<compile_context>
chip_gen: v6e
topology: v6e:2x2x1
jax: 0.10.0
libtpu: 0.0.40
codegen_flags: <defaults>
</compile_context>

<pallas_src>
import jax
import jax.numpy as jnp
from jax import lax
from jax.experimental import pallas as pl
from jax.experimental.pallas import tpu as pltpu

EPS = 1e-5
LANE = 128


# --------------------------------------------------------------------------
# small helpers
# --------------------------------------------------------------------------
def _rup(x, m):
    return (x + m - 1) // m * m


def _pick_row_tile(rows, per_row_bytes, vmem_budget=12 * 1024 * 1024,
                   target=4096):
    """Largest divisor of `rows` that is a multiple of 8, fits the VMEM byte
    budget and leaves >= 4 grid steps for DMA/compute overlap.  Falls back to
    the full extent (always a legal block dim)."""
    cap = min(target, vmem_budget // max(per_row_bytes, 1), max(8, rows // 4))
    cap = max(cap, 8)
    for t in range(min(cap, rows), 7, -1):
        if rows % t == 0 and t % 8 == 0:
            return t
    return rows


def _cparams():
    # 32 MiB is safe on every generation (v7x physical VMEM is 64 MiB).
    return pltpu.CompilerParams(
        dimension_semantics=("parallel",),
        vmem_limit_bytes=32 * 1024 * 1024)


def _pad_mat(w, rows, cols):
    w = jnp.pad(w, ((0, rows - w.shape[0]), (0, cols - w.shape[1])))
    return w.astype(jnp.bfloat16)


def _pad_vec(v, c, fill):
    v = v.astype(jnp.float32)
    if c > v.shape[0]:
        v = jnp.concatenate([v, jnp.full((c - v.shape[0],), fill, jnp.float32)])
    return v


def _tile_mean_m2(y):
    """Per-tile BN partials: (2, C) = [mean, sum((y-mean)^2)] in f32."""
    n = y.shape[0]
    mean = jnp.sum(y, axis=0, keepdims=True) * (1.0 / n)
    d = y - mean
    m2 = jnp.sum(d * d, axis=0, keepdims=True)
    return jnp.concatenate([mean, m2], axis=0)


def _bn_scale_shift(st, total_count, gamma, beta):
    """Chan-style combine of per-tile (mean, M2) partials -> per-channel BN
    affine (scale, shift).  All tiles carry equal row counts."""
    g = st.shape[0]
    n_t = total_count // g
    tmean = st[:, 0, :]
    tm2 = st[:, 1, :]
    mean = jnp.mean(tmean, axis=0)
    m2 = jnp.sum(tm2, axis=0) + n_t * jnp.sum((tmean - mean) ** 2, axis=0)
    var = jnp.maximum(m2 / total_count, 0.0)        # biased variance
    scale = gamma * lax.rsqrt(var + EPS)
    shift = beta - mean * scale
    return scale.reshape(1, -1), shift.reshape(1, -1)


# --------------------------------------------------------------------------
# stage 1: 1x1 conv(s) (row-tiled matmul) + per-channel BN partials
# --------------------------------------------------------------------------
def _conv1x1_stats_kernel(x_ref, w_ref, y_ref, st_ref):
    y = jnp.dot(x_ref[...], w_ref[...], preferred_element_type=jnp.float32)
    y_ref[...] = y.astype(y_ref.dtype)
    st_ref[0] = _tile_mean_m2(y)


def _conv1x1_stats(x_rows, w_mat):
    R, K = x_rows.shape
    C = w_mat.shape[1]
    per_row = 4 * (K + C) + 4 * C
    tr = _pick_row_tile(R, per_row)
    g = R // tr
    return pl.pallas_call(
        _conv1x1_stats_kernel,
        grid=(g,),
        in_specs=[pl.BlockSpec((tr, K), lambda i: (i, 0)),
                  pl.BlockSpec((K, C), lambda i: (0, 0))],
        out_specs=(pl.BlockSpec((tr, C), lambda i: (i, 0)),
                   pl.BlockSpec((1, 2, C), lambda i: (i, 0, 0))),
        out_shape=(jax.ShapeDtypeStruct((R, C), jnp.bfloat16),
                   jax.ShapeDtypeStruct((g, 2, C), jnp.float32)),
        compiler_params=_cparams(),
    )(x_rows, w_mat)


def _dual_conv1x1_stats_kernel(x_ref, w1_ref, wd_ref, y_ref, r_ref,
                               st1_ref, std_ref):
    x = x_ref[...]
    y = jnp.dot(x, w1_ref[...], preferred_element_type=jnp.float32)
    r = jnp.dot(x, wd_ref[...], preferred_element_type=jnp.float32)
    y_ref[...] = y.astype(y_ref.dtype)
    r_ref[...] = r.astype(r_ref.dtype)
    st1_ref[0] = _tile_mean_m2(y)
    std_ref[0] = _tile_mean_m2(r)


def _dual_conv1x1_stats(x_rows, w1, wd):
    """conv1 + downsample conv fused (stride==1): x is read from HBM once."""
    R, K = x_rows.shape
    C1 = w1.shape[1]
    Cd = wd.shape[1]
    per_row = 4 * (K + C1 + Cd) + 4 * (C1 + Cd)
    tr = _pick_row_tile(R, per_row)
    g = R // tr
    return pl.pallas_call(
        _dual_conv1x1_stats_kernel,
        grid=(g,),
        in_specs=[pl.BlockSpec((tr, K), lambda i: (i, 0)),
                  pl.BlockSpec((K, C1), lambda i: (0, 0)),
                  pl.BlockSpec((K, Cd), lambda i: (0, 0))],
        out_specs=(pl.BlockSpec((tr, C1), lambda i: (i, 0)),
                   pl.BlockSpec((tr, Cd), lambda i: (i, 0)),
                   pl.BlockSpec((1, 2, C1), lambda i: (i, 0, 0)),
                   pl.BlockSpec((1, 2, Cd), lambda i: (i, 0, 0))),
        out_shape=(jax.ShapeDtypeStruct((R, C1), jnp.bfloat16),
                   jax.ShapeDtypeStruct((R, Cd), jnp.bfloat16),
                   jax.ShapeDtypeStruct((g, 2, C1), jnp.float32),
                   jax.ShapeDtypeStruct((g, 2, Cd), jnp.float32)),
        compiler_params=_cparams(),
    )(x_rows, w1, wd)


# --------------------------------------------------------------------------
# stage 2: fused BN1+ReLU -> 3x3 conv (implicit im2col, K-stacked taps)
# --------------------------------------------------------------------------
def _make_conv2_kernel(H, W, stride, C1p, C2p):
    Ho = (H - 1) // stride + 1          # kernel 3, pad 1
    Wo = (W - 1) // stride + 1
    Hp2, Wp2 = H + 2, W + 2

    def kernel(y1_ref, w_ref, sc_ref, sh_ref, y_ref, st_ref, a_scr):
        # Build the 1-px zero halo in VMEM: zero the border ring, then write
        # the BN1+ReLU interior.  No HBM pad of y1, no mask multiply.
        zr = jnp.zeros((1, Wp2, C1p), jnp.float32)
        zc = jnp.zeros((Hp2, 1, C1p), jnp.float32)
        a_scr[0:1, :, :] = zr
        a_scr[Hp2 - 1:Hp2, :, :] = zr
        a_scr[:, 0:1, :] = zc
        a_scr[:, Wp2 - 1:Wp2, :] = zc
        a = y1_ref[0].astype(jnp.float32)                      # (H, W, C1p)
        a_scr[1:H + 1, 1:W + 1, :] = jnp.maximum(
            a * sc_ref[...] + sh_ref[...], 0.0)

        # 3x3 conv = 3 K-stacked matmuls (kw taps concatenated along K):
        # patch (Ho*Wo, 3*C1p) @ w_row (3*C1p, C2p), f32 accumulation on MXU.
        acc = None
        for kh in range(3):
            taps = []
            for kw in range(3):
                if stride == 1:
                    p = a_scr[kh:kh + Ho, kw:kw + Wo, :]
                else:
                    p = a_scr[pl.ds(kh, Ho, stride),
                              pl.ds(kw, Wo, stride), :]
                taps.append(p.astype(jnp.bfloat16))
            patch = jnp.concatenate(taps, axis=-1).reshape(Ho * Wo, 3 * C1p)
            d = jnp.dot(patch, w_ref[kh], preferred_element_type=jnp.float32)
            acc = d if acc is None else acc + d

        y_ref[0] = acc.astype(y_ref.dtype)
        st_ref[0] = _tile_mean_m2(acc)

    return kernel, Ho, Wo


def _conv3x3_fused(y1_nhwc, w2_rows, scale1, shift1, stride):
    N, H, W, C1p = y1_nhwc.shape
    C2p = w2_rows.shape[-1]
    kernel, Ho, Wo = _make_conv2_kernel(H, W, stride, C1p, C2p)
    Hp2, Wp2 = H + 2, W + 2
    y2, st2 = pl.pallas_call(
        kernel,
        grid=(N,),
        in_specs=[pl.BlockSpec((1, H, W, C1p), lambda n: (n, 0, 0, 0)),
                  pl.BlockSpec((3, 3 * C1p, C2p), lambda n: (0, 0, 0)),
                  pl.BlockSpec((1, C1p), lambda n: (0, 0)),
                  pl.BlockSpec((1, C1p), lambda n: (0, 0))],
        out_specs=(pl.BlockSpec((1, Ho * Wo, C2p), lambda n: (n, 0, 0)),
                   pl.BlockSpec((1, 2, C2p), lambda n: (n, 0, 0))),
        out_shape=(jax.ShapeDtypeStruct((N, Ho * Wo, C2p), jnp.bfloat16),
                   jax.ShapeDtypeStruct((N, 2, C2p), jnp.float32)),
        scratch_shapes=[pltpu.VMEM((Hp2, Wp2, C1p), jnp.float32)],
        compiler_params=_cparams(),
    )(y1_nhwc, w2_rows, scale1, shift1)
    return y2, st2, Ho, Wo


# --------------------------------------------------------------------------
# stage 3: fused BN2+ReLU -> conv3 (1x1)   [+ downsample when stride != 1]
# --------------------------------------------------------------------------
def _bnrelu_conv1x1_kernel(y2_ref, w3_ref, sc_ref, sh_ref, y3_ref, st_ref):
    z = jnp.maximum(y2_ref[...].astype(jnp.float32) * sc_ref[...] + sh_ref[...],
                    0.0)
    y3 = jnp.dot(z.astype(jnp.bfloat16), w3_ref[...],
                 preferred_element_type=jnp.float32)
    y3_ref[...] = y3.astype(y3_ref.dtype)
    st_ref[0] = _tile_mean_m2(y3)


def _bnrelu_conv1x1_stats(y2_rows, w3, scale2, shift2):
    R, C2p = y2_rows.shape
    Cop = w3.shape[1]
    per_row = 4 * (C2p + Cop) + 4 * (C2p + Cop)
    tr = _pick_row_tile(R, per_row)
    g = R // tr
    return pl.pallas_call(
        _bnrelu_conv1x1_kernel,
        grid=(g,),
        in_specs=[pl.BlockSpec((tr, C2p), lambda i: (i, 0)),
                  pl.BlockSpec((C2p, Cop), lambda i: (0, 0)),
                  pl.BlockSpec((1, C2p), lambda i: (0, 0)),
                  pl.BlockSpec((1, C2p), lambda i: (0, 0))],
        out_specs=(pl.BlockSpec((tr, Cop), lambda i: (i, 0)),
                   pl.BlockSpec((1, 2, Cop), lambda i: (i, 0, 0))),
        out_shape=(jax.ShapeDtypeStruct((R, Cop), jnp.bfloat16),
                   jax.ShapeDtypeStruct((g, 2, Cop), jnp.float32)),
        compiler_params=_cparams(),
    )(y2_rows, w3, scale2, shift2)


def _conv3_ds_kernel(y2_ref, xs_ref, w3_ref, wd_ref, sc_ref, sh_ref,
                     y3_ref, r_ref, st3_ref, std_ref):
    z = jnp.maximum(y2_ref[...].astype(jnp.float32) * sc_ref[...] + sh_ref[...],
                    0.0)
    y3 = jnp.dot(z.astype(jnp.bfloat16), w3_ref[...],
                 preferred_element_type=jnp.float32)
    r = jnp.dot(xs_ref[...], wd_ref[...], preferred_element_type=jnp.float32)
    y3_ref[...] = y3.astype(y3_ref.dtype)
    r_ref[...] = r.astype(r_ref.dtype)
    st3_ref[0] = _tile_mean_m2(y3)
    std_ref[0] = _tile_mean_m2(r)


def _conv3_downsample(y2_rows, xs_rows, w3, wd, scale2, shift2):
    R, C2p = y2_rows.shape
    Cinp = xs_rows.shape[1]
    Cop = w3.shape[1]
    per_row = 4 * (C2p + Cinp + 2 * Cop) + 8 * Cop
    tr = _pick_row_tile(R, per_row)
    g = R // tr
    return pl.pallas_call(
        _conv3_ds_kernel,
        grid=(g,),
        in_specs=[pl.BlockSpec((tr, C2p), lambda i: (i, 0)),
                  pl.BlockSpec((tr, Cinp), lambda i: (i, 0)),
                  pl.BlockSpec((C2p, Cop), lambda i: (0, 0)),
                  pl.BlockSpec((Cinp, Cop), lambda i: (0, 0)),
                  pl.BlockSpec((1, C2p), lambda i: (0, 0)),
                  pl.BlockSpec((1, C2p), lambda i: (0, 0))],
        out_specs=(pl.BlockSpec((tr, Cop), lambda i: (i, 0)),
                   pl.BlockSpec((tr, Cop), lambda i: (i, 0)),
                   pl.BlockSpec((1, 2, Cop), lambda i: (i, 0, 0)),
                   pl.BlockSpec((1, 2, Cop), lambda i: (i, 0, 0))),
        out_shape=(jax.ShapeDtypeStruct((R, Cop), jnp.bfloat16),
                   jax.ShapeDtypeStruct((R, Cop), jnp.bfloat16),
                   jax.ShapeDtypeStruct((g, 2, Cop), jnp.float32),
                   jax.ShapeDtypeStruct((g, 2, Cop), jnp.float32)),
        compiler_params=_cparams(),
    )(y2_rows, xs_rows, w3, wd, scale2, shift2)


# --------------------------------------------------------------------------
# stage 4: BN3(main) + BNd(residual) + add + ReLU
# --------------------------------------------------------------------------
def _bn_add_relu_kernel(y3_ref, r_ref, s3_ref, h3_ref, sd_ref, hd_ref, o_ref):
    y3 = y3_ref[...].astype(jnp.float32)
    r = r_ref[...].astype(jnp.float32)
    out = (y3 * s3_ref[...] + h3_ref[...]) + (r * sd_ref[...] + hd_ref[...])
    o_ref[...] = jnp.maximum(out, 0.0).astype(o_ref.dtype)


def _bn_add_relu(y3_rows, r_rows, sc3, sh3, scd, shd, out_dtype):
    R, Cop = y3_rows.shape
    ob = jnp.dtype(out_dtype).itemsize
    per_row = Cop * (4 * 2 + 2 * ob) + 8 * Cop
    tr = _pick_row_tile(R, per_row)
    g = R // tr
    row_spec = pl.BlockSpec((tr, Cop), lambda i: (i, 0))
    vec_spec = pl.BlockSpec((1, Cop), lambda i: (0, 0))
    return pl.pallas_call(
        _bn_add_relu_kernel,
        grid=(g,),
        in_specs=[row_spec, row_spec, vec_spec, vec_spec, vec_spec, vec_spec],
        out_specs=pl.BlockSpec((tr, Cop), lambda i: (i, 0)),
        out_shape=jax.ShapeDtypeStruct((R, Cop), out_dtype),
        compiler_params=_cparams(),
    )(y3_rows, r_rows, sc3, sh3, scd, shd)


# --------------------------------------------------------------------------
# Bottleneck forward
# --------------------------------------------------------------------------
def bottleneck_forward(x_nchw, params, stride=1, out_dtype=jnp.float32):
    N, Cin, H, W = x_nchw.shape
    C1 = params["w1"].shape[0]
    Cexp = params["w3"].shape[0]
    Cinp, C1p, Cexpp = _rup(Cin, LANE), _rup(C1, LANE), _rup(Cexp, LANE)

    # boundary layout glue: NCHW -> NHWC, lane-pad channels, bf16
    x = jnp.transpose(x_nchw, (0, 2, 3, 1)).astype(jnp.float32)
    x = jnp.pad(x, ((0, 0), (0, 0), (0, 0), (0, Cinp - Cin))).astype(jnp.bfloat16)

    w1 = _pad_mat(jnp.transpose(params["w1"][:, :, 0, 0], (1, 0)), Cinp, C1p)
    # 3x3 weights: (kh, kw, Cin, Cout), K-stacked per kh row -> (3, 3*C1p, C1p)
    w2 = jnp.transpose(params["w2"], (2, 3, 1, 0))
    w2 = jnp.pad(w2, ((0, 0), (0, 0), (0, C1p - C1), (0, C1p - C1)))
    w2 = w2.reshape(3, 3 * C1p, C1p).astype(jnp.bfloat16)
    w3 = _pad_mat(jnp.transpose(params["w3"][:, :, 0, 0], (1, 0)), C1p, Cexpp)
    wd = _pad_mat(jnp.transpose(params["wd"][:, :, 0, 0], (1, 0)), Cinp, Cexpp)

    g1, b1 = _pad_vec(params["g1"], C1p, 1.0), _pad_vec(params["b1"], C1p, 0.0)
    g2, b2 = _pad_vec(params["g2"], C1p, 1.0), _pad_vec(params["b2"], C1p, 0.0)
    g3, b3 = _pad_vec(params["g3"], Cexpp, 1.0), _pad_vec(params["b3"], Cexpp, 0.0)
    gd, bd = _pad_vec(params["gd"], Cexpp, 1.0), _pad_vec(params["bd"], Cexpp, 0.0)

    # stage 1: conv1 (and, for stride==1, the downsample conv) + BN partials
    R1 = N * H * W
    x_rows = x.reshape(R1, Cinp)
    if stride == 1:
        y1, r, st1, std = _dual_conv1x1_stats(x_rows, w1, wd)
    else:
        y1, st1 = _conv1x1_stats(x_rows, w1)
        r, std = None, None
    sc1, sh1 = _bn_scale_shift(st1, R1, g1, b1)

    # stage 2: BN1+ReLU -> conv2 (3x3, in-VMEM halo) + BN2 partials
    y2, st2, Ho, Wo = _conv3x3_fused(y1.reshape(N, H, W, C1p), w2, sc1, sh1,
                                     stride)
    R2 = N * Ho * Wo
    sc2, sh2 = _bn_scale_shift(st2, R2, g2, b2)

    # stage 3: BN2+ReLU -> conv3 (1x1)  [+ downsample when stride != 1]
    if stride == 1:
        y3, st3 = _bnrelu_conv1x1_stats(y2.reshape(R2, C1p), w3, sc2, sh2)
    else:
        # TODO(synk): express the stride-s sampling of x via the BlockSpec
        # index_map / in-kernel pl.ds instead of this XLA strided slice.
        xs = x[:, ::stride, ::stride, :]
        assert xs.shape[1:3] == (Ho, Wo)
        y3, r, st3, std = _conv3_downsample(y2.reshape(R2, C1p),
                                            xs.reshape(R2, Cinp),
                                            w3, wd, sc2, sh2)
    sc3, sh3 = _bn_scale_shift(st3, R2, g3, b3)
    scd, shd = _bn_scale_shift(std, R2, gd, bd)

    # stage 4: BN3(main) + BNd(residual) + add + ReLU
    out = _bn_add_relu(y3, r, sc3, sh3, scd, shd, out_dtype)

    out = out[:, :Cexp].reshape(N, Ho, Wo, Cexp)
    return jnp.transpose(out, (0, 3, 1, 2))            # back to NCHW


# --------------------------------------------------------------------------
# mixed-precision pure-JAX reference (bf16 conv inputs, f32 accumulation / BN)
# --------------------------------------------------------------------------
def _ref_conv(x, w, stride=1, padding=0):
    return lax.conv_general_dilated(
        x.astype(jnp.bfloat16), w.astype(jnp.bfloat16),
        window_strides=(stride, stride),
        padding=((padding, padding), (padding, padding)),
        dimension_numbers=("NCHW", "OIHW", "NCHW"),
        preferred_element_type=jnp.float32)


def _ref_bn(x, g, b):
    mean = jnp.mean(x, axis=(0, 2, 3), keepdims=True)
    var = jnp.mean((x - mean) ** 2, axis=(0, 2, 3), keepdims=True)
    return (x - mean) * lax.rsqrt(var + EPS) * g.reshape(1, -1, 1, 1) \
        + b.reshape(1, -1, 1, 1)


def bottleneck_reference(x, p, stride=1):
    y = jnp.maximum(_ref_bn(_ref_conv(x, p["w1"]), p["g1"], p["b1"]), 0.0)
    y = jnp.maximum(_ref_bn(_ref_conv(y, p["w2"], stride, 1), p["g2"], p["b2"]), 0.0)
    y = _ref_bn(_ref_conv(y, p["w3"]), p["g3"], p["b3"])
    r = _ref_bn(_ref_conv(x, p["wd"], stride), p["gd"], p["bd"])
    return jnp.maximum(y + r, 0.0)


# --------------------------------------------------------------------------
def make_params(key, in_channels, out_channels, expansion=4):
    ks = jax.random.split(key, 4)
    cexp = out_channels * expansion

    def conv_w(k, cout, cin, kh, kw):
        fan_in = cin * kh * kw
        bound = 1.0 / jnp.sqrt(fan_in)
        return jax.random.uniform(k, (cout, cin, kh, kw), jnp.float32,
                                  -bound, bound)

    return {
        "w1": conv_w(ks[0], out_channels, in_channels, 1, 1),
        "g1": jnp.ones((out_channels,), jnp.float32),
        "b1": jnp.zeros((out_channels,), jnp.float32),
        "w2": conv_w(ks[1], out_channels, out_channels, 3, 3),
        "g2": jnp.ones((out_channels,), jnp.float32),
        "b2": jnp.zeros((out_channels,), jnp.float32),
        "w3": conv_w(ks[2], cexp, out_channels, 1, 1),
        "g3": jnp.ones((cexp,), jnp.float32),
        "b3": jnp.zeros((cexp,), jnp.float32),
        "wd": conv_w(ks[3], cexp, in_channels, 1, 1),
        "gd": jnp.ones((cexp,), jnp.float32),
        "bd": jnp.zeros((cexp,), jnp.float32),
    }


if __name__ == "__main__":
    key = jax.random.PRNGKey(0)
    k_x, k_p = jax.random.split(key)

    N, Cin, H, W = 2, 4, 16, 16
    out_channels = 4
    stride = 1

    x = jax.random.normal(k_x, (N, Cin, H, W), jnp.float32)
    params = make_params(k_p, Cin, out_channels)

    fwd = jax.jit(bottleneck_forward, static_argnames=("stride",))
    out = jax.block_until_ready(fwd(x, params, stride=stride))
    ref = jax.block_until_ready(bottleneck_reference(x, params, stride=stride))

    assert out.shape == (N, out_channels * 4, H, W), out.shape
    # bf16 MXU inputs / f32 accumulation vs mixed-precision reference
    assert bool(jnp.allclose(out, ref, rtol=5e-2, atol=5e-2)), \
        float(jnp.max(jnp.abs(out - ref)))

    print("KERNEL_OK")
</pallas_src>

<mosaic_0001>
module attributes {stable_mosaic.version = 11 : i64} {
  func.func @_dual_conv1x1_stats_kernel(%arg0: i32, %arg1: memref<128x128xbf16, #tpu.memory_space<vmem>>, %arg2: memref<128x128xbf16, #tpu.memory_space<vmem>>, %arg3: memref<128x128xbf16, #tpu.memory_space<vmem>>, %arg4: memref<128x128xbf16, #tpu.memory_space<vmem>>, %arg5: memref<128x128xbf16, #tpu.memory_space<vmem>>, %arg6: memref<1x2x128xf32, #tpu.memory_space<vmem>>, %arg7: memref<1x2x128xf32, #tpu.memory_space<vmem>>) attributes {dimension_semantics = [#tpu.dimension_semantics<parallel>], iteration_bounds = array<i64: 4>, scalar_prefetch = 0 : i64, scratch_operands = 0 : i64, tpu.core_type = #tpu.core_type<tc>, window_params = [{transform_indices = @transform_0, window_bounds = array<i64: 128, 128>}, {pipeline_mode = #tpu.pipeline_mode<synchronous>, transform_indices = @transform_1, window_bounds = array<i64: 128, 128>}, {pipeline_mode = #tpu.pipeline_mode<synchronous>, transform_indices = @transform_2, window_bounds = array<i64: 128, 128>}, {transform_indices = @transform_3, window_bounds = array<i64: 128, 128>}, {transform_indices = @transform_4, window_bounds = array<i64: 128, 128>}, {transform_indices = @transform_5, window_bounds = array<i64: 1, 2, 128>}, {transform_indices = @transform_6, window_bounds = array<i64: 1, 2, 128>}]} {
    %c0 = arith.constant 0 : index
    %c0_0 = arith.constant 0 : index
    %0 = vector.load %arg1[%c0, %c0_0] : memref<128x128xbf16, #tpu.memory_space<vmem>>, vector<128x128xbf16>
    %c0_1 = arith.constant 0 : index
    %c0_2 = arith.constant 0 : index
    %1 = vector.load %arg2[%c0_1, %c0_2] : memref<128x128xbf16, #tpu.memory_space<vmem>>, vector<128x128xbf16>
    %cst = arith.constant dense<0.000000e+00> : vector<128x128xf32>
    %2 = tpu.matmul %0, %1, %cst {dimension_numbers = #tpu.dot_dimension_numbers<[1], [0], [0], [1], [0, 0, 1, 1], [], []>} : vector<128x128xbf16>, vector<128x128xbf16>, vector<128x128xf32> -> vector<128x128xf32>
    %c0_3 = arith.constant 0 : index
    %c0_4 = arith.constant 0 : index
    %3 = vector.load %arg3[%c0_3, %c0_4] : memref<128x128xbf16, #tpu.memory_space<vmem>>, vector<128x128xbf16>
    %cst_5 = arith.constant dense<0.000000e+00> : vector<128x128xf32>
    %4 = tpu.matmul %0, %3, %cst_5 {dimension_numbers = #tpu.dot_dimension_numbers<[1], [0], [0], [1], [0, 0, 1, 1], [], []>} : vector<128x128xbf16>, vector<128x128xbf16>, vector<128x128xf32> -> vector<128x128xf32>
    %5 = arith.truncf %2 : vector<128x128xf32> to vector<128x128xbf16>
    %c0_6 = arith.constant 0 : index
    %c0_7 = arith.constant 0 : index
    %6 = vector.load %arg4[%c0_6, %c0_7] : memref<128x128xbf16, #tpu.memory_space<vmem>>, vector<128x128xbf16>
    tpu.vector_store %arg4[%c0_6, %c0_7], %5 {strides = array<i32>} : memref<128x128xbf16, #tpu.memory_space<vmem>>, vector<128x128xbf16>,
    %7 = arith.truncf %4 : vector<128x128xf32> to vector<128x128xbf16>
    %c0_8 = arith.constant 0 : index
    %c0_9 = arith.constant 0 : index
    %8 = vector.load %arg5[%c0_8, %c0_9] : memref<128x128xbf16, #tpu.memory_space<vmem>>, vector<128x128xbf16>
    tpu.vector_store %arg5[%c0_8, %c0_9], %7 {strides = array<i32>} : memref<128x128xbf16, #tpu.memory_space<vmem>>, vector<128x128xbf16>,
    %cst_10 = arith.constant dense<0.000000e+00> : vector<128xf32>
    %9 = vector.multi_reduction <add>, %2, %cst_10 [0] : vector<128x128xf32> to vector<128xf32>
    %10 = vector.shape_cast %9 : vector<128xf32> to vector<1x128xf32>
    %cst_11 = arith.constant 7.812500e-03 : f32
    %11 = vector.broadcast %cst_11 : f32 to vector<1x128xf32>
    %12 = arith.mulf %10, %11 : vector<1x128xf32>
    %13 = vector.broadcast %12 : vector<1x128xf32> to vector<128x128xf32>
    %14 = arith.subf %2, %13 : vector<128x128xf32>
    %15 = arith.mulf %14, %14 : vector<128x128xf32>
    %cst_12 = arith.constant dense<0.000000e+00> : vector<128xf32>
    %16 = vector.multi_reduction <add>, %15, %cst_12 [0] : vector<128x128xf32> to vector<128xf32>
    %17 = vector.shape_cast %16 : vector<128xf32> to vector<1x128xf32>
    %18 = tpu.concatenate %12, %17 in 0 : vector<1x128xf32>, vector<1x128xf32> -> vector<2x128xf32>
    %c0_13 = arith.constant 0 : index
    %c0_14 = arith.constant 0 : index
    %c0_15 = arith.constant 0 : index
    %19 = vector.load %arg6[%c0_13, %c0_14, %c0_15] : memref<1x2x128xf32, #tpu.memory_space<vmem>>, vector<1x2x128xf32>
    %20 = vector.shape_cast %19 : vector<1x2x128xf32> to vector<2x128xf32>
    %21 = vector.shape_cast %18 : vector<2x128xf32> to vector<1x2x128xf32>
    tpu.vector_store %arg6[%c0_13, %c0_14, %c0_15], %21 {strides = array<i32>} : memref<1x2x128xf32, #tpu.memory_space<vmem>>, vector<1x2x128xf32>,
    %cst_16 = arith.constant dense<0.000000e+00> : vector<128xf32>
    %22 = vector.multi_reduction <add>, %4, %cst_16 [0] : vector<128x128xf32> to vector<128xf32>
    %23 = vector.shape_cast %22 : vector<128xf32> to vector<1x128xf32>
    %cst_17 = arith.constant 7.812500e-03 : f32
    %24 = vector.broadcast %cst_17 : f32 to vector<1x128xf32>
    %25 = arith.mulf %23, %24 : vector<1x128xf32>
    %26 = vector.broadcast %25 : vector<1x128xf32> to vector<128x128xf32>
    %27 = arith.subf %4, %26 : vector<128x128xf32>
    %28 = arith.mulf %27, %27 : vector<128x128xf32>
    %cst_18 = arith.constant dense<0.000000e+00> : vector<128xf32>
    %29 = vector.multi_reduction <add>, %28, %cst_18 [0] : vector<128x128xf32> to vector<128xf32>
    %30 = vector.shape_cast %29 : vector<128xf32> to vector<1x128xf32>
    %31 = tpu.concatenate %25, %30 in 0 : vector<1x128xf32>, vector<1x128xf32> -> vector<2x128xf32>
    %c0_19 = arith.constant 0 : index
    %c0_20 = arith.constant 0 : index
    %c0_21 = arith.constant 0 : index
    %32 = vector.load %arg7[%c0_19, %c0_20, %c0_21] : memref<1x2x128xf32, #tpu.memory_space<vmem>>, vector<1x2x128xf32>
    %33 = vector.shape_cast %32 : vector<1x2x128xf32> to vector<2x128xf32>
    %34 = vector.shape_cast %31 : vector<2x128xf32> to vector<1x2x128xf32>
    tpu.vector_store %arg7[%c0_19, %c0_20, %c0_21], %34 {strides = array<i32>} : memref<1x2x128xf32, #tpu.memory_space<vmem>>, vector<1x2x128xf32>,
    return
  }
  func.func @transform_0(%arg0: i32) -> (i32, i32) {
    %c0_i32 = arith.constant 0 : i32
    %c0_i32_0 = arith.constant 0 : i32
    return %arg0, %c0_i32 : i32, i32
  }
  func.func @transform_1(%arg0: i32) -> (i32, i32) {
    %c0_i32 = arith.constant 0 : i32
    %c0_i32_0 = arith.constant 0 : i32
    %c0_i32_1 = arith.constant 0 : i32
    return %c0_i32, %c0_i32_0 : i32, i32
  }
  func.func @transform_2(%arg0: i32) -> (i32, i32) {
    %c0_i32 = arith.constant 0 : i32
    %c0_i32_0 = arith.constant 0 : i32
    %c0_i32_1 = arith.constant 0 : i32
    return %c0_i32, %c0_i32_0 : i32, i32
  }
  func.func @transform_3(%arg0: i32) -> (i32, i32) {
    %c0_i32 = arith.constant 0 : i32
    %c0_i32_0 = arith.constant 0 : i32
    return %arg0, %c0_i32 : i32, i32
  }
  func.func @transform_4(%arg0: i32) -> (i32, i32) {
    %c0_i32 = arith.constant 0 : i32
    %c0_i32_0 = arith.constant 0 : i32
    return %arg0, %c0_i32 : i32, i32
  }
  func.func @transform_5(%arg0: i32) -> (i32, i32, i32) {
    %c0_i32 = arith.constant 0 : i32
    %c0_i32_0 = arith.constant 0 : i32
    %c0_i32_1 = arith.constant 0 : i32
    return %arg0, %c0_i32, %c0_i32_0 : i32, i32, i32
  }
  func.func @transform_6(%arg0: i32) -> (i32, i32, i32) {
    %c0_i32 = arith.constant 0 : i32
    %c0_i32_0 = arith.constant 0 : i32
    %c0_i32_1 = arith.constant 0 : i32
    return %arg0, %c0_i32, %c0_i32_0 : i32, i32, i32
  }
}

module attributes {stable_mosaic.version = 11 : i64} {
  func.func @kernel(%arg0: i32, %arg1: memref<1x16x16x128xbf16, #tpu.memory_space<vmem>>, %arg2: memref<3x384x128xbf16, #tpu.memory_space<vmem>>, %arg3: memref<1x128xf32, #tpu.memory_space<vmem>>, %arg4: memref<1x128xf32, #tpu.memory_space<vmem>>, %arg5: memref<1x256x128xbf16, #tpu.memory_space<vmem>>, %arg6: memref<1x2x128xf32, #tpu.memory_space<vmem>>, %arg7: memref<18x18x128xf32, #tpu.memory_space<vmem>>) attributes {dimension_semantics = [#tpu.dimension_semantics<parallel>], iteration_bounds = array<i64: 2>, scalar_prefetch = 0 : i64, scratch_operands = 1 : i64, tpu.core_type = #tpu.core_type<tc>, window_params = [{transform_indices = @transform_0, window_bounds = array<i64: 1, 16, 16, 128>}, {pipeline_mode = #tpu.pipeline_mode<synchronous>, transform_indices = @transform_1, window_bounds = array<i64: 3, 384, 128>}, {pipeline_mode = #tpu.pipeline_mode<synchronous>, transform_indices = @transform_2, window_bounds = array<i64: 1, 128>}, {pipeline_mode = #tpu.pipeline_mode<synchronous>, transform_indices = @transform_3, window_bounds = array<i64: 1, 128>}, {transform_indices = @transform_4, window_bounds = array<i64: 1, 256, 128>}, {transform_indices = @transform_5, window_bounds = array<i64: 1, 2, 128>}]} {
    %cst = arith.constant 0.000000e+00 : f32
    %0 = vector.broadcast %cst : f32 to vector<1x18x128xf32>
    %cst_0 = arith.constant 0.000000e+00 : f32
    %1 = vector.broadcast %cst_0 : f32 to vector<18x1x128xf32>
    %c0 = arith.constant 0 : index
    %c0_1 = arith.constant 0 : index
    %c0_2 = arith.constant 0 : index
    %2 = vector.load %arg7[%c0, %c0_1, %c0_2] : memref<18x18x128xf32, #tpu.memory_space<vmem>>, vector<1x18x128xf32>
    tpu.vector_store %arg7[%c0, %c0_1, %c0_2], %0 {strides = array<i32>} : memref<18x18x128xf32, #tpu.memory_space<vmem>>, vector<1x18x128xf32>,
    %c17 = arith.constant 17 : index
    %c0_3 = arith.constant 0 : index
    %c0_4 = arith.constant 0 : index
    %3 = vector.load %arg7[%c17, %c0_3, %c0_4] : memref<18x18x128xf32, #tpu.memory_space<vmem>>, vector<1x18x128xf32>
    tpu.vector_store %arg7[%c17, %c0_3, %c0_4], %0 {strides = array<i32>} : memref<18x18x128xf32, #tpu.memory_space<vmem>>, vector<1x18x128xf32>,
    %c0_5 = arith.constant 0 : index
    %c0_6 = arith.constant 0 : index
    %c0_7 = arith.constant 0 : index
    %4 = vector.load %arg7[%c0_5, %c0_6, %c0_7] : memref<18x18x128xf32, #tpu.memory_space<vmem>>, vector<18x1x128xf32>
    tpu.vector_store %arg7[%c0_5, %c0_6, %c0_7], %1 {strides = array<i32>} : memref<18x18x128xf32, #tpu.memory_space<vmem>>, vector<18x1x128xf32>,
    %c0_8 = arith.constant 0 : index
    %c17_9 = arith.constant 17 : index
    %c0_10 = arith.constant 0 : index
    %5 = vector.load %arg7[%c0_8, %c17_9, %c0_10] : memref<18x18x128xf32, #tpu.memory_space<vmem>>, vector<18x1x128xf32>
    tpu.vector_store %arg7[%c0_8, %c17_9, %c0_10], %1 {strides = array<i32>} : memref<18x18x128xf32, #tpu.memory_space<vmem>>, vector<18x1x128xf32>,
    %c0_11 = arith.constant 0 : index
    %c0_12 = arith.constant 0 : index
    %c0_13 = arith.constant 0 : index
    %c0_14 = arith.constant 0 : index
    %6 = vector.load %arg1[%c0_11, %c0_12, %c0_13, %c0_14] : memref<1x16x16x128xbf16, #tpu.memory_space<vmem>>, vector<1x16x16x128xbf16>
    %7 = vector.shape_cast %6 : vector<1x16x16x128xbf16> to vector<16x16x128xbf16>
    %8 = arith.extf %7 : vector<16x16x128xbf16> to vector<16x16x128xf32>
    %c0_15 = arith.constant 0 : index
    %c0_16 = arith.constant 0 : index
    %9 = vector.load %arg3[%c0_15, %c0_16] : memref<1x128xf32, #tpu.memory_space<vmem>>, vector<1x128xf32>
    %10 = vector.shape_cast %9 : vector<1x128xf32> to vector<1x1x128xf32>
    %11 = vector.broadcast %10 : vector<1x1x128xf32> to vector<16x16x128xf32>
    %12 = arith.mulf %8, %11 : vector<16x16x128xf32>
    %c0_17 = arith.constant 0 : index
    %c0_18 = arith.constant 0 : index
    %13 = vector.load %arg4[%c0_17, %c0_18] : memref<1x128xf32, #tpu.memory_space<vmem>>, vector<1x128xf32>
    %14 = vector.shape_cast %13 : vector<1x128xf32> to vector<1x1x128xf32>
    %15 = vector.broadcast %14 : vector<1x1x128xf32> to vector<16x16x128xf32>
    %16 = arith.addf %12, %15 : vector<16x16x128xf32>
    %cst_19 = arith.constant 0.000000e+00 : f32
    %17 = vector.broadcast %cst_19 : f32 to vector<16x16x128xf32>
    %18 = arith.maximumf %16, %17 : vector<16x16x128xf32>
    %c1 = arith.constant 1 : index
    %c1_20 = arith.constant 1 : index
    %c0_21 = arith.constant 0 : index
    %19 = vector.load %arg7[%c1, %c1_20, %c0_21] : memref<18x18x128xf32, #tpu.memory_space<vmem>>, vector<16x16x128xf32>
    tpu.vector_store %arg7[%c1, %c1_20, %c0_21], %18 {strides = array<i32>} : memref<18x18x128xf32, #tpu.memory_space<vmem>>, vector<16x16x128xf32>,
    %c0_22 = arith.constant 0 : index
    %c0_23 = arith.constant 0 : index
    %c0_24 = arith.constant 0 : index
    %20 = vector.load %arg7[%c0_22, %c0_23, %c0_24] : memref<18x18x128xf32, #tpu.memory_space<vmem>>, vector<16x16x128xf32>
    %21 = arith.truncf %20 : vector<16x16x128xf32> to vector<16x16x128xbf16>
    %c0_25 = arith.constant 0 : index
    %c1_26 = arith.constant 1 : index
    %c0_27 = arith.constant 0 : index
    %22 = vector.load %arg7[%c0_25, %c1_26, %c0_27] : memref<18x18x128xf32, #tpu.memory_space<vmem>>, vector<16x16x128xf32>
    %23 = arith.truncf %22 : vector<16x16x128xf32> to vector<16x16x128xbf16>
    %c0_28 = arith.constant 0 : index
    %c2 = arith.constant 2 : index
    %c0_29 = arith.constant 0 : index
    %24 = vector.load %arg7[%c0_28, %c2, %c0_29] : memref<18x18x128xf32, #tpu.memory_space<vmem>>, vector<16x16x128xf32>
    %25 = arith.truncf %24 : vector<16x16x128xf32> to vector<16x16x128xbf16>
    %26 = tpu.concatenate %21, %23, %25 in 2 : vector<16x16x128xbf16>, vector<16x16x128xbf16>, vector<16x16x128xbf16> -> vector<16x16x384xbf16>
    %27 = vector.shape_cast %26 : vector<16x16x384xbf16> to vector<256x384xbf16>
    %c0_30 = arith.constant 0 : index
    %c0_31 = arith.constant 0 : index
    %c0_32 = arith.constant 0 : index
    %28 = vector.load %arg2[%c0_30, %c0_31, %c0_32] : memref<3x384x128xbf16, #tpu.memory_space<vmem>>, vector<1x384x128xbf16>
    %29 = vector.shape_cast %28 : vector<1x384x128xbf16> to vector<384x128xbf16>
    %cst_33 = arith.constant dense<0.000000e+00> : vector<256x128xf32>
    %30 = tpu.matmul %27, %29, %cst_33 {dimension_numbers = #tpu.dot_dimension_numbers<[1], [0], [0], [1], [0, 0, 1, 1], [], []>} : vector<256x384xbf16>, vector<384x128xbf16>, vector<256x128xf32> -> vector<256x128xf32>
    %c1_34 = arith.constant 1 : index
    %c0_35 = arith.constant 0 : index
    %c0_36 = arith.constant 0 : index
    %31 = vector.load %arg7[%c1_34, %c0_35, %c0_36] : memref<18x18x128xf32, #tpu.memory_space<vmem>>, vector<16x16x128xf32>
    %32 = arith.truncf %31 : vector<16x16x128xf32> to vector<16x16x128xbf16>
    %c1_37 = arith.constant 1 : index
    %c1_38 = arith.constant 1 : index
    %c0_39 = arith.constant 0 : index
    %33 = vector.load %arg7[%c1_37, %c1_38, %c0_39] : memref<18x18x128xf32, #tpu.memory_space<vmem>>, vector<16x16x128xf32>
    %34 = arith.truncf %33 : vector<16x16x128xf32> to vector<16x16x128xbf16>
    %c1_40 = arith.constant 1 : index
    %c2_41 = arith.constant 2 : index
    %c0_42 = arith.constant 0 : index
    %35 = vector.load %arg7[%c1_40, %c2_41, %c0_42] : memref<18x18x128xf32, #tpu.memory_space<vmem>>, vector<16x16x128xf32>
    %36 = arith.truncf %35 : vector<16x16x128xf32> to vector<16x16x128xbf16>
    %37 = tpu.concatenate %32, %34, %36 in 2 : vector<16x16x128xbf16>, vector<16x16x128xbf16>, vector<16x16x128xbf16> -> vector<16x16x384xbf16>
    %38 = vector.shape_cast %37 : vector<16x16x384xbf16> to vector<256x384xbf16>
    %c1_43 = arith.constant 1 : index
    %c0_44 = arith.constant 0 : index
    %c0_45 = arith.constant 0 : index
    %39 = vector.load %arg2[%c1_43, %c0_44, %c0_45] : memref<3x384x128xbf16, #tpu.memory_space<vmem>>, vector<1x384x128xbf16>
    %40 = vector.shape_cast %39 : vector<1x384x128xbf16> to vector<384x128xbf16>
    %cst_46 = arith.constant dense<0.000000e+00> : vector<256x128xf32>
    %41 = tpu.matmul %38, %40, %cst_46 {dimension_numbers = #tpu.dot_dimension_numbers<[1], [0], [0], [1], [0, 0, 1, 1], [], []>} : vector<256x384xbf16>, vector<384x128xbf16>, vector<256x128xf32> -> vector<256x128xf32>
    %42 = arith.addf %30, %41 : vector<256x128xf32>
    %c2_47 = arith.constant 2 : index
    %c0_48 = arith.constant 0 : index
    %c0_49 = arith.constant 0 : index
    %43 = vector.load %arg7[%c2_47, %c0_48, %c0_49] : memref<18x18x128xf32, #tpu.memory_space<vmem>>, vector<16x16x128xf32>
    %44 = arith.truncf %43 : vector<16x16x128xf32> to vector<16x16x128xbf16>
    %c2_50 = arith.constant 2 : index
    %c1_51 = arith.constant 1 : index
    %c0_52 = arith.constant 0 : index
    %45 = vector.load %arg7[%c2_50, %c1_51, %c0_52] : memref<18x18x128xf32, #tpu.memory_space<vmem>>, vector<16x16x128xf32>
    %46 = arith.truncf %45 : vector<16x16x128xf32> to vector<16x16x128xbf16>
    %c2_53 = arith.constant 2 : index
    %c2_54 = arith.constant 2 : index
    %c0_55 = arith.constant 0 : index
    %47 = vector.load %arg7[%c2_53, %c2_54, %c0_55] : memref<18x18x128xf32, #tpu.memory_space<vmem>>, vector<16x16x128xf32>
    %48 = arith.truncf %47 : vector<16x16x128xf32> to vector<16x16x128xbf16>
    %49 = tpu.concatenate %44, %46, %48 in 2 : vector<16x16x128xbf16>, vector<16x16x128xbf16>, vector<16x16x128xbf16> -> vector<16x16x384xbf16>
    %50 = vector.shape_cast %49 : vector<16x16x384xbf16> to vector<256x384xbf16>
    %c2_56 = arith.constant 2 : index
    %c0_57 = arith.constant 0 : index
    %c0_58 = arith.constant 0 : index
    %51 = vector.load %arg2[%c2_56, %c0_57, %c0_58] : memref<3x384x128xbf16, #tpu.memory_space<vmem>>, vector<1x384x128xbf16>
    %52 = vector.shape_cast %51 : vector<1x384x128xbf16> to vector<384x128xbf16>
    %cst_59 = arith.constant dense<0.000000e+00> : vector<256x128xf32>
    %53 = tpu.matmul %50, %52, %cst_59 {dimension_numbers = #tpu.dot_dimension_numbers<[1], [0], [0], [1], [0, 0, 1, 1], [], []>} : vector<256x384xbf16>, vector<384x128xbf16>, vector<256x128xf32> -> vector<256x128xf32>
    %54 = arith.addf %42, %53 : vector<256x128xf32>
    %55 = arith.truncf %54 : vector<256x128xf32> to vector<256x128xbf16>
    %c0_60 = arith.constant 0 : index
    %c0_61 = arith.constant 0 : index
    %c0_62 = arith.constant 0 : index
    %56 = vector.load %arg5[%c0_60, %c0_61, %c0_62] : memref<1x256x128xbf16, #tpu.memory_space<vmem>>, vector<1x256x128xbf16>
    %57 = vector.shape_cast %56 : vector<1x256x128xbf16> to vector<256x128xbf16>
    %58 = vector.shape_cast %55 : vector<256x128xbf16> to vector<1x256x128xbf16>
    tpu.vector_store %arg5[%c0_60, %c0_61, %c0_62], %58 {strides = array<i32>} : memref<1x256x128xbf16, #tpu.memory_space<vmem>>, vector<1x256x128xbf16>,
    %cst_63 = arith.constant dense<0.000000e+00> : vector<128xf32>
    %59 = vector.multi_reduction <add>, %54, %cst_63 [0] : vector<256x128xf32> to vector<128xf32>
    %60 = vector.shape_cast %59 : vector<128xf32> to vector<1x128xf32>
    %cst_64 = arith.constant 3.906250e-03 : f32
    %61 = vector.broadcast %cst_64 : f32 to vector<1x128xf32>
    %62 = arith.mulf %60, %61 : vector<1x128xf32>
    %63 = vector.broadcast %62 : vector<1x128xf32> to vector<256x128xf32>
    %64 = arith.subf %54, %63 : vector<256x128xf32>
    %65 = arith.mulf %64, %64 : vector<256x128xf32>
    %cst_65 = arith.constant dense<0.000000e+00> : vector<128xf32>
    %66 = vector.multi_reduction <add>, %65, %cst_65 [0] : vector<256x128xf32> to vector<128xf32>
    %67 = vector.shape_cast %66 : vector<128xf32> to vector<1x128xf32>
    %68 = tpu.concatenate %62, %67 in 0 : vector<1x128xf32>, vector<1x128xf32> -> vector<2x128xf32>
    %c0_66 = arith.constant 0 : index
    %c0_67 = arith.constant 0 : index
    %c0_68 = arith.constant 0 : index
    %69 = vector.load %arg6[%c0_66, %c0_67, %c0_68] : memref<1x2x128xf32, #tpu.memory_space<vmem>>, vector<1x2x128xf32>
    %70 = vector.shape_cast %69 : vector<1x2x128xf32> to vector<2x128xf32>
    %71 = vector.shape_cast %68 : vector<2x128xf32> to vector<1x2x128xf32>
    tpu.vector_store %arg6[%c0_66, %c0_67, %c0_68], %71 {strides = array<i32>} : memref<1x2x128xf32, #tpu.memory_space<vmem>>, vector<1x2x128xf32>,
    return
  }
  func.func @transform_0(%arg0: i32) -> (i32, i32, i32, i32) {
    %c0_i32 = arith.constant 0 : i32
    %c0_i32_0 = arith.constant 0 : i32
    %c0_i32_1 = arith.constant 0 : i32
    %c0_i32_2 = arith.constant 0 : i32
    return %arg0, %c0_i32, %c0_i32_0, %c0_i32_1 : i32, i32, i32, i32
  }
  func.func @transform_1(%arg0: i32) -> (i32, i32, i32) {
    %c0_i32 = arith.constant 0 : i32
    %c0_i32_0 = arith.constant 0 : i32
    %c0_i32_1 = arith.constant 0 : i32
    %c0_i32_2 = arith.constant 0 : i32
    return %c0_i32, %c0_i32_0, %c0_i32_1 : i32, i32, i32
  }
  func.func @transform_2(%arg0: i32) -> (i32, i32) {
    %c0_i32 = arith.constant 0 : i32
    %c0_i32_0 = arith.constant 0 : i32
    %c0_i32_1 = arith.constant 0 : i32
    return %c0_i32, %c0_i32_0 : i32, i32
  }
  func.func @transform_3(%arg0: i32) -> (i32, i32) {
    %c0_i32 = arith.constant 0 : i32
    %c0_i32_0 = arith.constant 0 : i32
    %c0_i32_1 = arith.constant 0 : i32
    return %c0_i32, %c0_i32_0 : i32, i32
  }
  func.func @transform_4(%arg0: i32) -> (i32, i32, i32) {
    %c0_i32 = arith.constant 0 : i32
    %c0_i32_0 = arith.constant 0 : i32
    %c0_i32_1 = arith.constant 0 : i32
    return %arg0, %c0_i32, %c0_i32_0 : i32, i32, i32
  }
  func.func @transform_5(%arg0: i32) -> (i32, i32, i32) {
    %c0_i32 = arith.constant 0 : i32
    %c0_i32_0 = arith.constant 0 : i32
    %c0_i32_1 = arith.constant 0 : i32
    return %arg0, %c0_i32, %c0_i32_0 : i32, i32, i32
  }
}

module attributes {stable_mosaic.version = 11 : i64} {
  func.func @_bnrelu_conv1x1_kernel(%arg0: i32, %arg1: memref<128x128xbf16, #tpu.memory_space<vmem>>, %arg2: memref<128x128xbf16, #tpu.memory_space<vmem>>, %arg3: memref<1x128xf32, #tpu.memory_space<vmem>>, %arg4: memref<1x128xf32, #tpu.memory_space<vmem>>, %arg5: memref<128x128xbf16, #tpu.memory_space<vmem>>, %arg6: memref<1x2x128xf32, #tpu.memory_space<vmem>>) attributes {dimension_semantics = [#tpu.dimension_semantics<parallel>], iteration_bounds = array<i64: 4>, scalar_prefetch = 0 : i64, scratch_operands = 0 : i64, tpu.core_type = #tpu.core_type<tc>, window_params = [{transform_indices = @transform_0, window_bounds = array<i64: 128, 128>}, {pipeline_mode = #tpu.pipeline_mode<synchronous>, transform_indices = @transform_1, window_bounds = array<i64: 128, 128>}, {pipeline_mode = #tpu.pipeline_mode<synchronous>, transform_indices = @transform_2, window_bounds = array<i64: 1, 128>}, {pipeline_mode = #tpu.pipeline_mode<synchronous>, transform_indices = @transform_3, window_bounds = array<i64: 1, 128>}, {transform_indices = @transform_4, window_bounds = array<i64: 128, 128>}, {transform_indices = @transform_5, window_bounds = array<i64: 1, 2, 128>}]} {
    %c0 = arith.constant 0 : index
    %c0_0 = arith.constant 0 : index
    %0 = vector.load %arg1[%c0, %c0_0] : memref<128x128xbf16, #tpu.memory_space<vmem>>, vector<128x128xbf16>
    %1 = arith.extf %0 : vector<128x128xbf16> to vector<128x128xf32>
    %c0_1 = arith.constant 0 : index
    %c0_2 = arith.constant 0 : index
    %2 = vector.load %arg3[%c0_1, %c0_2] : memref<1x128xf32, #tpu.memory_space<vmem>>, vector<1x128xf32>
    %3 = vector.broadcast %2 : vector<1x128xf32> to vector<128x128xf32>
    %4 = arith.mulf %1, %3 : vector<128x128xf32>
    %c0_3 = arith.constant 0 : index
    %c0_4 = arith.constant 0 : index
    %5 = vector.load %arg4[%c0_3, %c0_4] : memref<1x128xf32, #tpu.memory_space<vmem>>, vector<1x128xf32>
    %6 = vector.broadcast %5 : vector<1x128xf32> to vector<128x128xf32>
    %7 = arith.addf %4, %6 : vector<128x128xf32>
    %cst = arith.constant 0.000000e+00 : f32
    %8 = vector.broadcast %cst : f32 to vector<128x128xf32>
    %9 = arith.maximumf %7, %8 : vector<128x128xf32>
    %10 = arith.truncf %9 : vector<128x128xf32> to vector<128x128xbf16>
    %c0_5 = arith.constant 0 : index
    %c0_6 = arith.constant 0 : index
    %11 = vector.load %arg2[%c0_5, %c0_6] : memref<128x128xbf16, #tpu.memory_space<vmem>>, vector<128x128xbf16>
    %cst_7 = arith.constant dense<0.000000e+00> : vector<128x128xf32>
    %12 = tpu.matmul %10, %11, %cst_7 {dimension_numbers = #tpu.dot_dimension_numbers<[1], [0], [0], [1], [0, 0, 1, 1], [], []>} : vector<128x128xbf16>, vector<128x128xbf16>, vector<128x128xf32> -> vector<128x128xf32>
    %13 = arith.truncf %12 : vector<128x128xf32> to vector<128x128xbf16>
    %c0_8 = arith.constant 0 : index
    %c0_9 = arith.constant 0 : index
    %14 = vector.load %arg5[%c0_8, %c0_9] : memref<128x128xbf16, #tpu.memory_space<vmem>>, vector<128x128xbf16>
    tpu.vector_store %arg5[%c0_8, %c0_9], %13 {strides = array<i32>} : memref<128x128xbf16, #tpu.memory_space<vmem>>, vector<128x128xbf16>,
    %cst_10 = arith.constant dense<0.000000e+00> : vector<128xf32>
    %15 = vector.multi_reduction <add>, %12, %cst_10 [0] : vector<128x128xf32> to vector<128xf32>
    %16 = vector.shape_cast %15 : vector<128xf32> to vector<1x128xf32>
    %cst_11 = arith.constant 7.812500e-03 : f32
    %17 = vector.broadcast %cst_11 : f32 to vector<1x128xf32>
    %18 = arith.mulf %16, %17 : vector<1x128xf32>
    %19 = vector.broadcast %18 : vector<1x128xf32> to vector<128x128xf32>
    %20 = arith.subf %12, %19 : vector<128x128xf32>
    %21 = arith.mulf %20, %20 : vector<128x128xf32>
    %cst_12 = arith.constant dense<0.000000e+00> : vector<128xf32>
    %22 = vector.multi_reduction <add>, %21, %cst_12 [0] : vector<128x128xf32> to vector<128xf32>
    %23 = vector.shape_cast %22 : vector<128xf32> to vector<1x128xf32>
    %24 = tpu.concatenate %18, %23 in 0 : vector<1x128xf32>, vector<1x128xf32> -> vector<2x128xf32>
    %c0_13 = arith.constant 0 : index
    %c0_14 = arith.constant 0 : index
    %c0_15 = arith.constant 0 : index
    %25 = vector.load %arg6[%c0_13, %c0_14, %c0_15] : memref<1x2x128xf32, #tpu.memory_space<vmem>>, vector<1x2x128xf32>
    %26 = vector.shape_cast %25 : vector<1x2x128xf32> to vector<2x128xf32>
    %27 = vector.shape_cast %24 : vector<2x128xf32> to vector<1x2x128xf32>
    tpu.vector_store %arg6[%c0_13, %c0_14, %c0_15], %27 {strides = array<i32>} : memref<1x2x128xf32, #tpu.memory_space<vmem>>, vector<1x2x128xf32>,
    return
  }
  func.func @transform_0(%arg0: i32) -> (i32, i32) {
    %c0_i32 = arith.constant 0 : i32
    %c0_i32_0 = arith.constant 0 : i32
    return %arg0, %c0_i32 : i32, i32
  }
  func.func @transform_1(%arg0: i32) -> (i32, i32) {
    %c0_i32 = arith.constant 0 : i32
    %c0_i32_0 = arith.constant 0 : i32
    %c0_i32_1 = arith.constant 0 : i32
    return %c0_i32, %c0_i32_0 : i32, i32
  }
  func.func @transform_2(%arg0: i32) -> (i32, i32) {
    %c0_i32 = arith.constant 0 : i32
    %c0_i32_0 = arith.constant 0 : i32
    %c0_i32_1 = arith.constant 0 : i32
    return %c0_i32, %c0_i32_0 : i32, i32
  }
  func.func @transform_3(%arg0: i32) -> (i32, i32) {
    %c0_i32 = arith.constant 0 : i32
    %c0_i32_0 = arith.constant 0 : i32
    %c0_i32_1 = arith.constant 0 : i32
    return %c0_i32, %c0_i32_0 : i32, i32
  }
  func.func @transform_4(%arg0: i32) -> (i32, i32) {
    %c0_i32 = arith.constant 0 : i32
    %c0_i32_0 = arith.constant 0 : i32
    return %arg0, %c0_i32 : i32, i32
  }
  func.func @transform_5(%arg0: i32) -> (i32, i32, i32) {
    %c0_i32 = arith.constant 0 : i32
    %c0_i32_0 = arith.constant 0 : i32
    %c0_i32_1 = arith.constant 0 : i32
    return %arg0, %c0_i32, %c0_i32_0 : i32, i32, i32
  }
}

module attributes {stable_mosaic.version = 11 : i64} {
  func.func @_bn_add_relu_kernel(%arg0: i32, %arg1: memref<128x128xbf16, #tpu.memory_space<vmem>>, %arg2: memref<128x128xbf16, #tpu.memory_space<vmem>>, %arg3: memref<1x128xf32, #tpu.memory_space<vmem>>, %arg4: memref<1x128xf32, #tpu.memory_space<vmem>>, %arg5: memref<1x128xf32, #tpu.memory_space<vmem>>, %arg6: memref<1x128xf32, #tpu.memory_space<vmem>>, %arg7: memref<128x128xf32, #tpu.memory_space<vmem>>) attributes {dimension_semantics = [#tpu.dimension_semantics<parallel>], iteration_bounds = array<i64: 4>, scalar_prefetch = 0 : i64, scratch_operands = 0 : i64, tpu.core_type = #tpu.core_type<tc>, window_params = [{transform_indices = @transform_0, window_bounds = array<i64: 128, 128>}, {transform_indices = @transform_1, window_bounds = array<i64: 128, 128>}, {pipeline_mode = #tpu.pipeline_mode<synchronous>, transform_indices = @transform_2, window_bounds = array<i64: 1, 128>}, {pipeline_mode = #tpu.pipeline_mode<synchronous>, transform_indices = @transform_3, window_bounds = array<i64: 1, 128>}, {pipeline_mode = #tpu.pipeline_mode<synchronous>, transform_indices = @transform_4, window_bounds = array<i64: 1, 128>}, {pipeline_mode = #tpu.pipeline_mode<synchronous>, transform_indices = @transform_5, window_bounds = array<i64: 1, 128>}, {transform_indices = @transform_6, window_bounds = array<i64: 128, 128>}]} {
    %c0 = arith.constant 0 : index
    %c0_0 = arith.constant 0 : index
    %0 = vector.load %arg1[%c0, %c0_0] : memref<128x128xbf16, #tpu.memory_space<vmem>>, vector<128x128xbf16>
    %1 = arith.extf %0 : vector<128x128xbf16> to vector<128x128xf32>
    %c0_1 = arith.constant 0 : index
    %c0_2 = arith.constant 0 : index
    %2 = vector.load %arg2[%c0_1, %c0_2] : memref<128x128xbf16, #tpu.memory_space<vmem>>, vector<128x128xbf16>
    %3 = arith.extf %2 : vector<128x128xbf16> to vector<128x128xf32>
    %c0_3 = arith.constant 0 : index
    %c0_4 = arith.constant 0 : index
    %4 = vector.load %arg3[%c0_3, %c0_4] : memref<1x128xf32, #tpu.memory_space<vmem>>, vector<1x128xf32>
    %5 = vector.broadcast %4 : vector<1x128xf32> to vector<128x128xf32>
    %6 = arith.mulf %1, %5 : vector<128x128xf32>
    %c0_5 = arith.constant 0 : index
    %c0_6 = arith.constant 0 : index
    %7 = vector.load %arg4[%c0_5, %c0_6] : memref<1x128xf32, #tpu.memory_space<vmem>>, vector<1x128xf32>
    %8 = vector.broadcast %7 : vector<1x128xf32> to vector<128x128xf32>
    %9 = arith.addf %6, %8 : vector<128x128xf32>
    %c0_7 = arith.constant 0 : index
    %c0_8 = arith.constant 0 : index
    %10 = vector.load %arg5[%c0_7, %c0_8] : memref<1x128xf32, #tpu.memory_space<vmem>>, vector<1x128xf32>
    %11 = vector.broadcast %10 : vector<1x128xf32> to vector<128x128xf32>
    %12 = arith.mulf %3, %11 : vector<128x128xf32>
    %c0_9 = arith.constant 0 : index
    %c0_10 = arith.constant 0 : index
    %13 = vector.load %arg6[%c0_9, %c0_10] : memref<1x128xf32, #tpu.memory_space<vmem>>, vector<1x128xf32>
    %14 = vector.broadcast %13 : vector<1x128xf32> to vector<128x128xf32>
    %15 = arith.addf %12, %14 : vector<128x128xf32>
    %16 = arith.addf %9, %15 : vector<128x128xf32>
    %cst = arith.constant 0.000000e+00 : f32
    %17 = vector.broadcast %cst : f32 to vector<128x128xf32>
    %18 = arith.maximumf %16, %17 : vector<128x128xf32>
    %c0_11 = arith.constant 0 : index
    %c0_12 = arith.constant 0 : index
    %19 = vector.load %arg7[%c0_11, %c0_12] : memref<128x128xf32, #tpu.memory_space<vmem>>, vector<128x128xf32>
    tpu.vector_store %arg7[%c0_11, %c0_12], %18 {strides = array<i32>} : memref<128x128xf32, #tpu.memory_space<vmem>>, vector<128x128xf32>,
    return
  }
  func.func @transform_0(%arg0: i32) -> (i32, i32) {
    %c0_i32 = arith.constant 0 : i32
    %c0_i32_0 = arith.constant 0 : i32
    return %arg0, %c0_i32 : i32, i32
  }
  func.func @transform_1(%arg0: i32) -> (i32, i32) {
    %c0_i32 = arith.constant 0 : i32
    %c0_i32_0 = arith.constant 0 : i32
    return %arg0, %c0_i32 : i32, i32
  }
  func.func @transform_2(%arg0: i32) -> (i32, i32) {
    %c0_i32 = arith.constant 0 : i32
    %c0_i32_0 = arith.constant 0 : i32
    %c0_i32_1 = arith.constant 0 : i32
    return %c0_i32, %c0_i32_0 : i32, i32
  }
  func.func @transform_3(%arg0: i32) -> (i32, i32) {
    %c0_i32 = arith.constant 0 : i32
    %c0_i32_0 = arith.constant 0 : i32
    %c0_i32_1 = arith.constant 0 : i32
    return %c0_i32, %c0_i32_0 : i32, i32
  }
  func.func @transform_4(%arg0: i32) -> (i32, i32) {
    %c0_i32 = arith.constant 0 : i32
    %c0_i32_0 = arith.constant 0 : i32
    %c0_i32_1 = arith.constant 0 : i32
    return %c0_i32, %c0_i32_0 : i32, i32
  }
  func.func @transform_5(%arg0: i32) -> (i32, i32) {
    %c0_i32 = arith.constant 0 : i32
    %c0_i32_0 = arith.constant 0 : i32
    %c0_i32_1 = arith.constant 0 : i32
    return %c0_i32, %c0_i32_0 : i32, i32
  }
  func.func @transform_6(%arg0: i32) -> (i32, i32) {
    %c0_i32 = arith.constant 0 : i32
    %c0_i32_0 = arith.constant 0 : i32
    return %arg0, %c0_i32 : i32, i32
  }
}

</mosaic_0001>

<bundles_post_ra>
// kernel: bottleneck_forward.4
= control target key start
LH: loop header
LB: loop body
LE: loop exit
PB: predicated region body
PF: predicated region fallthrough
CT: control target
= control target key end

     0   :  { %s1511_s21 = smov 0   ;;  %s1823_s0 = inlined_call_operand.vmem [shape: bf16[512,128], index: 0, kind: input, shape index: {}]   ;;  %s1824_s1 = inlined_call_operand.vmem [shape: bf16[128,128], index: 1, kind: input, shape index: {}]   ;;  %s1825_s2 = inlined_call_operand.vmem [shape: bf16[128,128], index: 2, kind: input, shape index: {}]   ;;  %s1826_s3 = inlined_call_operand.vmem [shape: bf16[512,128], index: 3, kind: output, shape index: {0}]   ;;  %s1827_s4 = inlined_call_operand.vmem [shape: bf16[512,128], index: 4, kind: output, shape index: {1}]   ;;  %s1828_s5 = inlined_call_operand.vmem [shape: f32[4,2,128], index: 5, kind: output, shape index: {2}]   ;;  %s1829_s6 = inlined_call_operand.vmem [shape: f32[4,2,128], index: 6, kind: output, shape index: {3}]  }
   0x1 LB: > { %s1517_s22 = sadd.s32 4294967295, %s1474_s21   ;;  %p1147_p0 = scmp.ge.s32.totalorder %s1474_s21, 1  ;;  %s1474_s21 = sphi %s1511_s21, %s17_s21  }
   0x2   : > { %p220_p1 = scmp.lt.s32.totalorder %s1474_s21, 5 }
   0x4   : > { %p221_p2 = pnand %p1147_p0, %p220_p1 }
   0x5   : > { %s1148_s25 = sshll.u32 (!%p221_p2), %s1517_s22, 4  ;;  %p281_p4 = scmp.lt.s32.totalorder (!%p221_p2), %s1517_s22, 3 }
   0x6   : > { %224 = sbr.rel (%p221_p2) target bundleno = 337 (0x151), region = 32  ;;  %p264_p3 = scmp.lt.s32.totalorder (!%p221_p2), %s1148_s25, 63 }
   0xb   : > { %v1444_v0 = vld [vmem:[%s1824_s1 + $0x38] sm:$0xff]   ;;  %v1446_v2 = vld [vmem:[%s1824_s1 + $0x30] sm:$0xff]   ;;  %v1448_v4 = vld [vmem:[%s1824_s1 + $0x28] sm:$0xff]   ;;  %s1831_s25 = smov (!%p264_p3, %s1148_s25), 63  ;;  %s1833_s22 = smov (!%p281_p4, %s1517_s22), 3  ;;  %vm911_vm0 = vcmask 1040384  }
   0xc   : > { %v1445_v1 = vld [vmem:[%s1825_s2 + $0x38] sm:$0xff]   ;;  %1372 = vmatprep.subr.bf16.mxu0 %v1444_v0  ;;  %v1447_v3 = vld [vmem:[%s1825_s2 + $0x30] sm:$0xff]   ;;  %v1449_v5 = vld [vmem:[%s1825_s2 + $0x28] sm:$0xff]   ;;  %s1546_s16 = sshll.u32 %s1831_s25, 2 }
   0xd   : > { %1404 = vmatprep.subr.bf16.mxu1 %v1445_v1  ;;  %1373 = vmatpush3.bf16.msra.mxu0 %v1444_v0  ;;  %v1450_v6 = vld [vmem:[%s1824_s1 + $0x20] sm:$0xff]   ;;  %v1452_v8 = vld [vmem:[%s1824_s1 + $0x18] sm:$0xff]   ;;  %s1558_s26 = scalar_lea.vmem %s1823_s0, %s1546_s16  ;;  %v1454_v10 = vld [vmem:[%s1824_s1 + $0x10] sm:$0xff]   ;;  %s1598_s17 = scalar_lea.vmem %s1826_s3, %s1546_s16 }
   0xe   : > { %1405 = vmatpush3.bf16.msra.mxu1 %v1445_v1  ;;  %1374 = vmatprep.subr.bf16.mxu0 %v1446_v2  ;;  %v1451_v7 = vld [vmem:[%s1825_s2 + $0x20] sm:$0xff]   ;;  %v1453_v9 = vld [vmem:[%s1825_s2 + $0x18] sm:$0xff]   ;;  %v1455_v12 = vld [vmem:[%s1825_s2 + $0x10] sm:$0xff]   ;;  %s1608_s20 = scalar_lea.vmem %s1827_s4, %s1546_s16  ;;  %s1154_s16 = sshll.u32 %s1833_s22, 1 }
   0xf   : > { %1406 = vmatprep.subr.bf16.mxu1 %v1447_v3  ;;  %v1460_v11 = vld [vmem:[%s1558_s26] sm:$0xff]   ;;  %v1456_v13 = vld [vmem:[%s1824_s1 + $0x8] sm:$0xff]   ;;  %v1462_v18 = vld [vmem:[%s1558_s26 + $0x10] sm:$0xff]   ;;  %s288_s22 = scalar_lea.vmem %s1829_s6, %s1154_s16 }
  0x10   : > { %1388 = vmatprep.mubr.bf16.mxu0 %v1460_v11  ;;  %1420 = vmatprep.mubr.bf16.mxu1 %v1460_v11  ;;  %v1457_v14 = vld [vmem:[%s1825_s2 + $0x8] sm:$0xff]   ;;  %v1458_v15 = vld [vmem:[%s1824_s1] sm:$0xff]   ;;  %v1463_v19 = vld [vmem:[%s1558_s26 + $0x18] sm:$0xff]  }
  0x11   : > { %1375 = vmatpush3.bf16.msra.mxu0 %v1446_v2  ;;  %v1459_v16 = vld [vmem:[%s1825_s2] sm:$0xff]   ;;  %v1461_v17 = vld [vmem:[%s1558_s26 + $0x8] sm:$0xff]   ;;  %v1466_v22 = vld [vmem:[%s1558_s26 + $0x30] sm:$0xff]  }
  0x12   : > { %1407 = vmatpush3.bf16.msra.mxu1 %v1447_v3  ;;  %1376 = vmatprep.subr.bf16.mxu0 %v1448_v4  ;;  %v1464_v20 = vld [vmem:[%s1558_s26 + $0x20] sm:$0xff]   ;;  %v1465_v21 = vld [vmem:[%s1558_s26 + $0x28] sm:$0xff]   ;;  %v1467_v23 = vld [vmem:[%s1558_s26 + $0x38] sm:$0xff]   ;;  %s284_s26 = scalar_lea.vmem %s1828_s5, %s1154_s16 }
  0x13   : > { %1408 = vmatprep.subr.bf16.mxu1 %v1449_v5 }
  0x15   : > { %1377 = vmatpush3.bf16.msra.mxu0 %v1448_v4 }
  0x16   : > { %1409 = vmatpush3.bf16.msra.mxu1 %v1449_v5  ;;  %1378 = vmatprep.subr.bf16.mxu0 %v1450_v6 }
  0x17   : > { %1410 = vmatprep.subr.bf16.mxu1 %v1451_v7 }
  0x19   : > { %1379 = vmatpush3.bf16.msra.mxu0 %v1450_v6 }
  0x1a   : > { %1411 = vmatpush3.bf16.msra.mxu1 %v1451_v7  ;;  %1380 = vmatprep.subr.bf16.mxu0 %v1452_v8 }
  0x1b   : > { %1412 = vmatprep.subr.bf16.mxu1 %v1453_v9 }
  0x1d   : > { %1381 = vmatpush3.bf16.msra.mxu0 %v1452_v8 }
  0x1e   : > { %1413 = vmatpush3.bf16.msra.mxu1 %v1453_v9  ;;  %1382 = vmatprep.subr.bf16.mxu0 %v1454_v10 }
  0x1f   : > { %1414 = vmatprep.subr.bf16.mxu1 %v1455_v12 }
  0x21   : > { %1383 = vmatpush3.bf16.msra.mxu0 %v1454_v10 }
  0x22   : > { %1415 = vmatpush3.bf16.msra.mxu1 %v1455_v12  ;;  %1384 = vmatprep.subr.bf16.mxu0 %v1456_v13 }
  0x23   : > { %1416 = vmatprep.subr.bf16.mxu1 %v1457_v14 }
  0x25   : > { %1385 = vmatpush3.bf16.msra.mxu0 %v1456_v13 }
  0x26   : > { %1417 = vmatpush3.bf16.msra.mxu1 %v1457_v14  ;;  %1386 = vmatprep.subr.bf16.mxu0 %v1458_v15 }
  0x27   : > { %1418 = vmatprep.subr.bf16.mxu1 %v1459_v16 }
  0x29   : > { %1387 = vmatpush3.bf16.msra.mxu0 %v1458_v15 }
  0x2a   : > { %1419 = vmatpush3.bf16.msra.mxu1 %v1459_v16 }
  0x2c   : > { %1389 = vmatmul.mubr.bf16.vlgmr.msra.gmra.mxu0 %v1461_v17 }
  0x2d   : > { %1421 = vmatmul.mubr.bf16.vlgmr.msra.gmra.mxu1 %v1461_v17  ;;  %1392 = vmatprep.mubr.bf16.mxu0 %v1462_v18 }
  0x2e   : > { %1424 = vmatprep.mubr.bf16.mxu1 %v1462_v18 }
  0x34   : > { %1393 = vmatmul.mubr.bf16.gmra.mxu0 %v1463_v19 }
  0x35   : > { %1425 = vmatmul.mubr.bf16.gmra.mxu1 %v1463_v19  ;;  %1396 = vmatprep.mubr.bf16.mxu0 %v1464_v20 }
  0x36   : > { %1428 = vmatprep.mubr.bf16.mxu1 %v1464_v20 }
  0x3c   : > { %1397 = vmatmul.mubr.bf16.gmra.mxu0 %v1465_v21 }
  0x3d   : > { %1429 = vmatmul.mubr.bf16.gmra.mxu1 %v1465_v21  ;;  %1400 = vmatprep.mubr.bf16.mxu0 %v1466_v22 }
  0x3e   : > { %1432 = vmatprep.mubr.bf16.mxu1 %v1466_v22 }
  0x44   : > { %1401 = vmatmul.mubr.bf16.gmra.mxu0 %v1467_v23 }
  0x45   : > { %1433 = vmatmul.mubr.bf16.gmra.mxu1 %v1467_v23 }
  0xec   : > { %v1586_v24 = vpop.f32.mrf.mxu0 }
  0xed   : > { %v1588_v25 = vpop.f32.mrf.mxu1 }
  0xee   : > { %v1590_v26 = vpop.f32.mrf.mxu0 }
  0xef   : > { %v1592_v27 = vpop.f32.mrf.mxu1 }
  0xf0   : > { %v1600_v28 = vpop.f32.mrf.mxu0 }
  0xf1   : > { %v1254_v29 = vpack.c.bf16 %v1600_v28, %v1586_v24  ;;  %v1610_v30 = vpop.f32.mrf.mxu1 }
  0xf2   : > { %v1294_v31 = vpack.c.bf16 %v1610_v30, %v1588_v25  ;;  %v1614_v32 = vpop.f32.mrf.mxu0 }
  0xf3   : > { %1326 = vst [vmem:[%s1598_s17 + $0x8] sm:$0xff] %v1254_v29   ;;  %v1249_v33 = vpack.c.bf16 %v1614_v32, %v1590_v26  ;;  %v836_v34 = vadd.f32 %v1614_v32, %v1590_v26  ;;  %v1621_v35 = vpop.f32.mrf.mxu1 }
  0xf4   : > { %1333 = vst [vmem:[%s1608_s20 + $0x8] sm:$0xff] %v1294_v31   ;;  %v1289_v36 = vpack.c.bf16 %v1621_v35, %v1592_v27  ;;  %v914_v37 = vadd.f32 %v1621_v35, %v1592_v27  ;;  %v1628_v38 = vpop.f32.mrf.mxu0 }
  0xf5   : > { %1250 = vst [vmem:[%s1598_s17] sm:$0xff] %v1249_v33   ;;  %v837_v39 = vadd.f32 %v1586_v24, %v836_v34  ;;  %v1632_v40 = vpop.f32.mrf.mxu1 }
  0xf6   : > { %1290 = vst [vmem:[%s1608_s20] sm:$0xff] %v1289_v36   ;;  %v915_v41 = vadd.f32 %v1588_v25, %v914_v37  ;;  %v1636_v42 = vpop.f32.mrf.mxu0 }
  0xf7   : > { %v838_v43 = vadd.f32 %v1600_v28, %v837_v39  ;;  %v1639_v44 = vpop.f32.mrf.mxu1 }
  0xf8   : > { %v916_v45 = vadd.f32 %v1610_v30, %v915_v41  ;;  %v1642_v46 = vpop.f32.mrf.mxu0 }
  0xf9   : > { %v839_v47 = vadd.f32 %v838_v43, %v1636_v42  ;;  %v1264_v48 = vpack.c.bf16 %v1642_v46, %v1628_v38  ;;  %v1647_v49 = vpop.f32.mrf.mxu1 }
  0xfa   : > { %v917_v50 = vadd.f32 %v916_v45, %v1639_v44  ;;  %v1304_v51 = vpack.c.bf16 %v1647_v49, %v1632_v40  ;;  %v1652_v52 = vpop.f32.mrf.mxu0 }
  0xfb   : > { %1328 = vst [vmem:[%s1598_s17 + $0x18] sm:$0xff] %v1264_v48   ;;  %v1259_v53 = vpack.c.bf16 %v1652_v52, %v1636_v42  ;;  %v840_v54 = vadd.f32 %v839_v47, %v1652_v52  ;;  %v1658_v55 = vpop.f32.mrf.mxu1 }
  0xfc   : > { %1335 = vst [vmem:[%s1608_s20 + $0x18] sm:$0xff] %v1304_v51   ;;  %v1299_v56 = vpack.c.bf16 %v1658_v55, %v1639_v44  ;;  %v918_v57 = vadd.f32 %v917_v50, %v1658_v55  ;;  %v1664_v58 = vpop.f32.mrf.mxu0 }
  0xfd   : > { %1327 = vst [vmem:[%s1598_s17 + $0x10] sm:$0xff] %v1259_v53   ;;  %v841_v59 = vadd.f32 %v1628_v38, %v840_v54  ;;  %v1668_v60 = vpop.f32.mrf.mxu1 }
  0xfe   : > { %1334 = vst [vmem:[%s1608_s20 + $0x10] sm:$0xff] %v1299_v56   ;;  %v919_v61 = vadd.f32 %v1632_v40, %v918_v57  ;;  %v1672_v62 = vpop.f32.mrf.mxu0 }
  0xff   : > { %v842_v63 = vadd.f32 %v1642_v46, %v841_v59  ;;  %v1675_v0 = vpop.f32.mrf.mxu1 }
 0x100   : > { %v920_v1 = vadd.f32 %v1647_v49, %v919_v61  ;;  %v1678_v2 = vpop.f32.mrf.mxu0 }
 0x101   : > { %v843_v3 = vadd.f32 %v842_v63, %v1672_v62  ;;  %v1274_v4 = vpack.c.bf16 %v1678_v2, %v1664_v58  ;;  %v1683_v5 = vpop.f32.mrf.mxu1 }
 0x102   : > { %v921_v6 = vadd.f32 %v920_v1, %v1675_v0  ;;  %v1314_v7 = vpack.c.bf16 %v1683_v5, %v1668_v60  ;;  %v1688_v8 = vpop.f32.mrf.mxu0 }
 0x103   : > { %1330 = vst [vmem:[%s1598_s17 + $0x28] sm:$0xff] %v1274_v4   ;;  %v1269_v9 = vpack.c.bf16 %v1688_v8, %v1672_v62  ;;  %v844_v10 = vadd.f32 %v843_v3, %v1688_v8  ;;  %v1694_v11 = vpop.f32.mrf.mxu1 }
 0x104   : > { %1337 = vst [vmem:[%s1608_s20 + $0x28] sm:$0xff] %v1314_v7   ;;  %v1309_v12 = vpack.c.bf16 %v1694_v11, %v1675_v0  ;;  %v922_v13 = vadd.f32 %v921_v6, %v1694_v11  ;;  %v1700_v14 = vpop.f32.mrf.mxu0 }
 0x105   : > { %1329 = vst [vmem:[%s1598_s17 + $0x20] sm:$0xff] %v1269_v9   ;;  %v845_v15 = vadd.f32 %v1664_v58, %v844_v10  ;;  %v1704_v16 = vpop.f32.mrf.mxu1 }
 0x106   : > { %1336 = vst [vmem:[%s1608_s20 + $0x20] sm:$0xff] %v1309_v12   ;;  %v923_v17 = vadd.f32 %v1668_v60, %v922_v13  ;;  %v1708_v18 = vpop.f32.mrf.mxu0 }
 0x107   : > { %v846_v19 = vadd.f32 %v1678_v2, %v845_v15  ;;  %v1711_v20 = vpop.f32.mrf.mxu1 }
 0x108   : > { %v924_v21 = vadd.f32 %v1683_v5, %v923_v17  ;;  %v1714_v22 = vpop.f32.mrf.mxu0 }
 0x109   : > { %v847_v23 = vadd.f32 %v846_v19, %v1708_v18  ;;  %v1284_v29 = vpack.c.bf16 %v1714_v22, %v1700_v14  ;;  %v1719_v31 = vpop.f32.mrf.mxu1 }
 0x10a   : > { %v925_v33 = vadd.f32 %v924_v21, %v1711_v20  ;;  %v1324_v34 = vpack.c.bf16 %v1719_v31, %v1704_v16  ;;  %v1724_v36 = vpop.f32.mrf.mxu0 }
 0x10b   : > { %1332 = vst [vmem:[%s1598_s17 + $0x38] sm:$0xff] %v1284_v29   ;;  %v1279_v37 = vpack.c.bf16 %v1724_v36, %v1708_v18  ;;  %v848_v39 = vadd.f32 %v847_v23, %v1724_v36  ;;  %v1730_v41 = vpop.f32.mrf.mxu1 }
 0x10c   : > { %1339 = vst [vmem:[%s1608_s20 + $0x38] sm:$0xff] %v1324_v34   ;;  %v1319_v43 = vpack.c.bf16 %v1730_v41, %v1711_v20  ;;  %v926_v45 = vadd.f32 %v925_v33, %v1730_v41 }
 0x10d   : > { %1331 = vst [vmem:[%s1598_s17 + $0x30] sm:$0xff] %v1279_v37   ;;  %v849_v47 = vadd.f32 %v1700_v14, %v848_v39 }
 0x10e   : > { %1338 = vst [vmem:[%s1608_s20 + $0x30] sm:$0xff] %v1319_v43   ;;  %v927_v48 = vadd.f32 %v1704_v16, %v926_v45 }
 0x10f   : > { %v850_v50 = vadd.f32 %v1714_v22, %v849_v47 }
 0x110   : > { %v928_v51 = vadd.f32 %v1719_v31, %v927_v48 }
 0x111   : > { %v851_v53 = vrot.slane %v850_v50, 4 }
 0x112   : > { %v929_v54 = vrot.slane %v928_v51, 4 }
 0x113   : > { %v852_v56 = vadd.f32 %v851_v53, %v850_v50 }
 0x114   : > { %v930_v57 = vadd.f32 %v929_v54, %v928_v51 }
 0x115   : > { %v853_v59 = vrot.slane %v852_v56, 2 }
 0x116   : > { %v931_v61 = vrot.slane %v930_v57, 2 }
 0x117   : > { %v854_v63 = vadd.f32 %v853_v59, %v852_v56 }
 0x118   : > { %v932_v1 = vadd.f32 %v931_v61, %v930_v57 }
 0x119   : > { %v855_v3 = vrot.slane %v854_v63, 1 }
 0x11a   : > { %v933_v6 = vrot.slane %v932_v1, 1 }
 0x11b   : > { %v856_v4 = vadd.f32 %v855_v3, %v854_v63 }
 0x11c   : > { %v934_v12 = vadd.f32 %v933_v6, %v932_v1 }
 0x11d   : > { %v1742_v7 = vmul.f32 0.0078125, %v856_v4 }
 0x11e   : > { %v1750_v19 = vmul.f32 0.0078125, %v934_v12 }
 0x11f   : > { %v858_v9 = vsub.f32 %v1590_v26, %v1742_v7  ;;  %v859_v10 = vsub.f32 %v1614_v32, %v1742_v7  ;;  %v860_v13 = vsub.f32 %v1586_v24, %v1742_v7  ;;  %v861_v21 = vsub.f32 %v1600_v28, %v1742_v7 }
 0x120   : > { %v862_v23 = vsub.f32 %v1636_v42, %v1742_v7  ;;  %v936_v26 = vsub.f32 %v1592_v27, %v1750_v19  ;;  %v937_v32 = vsub.f32 %v1621_v35, %v1750_v19  ;;  %v863_v24 = vsub.f32 %v1652_v52, %v1742_v7 }
 0x121   : > { %v874_v15 = vmul.f32 %v858_v9, %v858_v9  ;;  %v875_v17 = vmul.f32 %v859_v10, %v859_v10  ;;  %v876_v29 = vmul.f32 %v860_v13, %v860_v13  ;;  %v877_v34 = vmul.f32 %v861_v21, %v861_v21 }
 0x122   : > { %v864_v39 = vsub.f32 %v1628_v38, %v1742_v7  ;;  %v878_v28 = vmul.f32 %v862_v23, %v862_v23  ;;  %v938_v42 = vsub.f32 %v1588_v25, %v1750_v19  ;;  %v952_v45 = vmul.f32 %v936_v26, %v936_v26 }
 0x123   : > { %v890_v33 = vadd.f32 %v875_v17, %v874_v15  ;;  %v953_v47 = vmul.f32 %v937_v32, %v937_v32  ;;  %v865_v27 = vsub.f32 %v1642_v46, %v1742_v7  ;;  %v879_v48 = vmul.f32 %v863_v24, %v863_v24 }
 0x124   : > { %v939_v52 = vsub.f32 %v1610_v30, %v1750_v19  ;;  %v866_v50 = vsub.f32 %v1672_v62, %v1742_v7  ;;  %v880_v51 = vmul.f32 %v864_v39, %v864_v39  ;;  %v940_v53 = vsub.f32 %v1639_v44, %v1750_v19 }
 0x125   : > { %v891_v37 = vadd.f32 %v890_v33, %v876_v29  ;;  %v954_v54 = vmul.f32 %v938_v42, %v938_v42  ;;  %v968_v25 = vadd.f32 %v953_v47, %v952_v45  ;;  %v867_v56 = vsub.f32 %v1688_v8, %v1742_v7 }
 0x126   : > { %v881_v57 = vmul.f32 %v865_v27, %v865_v27  ;;  %v941_v59 = vsub.f32 %v1658_v55, %v1750_v19  ;;  %v955_v61 = vmul.f32 %v939_v52, %v939_v52  ;;  %v868_v62 = vsub.f32 %v1664_v58, %v1742_v7 }
 0x127   : > { %v892_v43 = vadd.f32 %v891_v37, %v877_v34  ;;  %v969_v30 = vadd.f32 %v968_v25, %v954_v54  ;;  %v882_v63 = vmul.f32 %v866_v50, %v866_v50  ;;  %v942_v44 = vsub.f32 %v1632_v40, %v1750_v19 }
 0x128   : > { %v956_v3 = vmul.f32 %v940_v53, %v940_v53  ;;  %v869_v8 = vsub.f32 %v1678_v2, %v1742_v7  ;;  %v883_v6 = vmul.f32 %v867_v56, %v867_v56  ;;  %v943_v55 = vsub.f32 %v1647_v49, %v1750_v19 }
 0x129   : > { %v893_v35 = vadd.f32 %v892_v43, %v878_v28  ;;  %v970_v4 = vadd.f32 %v969_v30, %v955_v61  ;;  %v957_v10 = vmul.f32 %v941_v59, %v941_v59  ;;  %v870_v58 = vsub.f32 %v1708_v18, %v1742_v7 }
 0x12a   : > { %v884_v13 = vmul.f32 %v868_v62, %v868_v62  ;;  %v944_v40 = vsub.f32 %v1675_v0, %v1750_v19  ;;  %v958_v17 = vmul.f32 %v942_v44, %v942_v44  ;;  %v871_v2 = vsub.f32 %v1724_v36, %v1742_v7 }
 0x12b   : > { %v894_v38 = vadd.f32 %v893_v35, %v879_v48  ;;  %v971_v12 = vadd.f32 %v970_v4, %v956_v3  ;;  %v885_v23 = vmul.f32 %v869_v8, %v869_v8  ;;  %v945_v49 = vsub.f32 %v1694_v11, %v1750_v19 }
 0x12c   : > { %v959_v33 = vmul.f32 %v943_v55, %v943_v55  ;;  %v872_v18 = vsub.f32 %v1700_v14, %v1742_v7  ;;  %v886_v32 = vmul.f32 %v870_v58, %v870_v58  ;;  %v946_v0 = vsub.f32 %v1668_v60, %v1750_v19 }
 0x12d   : > { %v895_v46 = vadd.f32 %v894_v38, %v880_v51  ;;  %v972_v21 = vadd.f32 %v971_v12, %v957_v10  ;;  %v960_v34 = vmul.f32 %v944_v40, %v944_v40  ;;  %v873_v36 = vsub.f32 %v1714_v22, %v1742_v7 }
 0x12e   : > { %v887_v39 = vmul.f32 %v871_v2, %v871_v2  ;;  %v947_v11 = vsub.f32 %v1683_v5, %v1750_v19  ;;  %v961_v43 = vmul.f32 %v945_v49, %v945_v49  ;;  %v888_v45 = vmul.f32 %v872_v18, %v872_v18 }
 0x12f   : > { %v896_v1 = vadd.f32 %v895_v46, %v881_v57  ;;  %v973_v26 = vadd.f32 %v972_v21, %v958_v17  ;;  %v948_v47 = vsub.f32 %v1711_v20, %v1750_v19  ;;  %v962_v27 = vmul.f32 %v946_v0, %v946_v0 }
 0x130   : > { %v889_v48 = vmul.f32 %v873_v36, %v873_v36  ;;  %v949_v22 = vsub.f32 %v1730_v41, %v1750_v19  ;;  %v963_v52 = vmul.f32 %v947_v11, %v947_v11  ;;  %v950_v5 = vsub.f32 %v1704_v16, %v1750_v19 }
 0x131   : > { %v897_v9 = vadd.f32 %v896_v1, %v882_v63  ;;  %v974_v37 = vadd.f32 %v973_v26, %v959_v33  ;;  %v964_v38 = vmul.f32 %v948_v47, %v948_v47  ;;  %v951_v20 = vsub.f32 %v1719_v31, %v1750_v19 }
 0x132   : > { %v965_v25 = vmul.f32 %v949_v22, %v949_v22  ;;  %v966_v46 = vmul.f32 %v950_v5, %v950_v5 }
 0x133   : > { %v898_v15 = vadd.f32 %v897_v9, %v883_v6  ;;  %v975_v42 = vadd.f32 %v974_v37, %v960_v34  ;;  %v967_v61 = vmul.f32 %v951_v20, %v951_v20 }
 0x135   : > { %v899_v29 = vadd.f32 %v898_v15, %v884_v13  ;;  %v976_v60 = vadd.f32 %v975_v42, %v961_v43 }
 0x137   : > { %v900_v24 = vadd.f32 %v899_v29, %v885_v23  ;;  %v977_v50 = vadd.f32 %v976_v60, %v962_v27 }
 0x139   : > { %v901_v28 = vadd.f32 %v900_v24, %v886_v32  ;;  %v978_v53 = vadd.f32 %v977_v50, %v963_v52 }
 0x13b   : > { %v902_v14 = vadd.f32 %v901_v28, %v887_v39  ;;  %v979_v56 = vadd.f32 %v978_v53, %v964_v38 }
 0x13d   : > { %v903_v35 = vadd.f32 %v902_v14, %v888_v45  ;;  %v980_v59 = vadd.f32 %v979_v56, %v965_v25 }
 0x13f   : > { %v904_v51 = vadd.f32 %v903_v35, %v889_v48  ;;  %v981_v30 = vadd.f32 %v980_v59, %v966_v46 }
 0x141   : > { %v905_v54 = vrot.slane %v904_v51, 4  ;;  %v982_v63 = vadd.f32 %v981_v30, %v967_v61 }
 0x143   : > { %v906_v57 = vadd.f32 %v905_v54, %v904_v51  ;;  %v983_v16 = vrot.slane %v982_v63, 4 }
 0x145   : > { %v907_v41 = vrot.slane %v906_v57, 2  ;;  %v984_v44 = vadd.f32 %v983_v16, %v982_v63 }
 0x147   : > { %v908_v62 = vadd.f32 %v907_v41, %v906_v57  ;;  %v985_v4 = vrot.slane %v984_v44, 2 }
 0x149   : > { %v909_v1 = vrot.slane %v908_v62, 1  ;;  %v986_v8 = vadd.f32 %v985_v4, %v984_v44 }
 0x14b   : > { %v910_v31 = vadd.f32 %v909_v1, %v908_v62  ;;  %v987_v6 = vrot.slane %v986_v8, 1 }
 0x14d   : > { %v912_v3 = vsel %vm911_vm0, %v1742_v7, %v910_v31  ;;  %v988_v9 = vadd.f32 %v987_v6, %v986_v8 }
 0x14e   : > { %913 = vst [vmem:[%s284_s26] sm:$0x3] %v912_v3 }
 0x14f   : > { %v989_v55 = vsel %vm911_vm0, %v1750_v19, %v988_v9 }
 0x150   : > { %990 = vst [vmem:[%s288_s22] sm:$0x3] %v989_v55 }
 0x151 PF: > { %s17_s21 = sadd.s32 1, %s1474_s21  }
 0x152   : > { %p14_p5 = scmp.ge.s32.totalorder %s17_s21, 6  }
 0x154   :  { %16 = sbr.rel (!%p14_p5) target bundleno = 1 (0x1), region = 98 }

// kernel: bottleneck_forward.7
= control target key start
LH: loop header
LB: loop body
LE: loop exit
PB: predicated region body
PF: predicated region fallthrough
CT: control target
= control target key end

     0   :  { %s695_s21 = smov 0   ;;  %s841_s0 = inlined_call_operand.vmem [shape: bf16[512,128], index: 0, kind: input, shape index: {}]   ;;  %s842_s1 = inlined_call_operand.vmem [shape: bf16[512,128], index: 1, kind: input, shape index: {}]   ;;  %s843_s2 = inlined_call_operand.vmem [shape: f32[1,128], index: 2, kind: input, shape index: {}]   ;;  %s844_s3 = inlined_call_operand.vmem [shape: f32[1,128], index: 3, kind: input, shape index: {}]   ;;  %s845_s4 = inlined_call_operand.vmem [shape: f32[1,128], index: 4, kind: input, shape index: {}]   ;;  %s846_s5 = inlined_call_operand.vmem [shape: f32[1,128], index: 5, kind: input, shape index: {}]   ;;  %s847_s6 = inlined_call_operand.vmem [shape: f32[512,128], index: 6, kind: output, shape index: {}]  }
   0x1 LB: > { %s549_s22 = sadd.s32 4294967295, %s658_s21   ;;  %p553_p0 = scmp.ge.s32.totalorder %s658_s21, 1  ;;  %s658_s21 = sphi %s695_s21, %s16_s21  }
   0x2   : > { %p224_p1 = scmp.lt.s32.totalorder %s658_s21, 5 }
   0x4   : > { %p225_p2 = pnand %p553_p0, %p224_p1 }
   0x5   : > { %s554_s23 = sshll.u32 (!%p225_p2), %s549_s22, 4 }
   0x6   : > { %228 = sbr.rel (%p225_p2) target bundleno = 53 (0x35), region = 44  ;;  %p260_p3 = scmp.lt.s32.totalorder (!%p225_p2), %s554_s23, 63 }
   0xb   : > { %s849_s23 = smov (!%p260_p3, %s554_s23), 63  ;;  %v719_v0 = vld [vmem:[%s843_s2] ss:$0 sm:$0xff] }
   0xc   : > { %s555_s24 = sshll.u32 %s849_s23, 2  ;;  %v724_v1 = vld [vmem:[%s845_s4] ss:$0 sm:$0xff]  ;;  %s559_s15 = sshll.u32 %s849_s23, 3 }
   0xd   : > { %s709_s27 = scalar_lea.vmem %s841_s0, %s555_s24  ;;  %s714_s30 = scalar_lea.vmem %s842_s1, %s555_s24  ;;  %v733_v10 = vld [vmem:[%s844_s3] ss:$0 sm:$0xff] }
   0xe   : > { %v567_v2 = vld [vmem:[%s709_s27] sm:$0xff]   ;;  %v630_v4 = vld [vmem:[%s709_s27 + $0x8] sm:$0xff]   ;;  %v631_v24 = vld [vmem:[%s709_s27 + $0x10] sm:$0xff]   ;;  %s762_s18 = scalar_lea.vmem %s847_s6, %s559_s15 }
   0xf   : > { %v599_v3 = vld [vmem:[%s714_s30] sm:$0xff]   ;;  %v568_v5 = vunpack.c.l.bf16 %v567_v2  ;;  %v569_v7 = vunpack.c.h.bf16 %v567_v2  ;;  %v637_v9 = vld [vmem:[%s714_s30 + $0x8] sm:$0xff]   ;;  %v572_v12 = vunpack.c.l.bf16 %v630_v4  ;;  %v573_v14 = vunpack.c.h.bf16 %v630_v4  ;;  %v638_v25 = vld [vmem:[%s714_s30 + $0x10] sm:$0xff]  }
  0x10   : > { %v600_v6 = vunpack.c.l.bf16 %v599_v3  ;;  %v601_v8 = vunpack.c.h.bf16 %v599_v3  ;;  %v738_v11 = vld [vmem:[%s846_s5] ss:$0 sm:$0xff]  ;;  %v604_v13 = vunpack.c.l.bf16 %v637_v9  ;;  %v605_v15 = vunpack.c.h.bf16 %v637_v9  ;;  %v632_v42 = vld [vmem:[%s709_s27 + $0x18] sm:$0xff]  }
  0x11   : > { %v348_v16 = vmul.f32 %v568_v5, %v719_v0  ;;  %v349_v18 = vmul.f32 %v569_v7, %v719_v0  ;;  %v350_v20 = vmul.f32 %v572_v12, %v719_v0  ;;  %v351_v22 = vmul.f32 %v573_v14, %v719_v0  ;;  %v639_v43 = vld [vmem:[%s714_s30 + $0x18] sm:$0xff]   ;;  %v633_v52 = vld [vmem:[%s709_s27 + $0x20] sm:$0xff]   ;;  %v634_v14 = vld [vmem:[%s709_s27 + $0x28] sm:$0xff]  }
  0x12   : > { %v394_v17 = vmul.f32 %v600_v6, %v724_v1  ;;  %v395_v19 = vmul.f32 %v601_v8, %v724_v1  ;;  %v396_v21 = vmul.f32 %v604_v13, %v724_v1  ;;  %v397_v23 = vmul.f32 %v605_v15, %v724_v1  ;;  %v640_v57 = vld [vmem:[%s714_s30 + $0x20] sm:$0xff]   ;;  %v641_v15 = vld [vmem:[%s714_s30 + $0x28] sm:$0xff]  }
  0x13   : > { %v371_v26 = vadd.f32 %v733_v10, %v348_v16  ;;  %v372_v28 = vadd.f32 %v733_v10, %v349_v18  ;;  %v373_v30 = vadd.f32 %v733_v10, %v350_v20  ;;  %v374_v32 = vadd.f32 %v733_v10, %v351_v22 }
  0x14   : > { %v417_v27 = vadd.f32 %v738_v11, %v394_v17  ;;  %v418_v29 = vadd.f32 %v738_v11, %v395_v19  ;;  %v419_v31 = vadd.f32 %v738_v11, %v396_v21  ;;  %v420_v33 = vadd.f32 %v738_v11, %v397_v23 }
  0x15   : > { %v576_v36 = vunpack.c.l.bf16 %v631_v24  ;;  %v608_v37 = vunpack.c.l.bf16 %v638_v25  ;;  %v577_v40 = vunpack.c.h.bf16 %v631_v24  ;;  %v609_v41 = vunpack.c.h.bf16 %v638_v25 }
  0x16   : > { %v433_v34 = vadd.f32 %v417_v27, %v371_v26  ;;  %v434_v35 = vadd.f32 %v418_v29, %v372_v28  ;;  %v435_v38 = vadd.f32 %v419_v31, %v373_v30  ;;  %v436_v39 = vadd.f32 %v420_v33, %v374_v32  ;;  %v635_v32 = vld [vmem:[%s709_s27 + $0x30] sm:$0xff]  }
  0x17   : > { %v352_v46 = vmul.f32 %v576_v36, %v719_v0  ;;  %v398_v47 = vmul.f32 %v608_v37, %v724_v1  ;;  %v353_v50 = vmul.f32 %v577_v40, %v719_v0  ;;  %v399_v51 = vmul.f32 %v609_v41, %v724_v1  ;;  %v642_v37 = vld [vmem:[%s714_s30 + $0x30] sm:$0xff]  }
  0x18   : > { %v449_v44 = vmax.f32 %v433_v34, 0.0  ;;  %v450_v45 = vmax.f32 %v434_v35, 0.0  ;;  %v451_v48 = vmax.f32 %v435_v38, 0.0  ;;  %v452_v49 = vmax.f32 %v436_v39, 0.0 }
  0x19   : > { %v375_v53 = vadd.f32 %v733_v10, %v352_v46  ;;  %v421_v54 = vadd.f32 %v738_v11, %v398_v47  ;;  %v580_v55 = vunpack.c.l.bf16 %v632_v42  ;;  %v612_v56 = vunpack.c.l.bf16 %v639_v43  ;;  %v636_v46 = vld [vmem:[%s709_s27 + $0x38] sm:$0xff]  }
  0x1a   : > { %465 = vst [vmem:[%s762_s18] sm:$0xff] %v449_v44  ;;  %466 = vst [vmem:[%s762_s18 + $0x8] sm:$0xff] %v450_v45  ;;  %v376_v58 = vadd.f32 %v733_v10, %v353_v50  ;;  %v422_v59 = vadd.f32 %v738_v11, %v399_v51  ;;  %v581_v60 = vunpack.c.h.bf16 %v632_v42  ;;  %v613_v61 = vunpack.c.h.bf16 %v639_v43 }
  0x1b   : > { %467 = vst [vmem:[%s762_s18 + $0x10] sm:$0xff] %v451_v48  ;;  %468 = vst [vmem:[%s762_s18 + $0x18] sm:$0xff] %v452_v49  ;;  %v437_v62 = vadd.f32 %v421_v54, %v375_v53  ;;  %v354_v63 = vmul.f32 %v580_v55, %v719_v0  ;;  %v400_v2 = vmul.f32 %v612_v56, %v724_v1  ;;  %v584_v3 = vunpack.c.l.bf16 %v633_v52  ;;  %v643_v55 = vld [vmem:[%s714_s30 + $0x38] sm:$0xff]  }
  0x1c   : > { %v438_v4 = vadd.f32 %v422_v59, %v376_v58  ;;  %v355_v5 = vmul.f32 %v581_v60, %v719_v0  ;;  %v401_v6 = vmul.f32 %v613_v61, %v724_v1  ;;  %v616_v7 = vunpack.c.l.bf16 %v640_v57 }
  0x1d   : > { %v453_v8 = vmax.f32 %v437_v62, 0.0  ;;  %v377_v9 = vadd.f32 %v733_v10, %v354_v63  ;;  %v423_v12 = vadd.f32 %v738_v11, %v400_v2  ;;  %v356_v13 = vmul.f32 %v584_v3, %v719_v0 }
  0x1e   : > { %v454_v16 = vmax.f32 %v438_v4, 0.0  ;;  %v378_v17 = vadd.f32 %v733_v10, %v355_v5  ;;  %v424_v18 = vadd.f32 %v738_v11, %v401_v6  ;;  %v402_v19 = vmul.f32 %v616_v7, %v724_v1 }
  0x1f   : > { %469 = vst [vmem:[%s762_s18 + $0x20] sm:$0xff] %v453_v8  ;;  %v439_v20 = vadd.f32 %v423_v12, %v377_v9  ;;  %v379_v21 = vadd.f32 %v733_v10, %v356_v13  ;;  %v585_v22 = vunpack.c.h.bf16 %v633_v52  ;;  %v617_v23 = vunpack.c.h.bf16 %v640_v57 }
  0x20   : > { %470 = vst [vmem:[%s762_s18 + $0x28] sm:$0xff] %v454_v16  ;;  %v440_v24 = vadd.f32 %v424_v18, %v378_v17  ;;  %v425_v25 = vadd.f32 %v738_v11, %v402_v19  ;;  %v588_v26 = vunpack.c.l.bf16 %v634_v14  ;;  %v620_v27 = vunpack.c.l.bf16 %v641_v15 }
  0x21   : > { %v455_v28 = vmax.f32 %v439_v20, 0.0  ;;  %v357_v29 = vmul.f32 %v585_v22, %v719_v0  ;;  %v403_v30 = vmul.f32 %v617_v23, %v724_v1  ;;  %v589_v31 = vunpack.c.h.bf16 %v634_v14 }
  0x22   : > { %v456_v33 = vmax.f32 %v440_v24, 0.0  ;;  %v441_v34 = vadd.f32 %v425_v25, %v379_v21  ;;  %v358_v35 = vmul.f32 %v588_v26, %v719_v0  ;;  %v404_v36 = vmul.f32 %v620_v27, %v724_v1 }
  0x23   : > { %471 = vst [vmem:[%s762_s18 + $0x30] sm:$0xff] %v455_v28  ;;  %v380_v38 = vadd.f32 %v733_v10, %v357_v29  ;;  %v426_v39 = vadd.f32 %v738_v11, %v403_v30  ;;  %v621_v40 = vunpack.c.h.bf16 %v641_v15  ;;  %v359_v41 = vmul.f32 %v589_v31, %v719_v0 }
  0x24   : > { %472 = vst [vmem:[%s762_s18 + $0x38] sm:$0xff] %v456_v33  ;;  %v457_v42 = vmax.f32 %v441_v34, 0.0  ;;  %v381_v43 = vadd.f32 %v733_v10, %v358_v35  ;;  %v427_v44 = vadd.f32 %v738_v11, %v404_v36  ;;  %v592_v45 = vunpack.c.l.bf16 %v635_v32 }
  0x25   : > { %v442_v47 = vadd.f32 %v426_v39, %v380_v38  ;;  %v382_v48 = vadd.f32 %v733_v10, %v359_v41  ;;  %v405_v49 = vmul.f32 %v621_v40, %v724_v1  ;;  %v624_v50 = vunpack.c.l.bf16 %v642_v37 }
  0x26   : > { %473 = vst [vmem:[%s762_s18 + $0x40] sm:$0xff] %v457_v42  ;;  %v443_v51 = vadd.f32 %v427_v44, %v381_v43  ;;  %v360_v52 = vmul.f32 %v592_v45, %v719_v0  ;;  %v593_v53 = vunpack.c.h.bf16 %v635_v32  ;;  %v625_v54 = vunpack.c.h.bf16 %v642_v37 }
  0x27   : > { %v458_v56 = vmax.f32 %v442_v47, 0.0  ;;  %v428_v57 = vadd.f32 %v738_v11, %v405_v49  ;;  %v406_v58 = vmul.f32 %v624_v50, %v724_v1  ;;  %v596_v59 = vunpack.c.l.bf16 %v636_v46 }
  0x28   : > { %v459_v60 = vmax.f32 %v443_v51, 0.0  ;;  %v383_v61 = vadd.f32 %v733_v10, %v360_v52  ;;  %v361_v62 = vmul.f32 %v593_v53, %v719_v0  ;;  %v407_v63 = vmul.f32 %v625_v54, %v724_v1 }
  0x29   : > { %474 = vst [vmem:[%s762_s18 + $0x48] sm:$0xff] %v458_v56  ;;  %v444_v2 = vadd.f32 %v428_v57, %v382_v48  ;;  %v429_v3 = vadd.f32 %v738_v11, %v406_v58  ;;  %v628_v4 = vunpack.c.l.bf16 %v643_v55  ;;  %v362_v5 = vmul.f32 %v596_v59, %v719_v0 }
  0x2a   : > { %475 = vst [vmem:[%s762_s18 + $0x50] sm:$0xff] %v459_v60  ;;  %v384_v6 = vadd.f32 %v733_v10, %v361_v62  ;;  %v430_v7 = vadd.f32 %v738_v11, %v407_v63  ;;  %v597_v8 = vunpack.c.h.bf16 %v636_v46  ;;  %v629_v9 = vunpack.c.h.bf16 %v643_v55 }
  0x2b   : > { %v460_v12 = vmax.f32 %v444_v2, 0.0  ;;  %v445_v13 = vadd.f32 %v429_v3, %v383_v61  ;;  %v385_v14 = vadd.f32 %v733_v10, %v362_v5  ;;  %v408_v15 = vmul.f32 %v628_v4, %v724_v1 }
  0x2c   : > { %v446_v16 = vadd.f32 %v430_v7, %v384_v6  ;;  %v363_v17 = vmul.f32 %v597_v8, %v719_v0  ;;  %v409_v18 = vmul.f32 %v629_v9, %v724_v1 }
  0x2d   : > { %476 = vst [vmem:[%s762_s18 + $0x58] sm:$0xff] %v460_v12  ;;  %v461_v19 = vmax.f32 %v445_v13, 0.0  ;;  %v431_v20 = vadd.f32 %v738_v11, %v408_v15 }
  0x2e   : > { %v462_v21 = vmax.f32 %v446_v16, 0.0  ;;  %v386_v22 = vadd.f32 %v733_v10, %v363_v17  ;;  %v432_v23 = vadd.f32 %v738_v11, %v409_v18 }
  0x2f   : > { %477 = vst [vmem:[%s762_s18 + $0x60] sm:$0xff] %v461_v19  ;;  %v447_v24 = vadd.f32 %v431_v20, %v385_v14 }
  0x30   : > { %478 = vst [vmem:[%s762_s18 + $0x68] sm:$0xff] %v462_v21  ;;  %v448_v25 = vadd.f32 %v432_v23, %v386_v22 }
  0x31   : > { %v463_v26 = vmax.f32 %v447_v24, 0.0 }
  0x32   : > { %v464_v27 = vmax.f32 %v448_v25, 0.0 }
  0x33   : > { %479 = vst [vmem:[%s762_s18 + $0x70] sm:$0xff] %v463_v26 }
  0x34   : > { %480 = vst [vmem:[%s762_s18 + $0x78] sm:$0xff] %v464_v27 }
  0x35 PF: > { %s16_s21 = sadd.s32 1, %s658_s21  }
  0x36   : > { %p13_p4 = scmp.ge.s32.totalorder %s16_s21, 6  }
  0x38   :  { %15 = sbr.rel (!%p13_p4) target bundleno = 1 (0x1), region = 77 }

// kernel: bottleneck_forward.6
= control target key start
LH: loop header
LB: loop body
LE: loop exit
PB: predicated region body
PF: predicated region fallthrough
CT: control target
= control target key end

     0   :  { %s1006_s18 = smov 0   ;;  %s1159_s0 = inlined_call_operand.vmem [shape: bf16[512,128], index: 0, kind: input, shape index: {}]   ;;  %s1160_s1 = inlined_call_operand.vmem [shape: bf16[128,128], index: 1, kind: input, shape index: {}]   ;;  %s1161_s2 = inlined_call_operand.vmem [shape: f32[1,128], index: 2, kind: input, shape index: {}]   ;;  %s1162_s3 = inlined_call_operand.vmem [shape: f32[1,128], index: 3, kind: input, shape index: {}]   ;;  %s1163_s4 = inlined_call_operand.vmem [shape: bf16[512,128], index: 4, kind: output, shape index: {0}]   ;;  %s1164_s5 = inlined_call_operand.vmem [shape: f32[4,2,128], index: 5, kind: output, shape index: {1}]  }
   0x1 LB: > { %s1012_s19 = sadd.s32 4294967295, %s974_s18   ;;  %p752_p0 = scmp.ge.s32.totalorder %s974_s18, 1  ;;  %s974_s18 = sphi %s1006_s18, %s16_s18  }
   0x2   : > { %p191_p1 = scmp.lt.s32.totalorder %s974_s18, 5 }
   0x4   : > { %p192_p2 = pnand %p752_p0, %p191_p1 }
   0x5   : > { %s753_s22 = sshll.u32 (!%p192_p2), %s1012_s19, 4  ;;  %p235_p4 = scmp.lt.s32.totalorder (!%p192_p2), %s1012_s19, 3 }
   0x6   : > { %195 = sbr.rel (%p192_p2) target bundleno = 335 (0x14f), region = 36  ;;  %p224_p3 = scmp.lt.s32.totalorder (!%p192_p2), %s753_s22, 63 }
   0xb   : > { %v960_v0 = vld [vmem:[%s1160_s1 + $0x38] sm:$0xff]   ;;  %v961_v1 = vld [vmem:[%s1160_s1 + $0x30] sm:$0xff]   ;;  %s1166_s22 = smov (!%p224_p3, %s753_s22), 63  ;;  %v962_v2 = vld [vmem:[%s1160_s1 + $0x28] sm:$0xff]   ;;  %s1168_s19 = smov (!%p235_p4, %s1012_s19), 3  ;;  %vm658_vm0 = vcmask 1040384  }
   0xc   : > { %904 = vmatprep.subr.bf16.mxu0 %v960_v0  ;;  %936 = vmatprep.subr.bf16.mxu1 %v960_v0  ;;  %s754_s27 = sshll.u32 %s1166_s22, 2  ;;  %v963_v3 = vld [vmem:[%s1160_s1 + $0x20] sm:$0xff]   ;;  %v964_v16 = vld [vmem:[%s1160_s1 + $0x18] sm:$0xff]   ;;  %v965_v28 = vld [vmem:[%s1160_s1 + $0x10] sm:$0xff]   ;;  %s757_s22 = sshll.u32 %s1168_s19, 1 }
   0xd   : > { %905 = vmatpush3.bf16.msra.mxu0 %v960_v0  ;;  %944 = vmatpush3.bf16.msra.mxu1 %v960_v0  ;;  %s1034_s30 = scalar_lea.vmem %s1159_s0, %s754_s27  ;;  %v1043_v5 = vld [vmem:[%s1161_s2] ss:$0 sm:$0xff]  ;;  %v966_v44 = vld [vmem:[%s1160_s1 + $0x8] sm:$0xff]   ;;  %s1110_s25 = scalar_lea.vmem %s1163_s4, %s754_s27 }
   0xe   : > { %906 = vmatprep.subr.bf16.mxu0 %v961_v1  ;;  %937 = vmatprep.subr.bf16.mxu1 %v961_v1  ;;  %v803_v4 = vld [vmem:[%s1034_s30] sm:$0xff]   ;;  %v874_v8 = vld [vmem:[%s1034_s30 + $0x8] sm:$0xff]   ;;  %v875_v9 = vld [vmem:[%s1034_s30 + $0x10] sm:$0xff]   ;;  %s238_s28 = scalar_lea.vmem %s1164_s5, %s757_s22 }
   0xf   : > { %v804_v6 = vunpack.c.l.bf16 %v803_v4  ;;  %v805_v7 = vunpack.c.h.bf16 %v803_v4  ;;  %v1050_v10 = vld [vmem:[%s1162_s3] ss:$0 sm:$0xff]  ;;  %v808_v11 = vunpack.c.l.bf16 %v874_v8  ;;  %v809_v14 = vunpack.c.h.bf16 %v874_v8  ;;  %v876_v22 = vld [vmem:[%s1034_s30 + $0x18] sm:$0xff]   ;;  %v878_v27 = vld [vmem:[%s1034_s30 + $0x28] sm:$0xff]  }
  0x10   : > { %v877_v15 = vld [vmem:[%s1034_s30 + $0x20] sm:$0xff]   ;;  %v812_v17 = vunpack.c.l.bf16 %v875_v9  ;;  %v813_v21 = vunpack.c.h.bf16 %v875_v9  ;;  %v879_v30 = vld [vmem:[%s1034_s30 + $0x30] sm:$0xff]   ;;  %v816_v32 = vunpack.c.l.bf16 %v876_v22  ;;  %v817_v33 = vunpack.c.h.bf16 %v876_v22  ;;  %v880_v39 = vld [vmem:[%s1034_s30 + $0x38] sm:$0xff]  }
  0x11   : > { %907 = vmatpush3.bf16.msra.mxu0 %v961_v1  ;;  %945 = vmatpush3.bf16.msra.mxu1 %v961_v1  ;;  %v279_v12 = vmul.f32 %v804_v6, %v1043_v5  ;;  %v280_v13 = vmul.f32 %v805_v7, %v1043_v5  ;;  %v281_v20 = vmul.f32 %v808_v11, %v1043_v5  ;;  %v820_v23 = vunpack.c.l.bf16 %v877_v15  ;;  %v967_v61 = vld [vmem:[%s1160_s1] sm:$0xff]  }
  0x12   : > { %908 = vmatprep.subr.bf16.mxu0 %v962_v2  ;;  %938 = vmatprep.subr.bf16.mxu1 %v962_v2  ;;  %v282_v26 = vmul.f32 %v809_v14, %v1043_v5  ;;  %v283_v29 = vmul.f32 %v812_v17, %v1043_v5  ;;  %v821_v34 = vunpack.c.h.bf16 %v877_v15  ;;  %v284_v36 = vmul.f32 %v813_v21, %v1043_v5 }
  0x13   : > { %v302_v18 = vadd.f32 %v1050_v10, %v279_v12  ;;  %v303_v19 = vadd.f32 %v1050_v10, %v280_v13  ;;  %v304_v35 = vadd.f32 %v1050_v10, %v281_v20  ;;  %v287_v37 = vmul.f32 %v820_v23, %v1043_v5 }
  0x14   : > { %v824_v38 = vunpack.c.l.bf16 %v878_v27  ;;  %v305_v40 = vadd.f32 %v1050_v10, %v282_v26  ;;  %v288_v41 = vmul.f32 %v821_v34, %v1043_v5  ;;  %v825_v42 = vunpack.c.h.bf16 %v878_v27 }
  0x15   : > { %909 = vmatpush3.bf16.msra.mxu0 %v962_v2  ;;  %946 = vmatpush3.bf16.msra.mxu1 %v962_v2  ;;  %v318_v24 = vmax.f32 %v302_v18, 0.0  ;;  %v319_v25 = vmax.f32 %v303_v19, 0.0  ;;  %v828_v43 = vunpack.c.l.bf16 %v879_v30  ;;  %v306_v45 = vadd.f32 %v1050_v10, %v283_v29 }
  0x16   : > { %910 = vmatprep.subr.bf16.mxu0 %v963_v3  ;;  %939 = vmatprep.subr.bf16.mxu1 %v963_v3  ;;  %v310_v46 = vadd.f32 %v1050_v10, %v287_v37  ;;  %v289_v47 = vmul.f32 %v824_v38, %v1043_v5  ;;  %v829_v48 = vunpack.c.h.bf16 %v879_v30  ;;  %v311_v49 = vadd.f32 %v1050_v10, %v288_v41 }
  0x17   : > { %v334_v31 = vpack.c.bf16 %v319_v25, %v318_v24  ;;  %v290_v50 = vmul.f32 %v825_v42, %v1043_v5  ;;  %v291_v51 = vmul.f32 %v828_v43, %v1043_v5  ;;  %v832_v52 = vunpack.c.l.bf16 %v880_v39 }
  0x18   : > { %v326_v53 = vmax.f32 %v310_v46, 0.0  ;;  %v312_v54 = vadd.f32 %v1050_v10, %v289_v47  ;;  %v292_v55 = vmul.f32 %v829_v48, %v1043_v5  ;;  %v833_v56 = vunpack.c.h.bf16 %v880_v39 }
  0x19   : > { %911 = vmatpush3.bf16.msra.mxu0 %v963_v3  ;;  %947 = vmatpush3.bf16.msra.mxu1 %v963_v3  ;;  %v307_v57 = vadd.f32 %v1050_v10, %v284_v36  ;;  %v327_v58 = vmax.f32 %v311_v49, 0.0  ;;  %v313_v59 = vadd.f32 %v1050_v10, %v290_v50  ;;  %v314_v60 = vadd.f32 %v1050_v10, %v291_v51 }
  0x1a   : > { %912 = vmatprep.subr.bf16.mxu0 %v964_v16  ;;  %940 = vmatprep.subr.bf16.mxu1 %v964_v16  ;;  %v285_v62 = vmul.f32 %v816_v32, %v1043_v5  ;;  %v315_v63 = vadd.f32 %v1050_v10, %v292_v55  ;;  %v320_v0 = vmax.f32 %v304_v35, 0.0  ;;  %v321_v1 = vmax.f32 %v305_v40, 0.0 }
  0x1b   : > { %920 = vmatprep.mubr.bf16.mxu0 %v334_v31  ;;  %v286_v2 = vmul.f32 %v817_v33, %v1043_v5  ;;  %v338_v3 = vpack.c.bf16 %v327_v58, %v326_v53  ;;  %v328_v4 = vmax.f32 %v312_v54, 0.0  ;;  %v329_v6 = vmax.f32 %v313_v59, 0.0 }
  0x1c   : > { %v293_v7 = vmul.f32 %v832_v52, %v1043_v5  ;;  %v294_v8 = vmul.f32 %v833_v56, %v1043_v5  ;;  %v322_v9 = vmax.f32 %v306_v45, 0.0  ;;  %v323_v11 = vmax.f32 %v307_v57, 0.0 }
  0x1d   : > { %913 = vmatpush3.bf16.msra.mxu0 %v964_v16  ;;  %948 = vmatpush3.bf16.msra.mxu1 %v964_v16  ;;  %v330_v12 = vmax.f32 %v314_v60, 0.0  ;;  %v331_v13 = vmax.f32 %v315_v63, 0.0  ;;  %v308_v14 = vadd.f32 %v1050_v10, %v285_v62  ;;  %v309_v15 = vadd.f32 %v1050_v10, %v286_v2 }
  0x1e   : > { %914 = vmatprep.subr.bf16.mxu0 %v965_v28  ;;  %941 = vmatprep.subr.bf16.mxu1 %v965_v28  ;;  %v335_v16 = vpack.c.bf16 %v321_v1, %v320_v0  ;;  %v339_v17 = vpack.c.bf16 %v329_v6, %v328_v4  ;;  %v316_v18 = vadd.f32 %v1050_v10, %v293_v7 }
  0x1f   : > { %928 = vmatprep.mubr.bf16.mxu1 %v338_v3  ;;  %v317_v19 = vadd.f32 %v1050_v10, %v294_v8  ;;  %v336_v5 = vpack.c.bf16 %v323_v11, %v322_v9  ;;  %v340_v20 = vpack.c.bf16 %v331_v13, %v330_v12  ;;  %v324_v21 = vmax.f32 %v308_v14, 0.0 }
  0x20   : > { %v325_v22 = vmax.f32 %v309_v15, 0.0  ;;  %v332_v23 = vmax.f32 %v316_v18, 0.0 }
  0x21   : > { %915 = vmatpush3.bf16.msra.mxu0 %v965_v28  ;;  %949 = vmatpush3.bf16.msra.mxu1 %v965_v28  ;;  %v333_v24 = vmax.f32 %v317_v19, 0.0 }
  0x22   : > { %916 = vmatprep.subr.bf16.mxu0 %v966_v44  ;;  %942 = vmatprep.subr.bf16.mxu1 %v966_v44  ;;  %v337_v25 = vpack.c.bf16 %v325_v22, %v324_v21 }
  0x23   : > { %v341_v26 = vpack.c.bf16 %v333_v24, %v332_v23 }
  0x25   : > { %917 = vmatpush3.bf16.msra.mxu0 %v966_v44  ;;  %950 = vmatpush3.bf16.msra.mxu1 %v966_v44 }
  0x26   : > { %918 = vmatprep.subr.bf16.mxu0 %v967_v61  ;;  %943 = vmatprep.subr.bf16.mxu1 %v967_v61 }
  0x29   : > { %919 = vmatpush3.bf16.msra.mxu0 %v967_v61  ;;  %951 = vmatpush3.bf16.msra.mxu1 %v967_v61 }
  0x2c   : > { %921 = vmatmul.mubr.bf16.vlgmr.msra.gmra.mxu0 %v335_v16  ;;  %929 = vmatmul.mubr.bf16.vlgmr.msra.gmra.mxu1 %v339_v17 }
  0x2d   : > { %924 = vmatprep.mubr.bf16.mxu0 %v336_v5  ;;  %932 = vmatprep.mubr.bf16.mxu1 %v340_v20 }
  0x34   : > { %925 = vmatmul.mubr.bf16.gmra.mxu0 %v337_v25  ;;  %933 = vmatmul.mubr.bf16.gmra.mxu1 %v341_v26 }
  0xec   : > { %v922_v27 = vpop.f32.mrf.mxu0  ;;  %v1101_v28 = vpop.f32.mrf.mxu1 }
  0xee   : > { %v440_v10 = vpop.f32.mrf.mxu0  ;;  %v1103_v29 = vpop.f32.mrf.mxu1 }
  0xf0   : > { %v923_v30 = vpop.f32.mrf.mxu0  ;;  %v1112_v31 = vpop.f32.mrf.mxu1 }
  0xf1   : > { %v842_v32 = vpack.c.bf16 %v923_v30, %v922_v27  ;;  %v862_v33 = vpack.c.bf16 %v1112_v31, %v1101_v28 }
  0xf2   : > { %v443_v34 = vpop.f32.mrf.mxu0  ;;  %v1116_v35 = vpop.f32.mrf.mxu1 }
  0xf3   : > { %881 = vst [vmem:[%s1110_s25 + $0x8] sm:$0xff] %v842_v32   ;;  %v837_v36 = vpack.c.bf16 %v443_v34, %v440_v10  ;;  %v583_v37 = vadd.f32 %v443_v34, %v440_v10  ;;  %885 = vst [vmem:[%s1110_s25 + $0x28] sm:$0xff] %v862_v33   ;;  %v857_v38 = vpack.c.bf16 %v1116_v35, %v1103_v29 }
  0xf4   : > { %v926_v39 = vpop.f32.mrf.mxu0  ;;  %v1122_v40 = vpop.f32.mrf.mxu1 }
  0xf5   : > { %838 = vst [vmem:[%s1110_s25] sm:$0xff] %v837_v36   ;;  %v584_v41 = vadd.f32 %v922_v27, %v583_v37  ;;  %884 = vst [vmem:[%s1110_s25 + $0x20] sm:$0xff] %v857_v38  }
  0xf6   : > { %v456_v42 = vpop.f32.mrf.mxu0  ;;  %v1126_v43 = vpop.f32.mrf.mxu1 }
  0xf7   : > { %v585_v44 = vadd.f32 %v923_v30, %v584_v41 }
  0xf8   : > { %v927_v45 = vpop.f32.mrf.mxu0  ;;  %v1128_v46 = vpop.f32.mrf.mxu1 }
  0xf9   : > { %v586_v47 = vadd.f32 %v585_v44, %v456_v42  ;;  %v852_v48 = vpack.c.bf16 %v927_v45, %v926_v39  ;;  %v872_v49 = vpack.c.bf16 %v1128_v46, %v1122_v40 }
  0xfa   : > { %v459_v50 = vpop.f32.mrf.mxu0  ;;  %v491_v51 = vpop.f32.mrf.mxu1 }
  0xfb   : > { %883 = vst [vmem:[%s1110_s25 + $0x18] sm:$0xff] %v852_v48   ;;  %v847_v52 = vpack.c.bf16 %v459_v50, %v456_v42  ;;  %v587_v53 = vadd.f32 %v586_v47, %v459_v50  ;;  %887 = vst [vmem:[%s1110_s25 + $0x38] sm:$0xff] %v872_v49   ;;  %v867_v54 = vpack.c.bf16 %v491_v51, %v1126_v43 }
  0xfd   : > { %882 = vst [vmem:[%s1110_s25 + $0x10] sm:$0xff] %v847_v52   ;;  %v588_v55 = vadd.f32 %v926_v39, %v587_v53  ;;  %886 = vst [vmem:[%s1110_s25 + $0x30] sm:$0xff] %v867_v54  }
  0xff   : > { %v589_v56 = vadd.f32 %v927_v45, %v588_v55 }
 0x101   : > { %v590_v57 = vadd.f32 %v589_v56, %v1103_v29 }
 0x103   : > { %v591_v58 = vadd.f32 %v590_v57, %v1116_v35 }
 0x105   : > { %v592_v59 = vadd.f32 %v1101_v28, %v591_v58 }
 0x107   : > { %v593_v60 = vadd.f32 %v1112_v31, %v592_v59 }
 0x109   : > { %v594_v61 = vadd.f32 %v593_v60, %v1126_v43 }
 0x10b   : > { %v595_v62 = vadd.f32 %v594_v61, %v491_v51 }
 0x10d   : > { %v596_v63 = vadd.f32 %v1122_v40, %v595_v62 }
 0x10f   : > { %v597_v0 = vadd.f32 %v1128_v46, %v596_v63 }
 0x111   : > { %v598_v1 = vrot.slane %v597_v0, 4 }
 0x113   : > { %v599_v2 = vadd.f32 %v598_v1, %v597_v0 }
 0x115   : > { %v600_v3 = vrot.slane %v599_v2, 2 }
 0x117   : > { %v601_v4 = vadd.f32 %v600_v3, %v599_v2 }
 0x119   : > { %v602_v6 = vrot.slane %v601_v4, 1 }
 0x11b   : > { %v603_v7 = vadd.f32 %v602_v6, %v601_v4 }
 0x11d   : > { %v604_v8 = vmul.f32 0.0078125, %v603_v7 }
 0x11f   : > { %v605_v9 = vsub.f32 %v440_v10, %v604_v8  ;;  %v606_v11 = vsub.f32 %v443_v34, %v604_v8  ;;  %v607_v12 = vsub.f32 %v922_v27, %v604_v8  ;;  %v608_v15 = vsub.f32 %v923_v30, %v604_v8 }
 0x120   : > { %v609_v16 = vsub.f32 %v456_v42, %v604_v8  ;;  %v610_v19 = vsub.f32 %v459_v50, %v604_v8  ;;  %v611_v21 = vsub.f32 %v926_v39, %v604_v8  ;;  %v612_v24 = vsub.f32 %v927_v45, %v604_v8 }
 0x121   : > { %v621_v13 = vmul.f32 %v605_v9, %v605_v9  ;;  %v622_v14 = vmul.f32 %v606_v11, %v606_v11  ;;  %v623_v17 = vmul.f32 %v607_v12, %v607_v12  ;;  %v624_v5 = vmul.f32 %v608_v15, %v608_v15 }
 0x122   : > { %v625_v22 = vmul.f32 %v609_v16, %v609_v16  ;;  %v626_v25 = vmul.f32 %v610_v19, %v610_v19  ;;  %v613_v32 = vsub.f32 %v1103_v29, %v604_v8  ;;  %v627_v10 = vmul.f32 %v611_v21, %v611_v21 }
 0x123   : > { %v637_v18 = vadd.f32 %v622_v14, %v621_v13  ;;  %v614_v27 = vsub.f32 %v1116_v35, %v604_v8  ;;  %v628_v34 = vmul.f32 %v612_v24, %v612_v24  ;;  %v615_v36 = vsub.f32 %v1101_v28, %v604_v8 }
 0x124   : > { %v629_v37 = vmul.f32 %v613_v32, %v613_v32  ;;  %v616_v41 = vsub.f32 %v1112_v31, %v604_v8  ;;  %v617_v44 = vsub.f32 %v1126_v43, %v604_v8  ;;  %v618_v29 = vsub.f32 %v491_v51, %v604_v8 }
 0x125   : > { %v638_v20 = vadd.f32 %v637_v18, %v623_v17  ;;  %v630_v39 = vmul.f32 %v614_v27, %v614_v27  ;;  %v631_v45 = vmul.f32 %v615_v36, %v615_v36  ;;  %v619_v35 = vsub.f32 %v1122_v40, %v604_v8 }
 0x126   : > { %v632_v48 = vmul.f32 %v616_v41, %v616_v41  ;;  %v633_v50 = vmul.f32 %v617_v44, %v617_v44  ;;  %v620_v28 = vsub.f32 %v1128_v46, %v604_v8  ;;  %v634_v53 = vmul.f32 %v618_v29, %v618_v29 }
 0x127   : > { %v639_v23 = vadd.f32 %v638_v20, %v624_v5  ;;  %v635_v31 = vmul.f32 %v619_v35, %v619_v35 }
 0x128   : > { %v636_v56 = vmul.f32 %v620_v28, %v620_v28 }
 0x129   : > { %v640_v26 = vadd.f32 %v639_v23, %v625_v22 }
 0x12b   : > { %v641_v33 = vadd.f32 %v640_v26, %v626_v25 }
 0x12d   : > { %v642_v30 = vadd.f32 %v641_v33, %v627_v10 }
 0x12f   : > { %v643_v38 = vadd.f32 %v642_v30, %v628_v34 }
 0x131   : > { %v644_v42 = vadd.f32 %v643_v38, %v629_v37 }
 0x133   : > { %v645_v47 = vadd.f32 %v644_v42, %v630_v39 }
 0x135   : > { %v646_v49 = vadd.f32 %v645_v47, %v631_v45 }
 0x137   : > { %v647_v52 = vadd.f32 %v646_v49, %v632_v48 }
 0x139   : > { %v648_v54 = vadd.f32 %v647_v52, %v633_v50 }
 0x13b   : > { %v649_v55 = vadd.f32 %v648_v54, %v634_v53 }
 0x13d   : > { %v650_v57 = vadd.f32 %v649_v55, %v635_v31 }
 0x13f   : > { %v651_v43 = vadd.f32 %v650_v57, %v636_v56 }
 0x141   : > { %v652_v58 = vrot.slane %v651_v43, 4 }
 0x143   : > { %v653_v59 = vadd.f32 %v652_v58, %v651_v43 }
 0x145   : > { %v654_v51 = vrot.slane %v653_v59, 2 }
 0x147   : > { %v655_v60 = vadd.f32 %v654_v51, %v653_v59 }
 0x149   : > { %v656_v61 = vrot.slane %v655_v60, 1 }
 0x14b   : > { %v657_v40 = vadd.f32 %v656_v61, %v655_v60 }
 0x14d   : > { %v659_v46 = vsel %vm658_vm0, %v604_v8, %v657_v40 }
 0x14e   : > { %660 = vst [vmem:[%s238_s28] sm:$0x3] %v659_v46 }
 0x14f PF: > { %s16_s18 = sadd.s32 1, %s974_s18  }
 0x150   : > { %p13_p5 = scmp.ge.s32.totalorder %s16_s18, 6  }
 0x152   :  { %15 = sbr.rel (!%p13_p5) target bundleno = 1 (0x1), region = 78 }

// kernel: bottleneck_forward.5
= control target key start
LH: loop header
LB: loop body
LE: loop exit
PB: predicated region body
PF: predicated region fallthrough
CT: control target
= control target key end

     0   :  { %s3995_s18 = smov 0   ;;  %s5306_s0 = inlined_call_operand.vmem [shape: bf16[2,16,16,128], index: 0, kind: input, shape index: {}]   ;;  %s5307_s1 = inlined_call_operand.vmem [shape: bf16[3,384,128], index: 1, kind: input, shape index: {}]   ;;  %s5308_s2 = inlined_call_operand.vmem [shape: f32[1,128], index: 2, kind: input, shape index: {}]   ;;  %s5309_s3 = inlined_call_operand.vmem [shape: f32[1,128], index: 3, kind: input, shape index: {}]   ;;  %s5310_s4 = inlined_call_operand.vmem [shape: bf16[2,256,128], index: 4, kind: output, shape index: {0}]   ;;  %s5311_s5 = inlined_call_operand.vmem [shape: f32[2,2,128], index: 5, kind: output, shape index: {1}]  }
   0x1 LB: > { %s2884_s19 = sadd.s32 4294967295, %s3962_s18   ;;  %p2888_p0 = scmp.ge.s32.totalorder %s3962_s18, 1  ;;  %s3962_s18 = sphi %s3995_s18, %s16_s18  }
   0x2   : > { %p190_p1 = scmp.lt.s32.totalorder %s3962_s18, 3 }
   0x4   : > { %p191_p2 = pnand %p2888_p0, %p190_p1 }
   0x6   : > { %194 = sbr.rel (%p191_p2) target bundleno = 628 (0x274), region = 36 }
   0xb   : > { %v3883_v0 = vld [vmem:[%s5307_s1 + $0x138] sm:$0xff]   ;;  %v3885_v2 = vld [vmem:[%s5307_s1 + $0x130] sm:$0xff]   ;;  %p4014_p3 = scmp.lt.s32.totalorder %s2884_s19, 1  ;;  %v3964_v3 = vmov 0.0   ;;  %v3887_v5 = vld [vmem:[%s5307_s1 + $0x128] sm:$0xff]   ;;  %vm2795_vm0 = vcmask 1040384  }
   0xc   : > { %v3884_v1 = vld [vmem:[%s5307_s1 + $0xf8] sm:$0xff]   ;;  %3306 = vmatprep.subr.bf16.mxu0 %v3883_v0  ;;  %3858 = vmatprep.subr.bf16.mxu1 %v3883_v0  ;;  %245 = vst [vmem:[#allocation2 + $0x18] sm:$0x1] %v3964_v3  ;;  %237 = vst [vmem:[#allocation2] sm:$0xff] %v3964_v3  ;;  %v3886_v4 = vld [vmem:[%s5307_s1 + $0xf0] sm:$0xff]  }
   0xd   : > { %238 = vst [vmem:[#allocation2 + $0x8] sm:$0xff] %v3964_v3  ;;  %239 = vst [vmem:[#allocation2 + $0x10] sm:$0x3] %v3964_v3  ;;  %3307 = vmatpush3.bf16.msra.mxu0 %v3884_v1  ;;  %3866 = vmatpush3.bf16.msra.mxu1 %v3884_v1  ;;  %s5348_s19 = smov (!%p4014_p3, %s2884_s19), 1  ;;  %v3888_v6 = vld [vmem:[%s5307_s1 + $0xe8] sm:$0xff]   ;;  %v3889_v7 = vld [vmem:[%s5307_s1 + $0x120] sm:$0xff]  }
   0xe   : > { %241 = vst [vmem:[#allocation2 + $0x198] sm:$0xff] %v3964_v3  ;;  %242 = vst [vmem:[#allocation2 + $0x1a0] sm:$0xff] %v3964_v3  ;;  %3308 = vmatprep.subr.bf16.mxu0 %v3885_v2  ;;  %3859 = vmatprep.subr.bf16.mxu1 %v3885_v2  ;;  %s3098_s10 = sshll.u32 %s5348_s19, 7  ;;  %v3890_v8 = vld [vmem:[%s5307_s1 + $0xe0] sm:$0xff]   ;;  %v3891_v9 = vld [vmem:[%s5307_s1 + $0x118] sm:$0xff]  }
   0xf   : > { %243 = vst [vmem:[#allocation2 + $0x1a8] sm:$0x3] %v3964_v3  ;;  %246 = vst [vmem:[#allocation2 + $0x30] sm:$0x1] %v3964_v3  ;;  %s4048_s17 = scalar_lea.vmem %s5306_s0, %s3098_s10  ;;  %v3892_v10 = vld [vmem:[%s5307_s1 + $0xd8] sm:$0xff]   ;;  %v3893_v11 = vld [vmem:[%s5307_s1 + $0x110] sm:$0xff]   ;;  %s5011_s22 = scalar_lea.vmem %s5310_s4, %s3098_s10 }
  0x10   : > { %247 = vst [vmem:[#allocation2 + $0x48] sm:$0x1] %v3964_v3  ;;  %248 = vst [vmem:[#allocation2 + $0x60] sm:$0x1] %v3964_v3  ;;  %v3133_v12 = vld [vmem:[%s4048_s17] sm:$0xff]   ;;  %v3894_v20 = vld [vmem:[%s5307_s1 + $0xd0] sm:$0xff]  }
  0x11   : > { %249 = vst [vmem:[#allocation2 + $0x78] sm:$0x1] %v3964_v3  ;;  %250 = vst [vmem:[#allocation2 + $0x90] sm:$0x1] %v3964_v3  ;;  %3309 = vmatpush3.bf16.msra.mxu0 %v3886_v4  ;;  %3867 = vmatpush3.bf16.msra.mxu1 %v3886_v4  ;;  %v4060_v13 = vld [vmem:[%s5308_s2] ss:$0 sm:$0xff]  ;;  %v3134_v14 = vunpack.c.l.bf16 %v3133_v12  ;;  %v3135_v15 = vunpack.c.h.bf16 %v3133_v12 }
  0x12   : > { %251 = vst [vmem:[#allocation2 + $0xa8] sm:$0x1] %v3964_v3  ;;  %252 = vst [vmem:[#allocation2 + $0xc0] sm:$0x1] %v3964_v3  ;;  %3310 = vmatprep.subr.bf16.mxu0 %v3887_v5  ;;  %3860 = vmatprep.subr.bf16.mxu1 %v3887_v5  ;;  %v3287_v16 = vld [vmem:[%s4048_s17 + $0x60] sm:$0xff]   ;;  %v3895_v23 = vld [vmem:[%s5307_s1 + $0x108] sm:$0xff]  }
  0x13   : > { %253 = vst [vmem:[#allocation2 + $0xd8] sm:$0x1] %v3964_v3  ;;  %254 = vst [vmem:[#allocation2 + $0xf0] sm:$0x1] %v3964_v3  ;;  %v4066_v17 = vld [vmem:[%s5309_s3] ss:$0 sm:$0xff]  ;;  %v3182_v18 = vunpack.c.l.bf16 %v3287_v16  ;;  %v3183_v19 = vunpack.c.h.bf16 %v3287_v16  ;;  %v351_v21 = vmul.f32 %v3134_v14, %v4060_v13  ;;  %v352_v22 = vmul.f32 %v3135_v15, %v4060_v13 }
  0x14   : > { %255 = vst [vmem:[#allocation2 + $0x108] sm:$0x1] %v3964_v3  ;;  %256 = vst [vmem:[#allocation2 + $0x120] sm:$0x1] %v3964_v3  ;;  %v3276_v26 = vld [vmem:[%s4048_s17 + $0x8] sm:$0xff]   ;;  %v3897_v41 = vld [vmem:[%s5307_s1 + $0x100] sm:$0xff]  }
  0x15   : > { %257 = vst [vmem:[#allocation2 + $0x138] sm:$0x1] %v3964_v3  ;;  %258 = vst [vmem:[#allocation2 + $0x150] sm:$0x1] %v3964_v3  ;;  %3311 = vmatpush3.bf16.msra.mxu0 %v3888_v6  ;;  %3868 = vmatpush3.bf16.msra.mxu1 %v3888_v6  ;;  %v375_v24 = vmul.f32 %v3182_v18, %v4060_v13  ;;  %v376_v25 = vmul.f32 %v3183_v19, %v4060_v13  ;;  %v3288_v27 = vld [vmem:[%s4048_s17 + $0x68] sm:$0xff]   ;;  %v3138_v30 = vunpack.c.l.bf16 %v3276_v26  ;;  %v3277_v46 = vld [vmem:[%s4048_s17 + $0x10] sm:$0xff]  }
  0x16   : > { %259 = vst [vmem:[#allocation2 + $0x168] sm:$0x1] %v3964_v3  ;;  %260 = vst [vmem:[#allocation2 + $0x180] sm:$0x1] %v3964_v3  ;;  %3312 = vmatprep.subr.bf16.mxu0 %v3889_v7  ;;  %3861 = vmatprep.subr.bf16.mxu1 %v3889_v7  ;;  %v390_v28 = vadd.f32 %v4066_v17, %v351_v21  ;;  %v391_v29 = vadd.f32 %v4066_v17, %v352_v22  ;;  %v3139_v31 = vunpack.c.h.bf16 %v3276_v26  ;;  %v3896_v32 = vld [vmem:[%s5307_s1 + $0xc8] sm:$0xff]   ;;  %v3289_v47 = vld [vmem:[%s4048_s17 + $0x70] sm:$0xff]  }
  0x17   : > { %263 = vst [vmem:[#allocation2 + $0x29] sm:$0x1] %v3964_v3  ;;  %264 = vst [vmem:[#allocation2 + $0x41] sm:$0x1] %v3964_v3  ;;  %v414_v33 = vadd.f32 %v4066_v17, %v375_v24  ;;  %v415_v34 = vadd.f32 %v4066_v17, %v376_v25  ;;  %v3186_v35 = vunpack.c.l.bf16 %v3288_v27  ;;  %v3187_v36 = vunpack.c.h.bf16 %v3288_v27  ;;  %v3898_v52 = vld [vmem:[%s5307_s1 + $0xc0] sm:$0xff]   ;;  %v4106_v57 = vld [vmem:[%s5307_s1 + $0x178] sm:$0xff]  }
  0x18   : > { %265 = vst [vmem:[#allocation2 + $0x59] sm:$0x1] %v3964_v3  ;;  %266 = vst [vmem:[#allocation2 + $0x71] sm:$0x1] %v3964_v3  ;;  %v422_v37 = vmax.f32 %v390_v28, 0.0  ;;  %v423_v38 = vmax.f32 %v391_v29, 0.0  ;;  %v353_v39 = vmul.f32 %v3138_v30, %v4060_v13  ;;  %v354_v40 = vmul.f32 %v3139_v31, %v4060_v13 }
  0x19   : > { %267 = vst [vmem:[#allocation2 + $0x89] sm:$0x1] %v3964_v3  ;;  %268 = vst [vmem:[#allocation2 + $0xa1] sm:$0x1] %v3964_v3  ;;  %3313 = vmatpush3.bf16.msra.mxu0 %v3890_v8  ;;  %3869 = vmatpush3.bf16.msra.mxu1 %v3890_v8  ;;  %v446_v42 = vmax.f32 %v414_v33, 0.0  ;;  %v447_v43 = vmax.f32 %v415_v34, 0.0  ;;  %v377_v44 = vmul.f32 %v3186_v35, %v4060_v13  ;;  %v3142_v51 = vunpack.c.l.bf16 %v3277_v46 }
  0x1a   : > { %269 = vst [vmem:[#allocation2 + $0xb9] sm:$0x1] %v3964_v3  ;;  %270 = vst [vmem:[#allocation2 + $0xd1] sm:$0x1] %v3964_v3  ;;  %3314 = vmatprep.subr.bf16.mxu0 %v3891_v9  ;;  %3862 = vmatprep.subr.bf16.mxu1 %v3891_v9  ;;  %v378_v45 = vmul.f32 %v3187_v36, %v4060_v13  ;;  %v759_v48 = vpack.c.bf16 %v423_v38, %v422_v37  ;;  %v3143_v56 = vunpack.c.h.bf16 %v3277_v46  ;;  %v3278_v62 = vld [vmem:[%s4048_s17 + $0x18] sm:$0xff]   ;;  %v3279_v24 = vld [vmem:[%s4048_s17 + $0x20] sm:$0xff]  }
  0x1b   : > { %271 = vst [vmem:[#allocation2 + $0xe9] sm:$0x1] %v3964_v3  ;;  %272 = vst [vmem:[#allocation2 + $0x101] sm:$0x1] %v3964_v3  ;;  %v392_v49 = vadd.f32 %v4066_v17, %v353_v39  ;;  %v393_v50 = vadd.f32 %v4066_v17, %v354_v40  ;;  %v771_v53 = vpack.c.bf16 %v447_v43, %v446_v42  ;;  %v3190_v61 = vunpack.c.l.bf16 %v3289_v47  ;;  %v3900_v63 = vld [vmem:[%s5307_s1 + $0xb8] sm:$0xff]   ;;  %v3904_v36 = vld [vmem:[%s5307_s1 + $0xb0] sm:$0xff]  }
  0x1c   : > { %273 = vst [vmem:[#allocation2 + $0x119] sm:$0x1] %v3964_v3  ;;  %274 = vst [vmem:[#allocation2 + $0x131] sm:$0x1] %v3964_v3  ;;  %v416_v54 = vadd.f32 %v4066_v17, %v377_v44  ;;  %v417_v55 = vadd.f32 %v4066_v17, %v378_v45  ;;  %v355_v60 = vmul.f32 %v3142_v51, %v4060_v13  ;;  %v3290_v4 = vld [vmem:[%s4048_s17 + $0x78] sm:$0xff]   ;;  %1048 = vmatprep.mubr.bf16.mxu0 %v759_v48  ;;  %s2893_s10 = sshll.u32 %s5348_s19, 1 }
  0x1d   : > { %275 = vst [vmem:[#allocation2 + $0x149] sm:$0x1] %v3964_v3  ;;  %276 = vst [vmem:[#allocation2 + $0x161] sm:$0x1] %v3964_v3  ;;  %3315 = vmatpush3.bf16.msra.mxu0 %v3892_v10  ;;  %3870 = vmatpush3.bf16.msra.mxu1 %v3892_v10  ;;  %v424_v58 = vmax.f32 %v392_v49, 0.0  ;;  %v425_v59 = vmax.f32 %v393_v50, 0.0  ;;  %v356_v2 = vmul.f32 %v3143_v56, %v4060_v13  ;;  %v3146_v7 = vunpack.c.l.bf16 %v3278_v62  ;;  %s235_s24 = scalar_lea.vmem %s5311_s5, %s2893_s10 }
  0x1e   : > { %277 = vst [vmem:[#allocation2 + $0x179] sm:$0x1] %v3964_v3  ;;  %278 = vst [vmem:[#allocation2 + $0x191] sm:$0x1] %v3964_v3  ;;  %3316 = vmatprep.subr.bf16.mxu0 %v3893_v11  ;;  %3863 = vmatprep.subr.bf16.mxu1 %v3893_v11  ;;  %v448_v0 = vmax.f32 %v416_v54, 0.0  ;;  %v449_v1 = vmax.f32 %v417_v55, 0.0  ;;  %v4116_v5 = vadd.f32 %v4066_v17, %v355_v60  ;;  %v3147_v11 = vunpack.c.h.bf16 %v3278_v62 }
  0x1f   : > { %244 = vst [vmem:[#allocation2] sm:$0x1] %v3964_v3  ;;  %261 = vst [vmem:[#allocation2 + $0x198] sm:$0x1] %v3964_v3  ;;  %1144 = vmatprep.mubr.bf16.mxu1 %v771_v53  ;;  %v379_v6 = vmul.f32 %v3190_v61, %v4060_v13  ;;  %v4119_v8 = vpack.c.bf16 %v425_v59, %v424_v58  ;;  %v4122_v9 = vadd.f32 %v4066_v17, %v356_v2  ;;  %v3908_v50 = vld [vmem:[%s5307_s1 + $0xa8] sm:$0xff]   ;;  %v3281_v62 = vld [vmem:[%s4048_s17 + $0x30] sm:$0xff]  }
  0x20   : > { %262 = vst [vmem:[#allocation2 + $0x11] sm:$0x1] %v3964_v3  ;;  %279 = vst [vmem:[#allocation2 + $0x1a9] sm:$0x1] %v3964_v3  ;;  %v3191_v3 = vunpack.c.h.bf16 %v3289_v47  ;;  %v426_v12 = vmax.f32 %v4116_v5, 0.0  ;;  %v357_v15 = vmul.f32 %v3146_v7, %v4060_v13  ;;  %v3194_v16 = vunpack.c.l.bf16 %v3290_v4  ;;  %v3280_v53 = vld [vmem:[%s4048_s17 + $0x28] sm:$0xff]  }
  0x21   : > { %3317 = vmatpush3.bf16.msra.mxu0 %v3894_v20  ;;  %3871 = vmatpush3.bf16.msra.mxu1 %v3894_v20  ;;  %455 = vst [vmem:[#allocation2 + $0x19] sm:$0xff] %v422_v37  ;;  %456 = vst [vmem:[#allocation2 + $0x21] sm:$0xff] %v423_v38  ;;  %v4127_v14 = vadd.f32 %v4066_v17, %v379_v6  ;;  %v427_v20 = vmax.f32 %v4122_v9, 0.0  ;;  %v358_v22 = vmul.f32 %v3147_v11, %v4060_v13  ;;  %v3912_v6 = vld [vmem:[%s5307_s1 + $0xa0] sm:$0xff]  }
  0x22   : > { %3318 = vmatprep.subr.bf16.mxu0 %v3895_v23  ;;  %3864 = vmatprep.subr.bf16.mxu1 %v3895_v23  ;;  %479 = vst [vmem:[#allocation2 + $0x139] sm:$0xff] %v446_v42  ;;  %480 = vst [vmem:[#allocation2 + $0x141] sm:$0xff] %v447_v43  ;;  %v380_v10 = vmul.f32 %v3191_v3, %v4060_v13  ;;  %v3195_v23 = vunpack.c.h.bf16 %v3290_v4  ;;  %v4137_v29 = vadd.f32 %v4066_v17, %v357_v15  ;;  %v3902_v43 = vld [vmem:[%s5307_s1 + $0x168] sm:$0xff]   ;;  %v3903_v3 = vld [vmem:[%s5307_s1 + $0x160] sm:$0xff]  }
  0x23   : > { %457 = vst [vmem:[#allocation2 + $0x31] sm:$0xff] %v424_v58  ;;  %458 = vst [vmem:[#allocation2 + $0x39] sm:$0xff] %v425_v59  ;;  %v450_v28 = vmax.f32 %v4127_v14, 0.0  ;;  %v381_v30 = vmul.f32 %v3194_v16, %v4060_v13  ;;  %v772_v33 = vpack.c.bf16 %v449_v1, %v448_v0  ;;  %v4144_v35 = vadd.f32 %v4066_v17, %v358_v22 }
  0x24   : > { %481 = vst [vmem:[#allocation2 + $0x151] sm:$0xff] %v448_v0  ;;  %482 = vst [vmem:[#allocation2 + $0x159] sm:$0xff] %v449_v1  ;;  %v419_v21 = vadd.f32 %v4066_v17, %v380_v10  ;;  %v428_v37 = vmax.f32 %v4137_v29, 0.0  ;;  %v382_v38 = vmul.f32 %v3195_v23, %v4060_v13  ;;  %v3150_v40 = vunpack.c.l.bf16 %v3279_v24  ;;  %v3906_v29 = vld [vmem:[%s5307_s1 + $0x150] sm:$0xff]  }
  0x25   : > { %3319 = vmatpush3.bf16.msra.mxu0 %v3896_v32  ;;  %3872 = vmatpush3.bf16.msra.mxu1 %v3896_v32  ;;  %459 = vst [vmem:[#allocation2 + $0x49] sm:$0xff] %v426_v12  ;;  %v3901_v32 = vld [vmem:[%s5307_s1 + $0x170] sm:$0xff]   ;;  %460 = vst [vmem:[#allocation2 + $0x51] sm:$0xff] %v427_v20  ;;  %v4152_v39 = vadd.f32 %v4066_v17, %v381_v30  ;;  %v429_v44 = vmax.f32 %v4144_v35, 0.0  ;;  %v3151_v45 = vunpack.c.h.bf16 %v3279_v24  ;;  %v3155_v61 = vunpack.c.h.bf16 %v3280_v53 }
  0x26   : > { %3320 = vmatprep.subr.bf16.mxu0 %v3897_v41  ;;  %3865 = vmatprep.subr.bf16.mxu1 %v3897_v41  ;;  %v451_v34 = vmax.f32 %v419_v21, 0.0  ;;  %483 = vst [vmem:[#allocation2 + $0x169] sm:$0xff] %v450_v28  ;;  %461 = vst [vmem:[#allocation2 + $0x61] sm:$0xff] %v428_v37  ;;  %v4163_v48 = vadd.f32 %v4066_v17, %v382_v38  ;;  %v359_v51 = vmul.f32 %v3150_v40, %v4060_v13  ;;  %v3905_v21 = vld [vmem:[%s5307_s1 + $0x158] sm:$0xff]   ;;  %v3907_v40 = vld [vmem:[%s5307_s1 + $0x148] sm:$0xff]  }
  0x27   : > { %v452_v49 = vmax.f32 %v4152_v39, 0.0  ;;  %462 = vst [vmem:[#allocation2 + $0x69] sm:$0xff] %v429_v44  ;;  %v4182_v59 = vpack.c.bf16 %v427_v20, %v426_v12  ;;  %v3158_v2 = vunpack.c.l.bf16 %v3281_v62  ;;  %v362_v5 = vmul.f32 %v3155_v61, %v4060_v13 }
  0x28   : > { %v679_v18 = vld [vmem:[#allocation2 + $0x18] sm:$0xff]  ;;  %v680_v19 = vld [vmem:[#allocation2 + $0x20] sm:$0xff]  ;;  %484 = vst [vmem:[#allocation2 + $0x171] sm:$0xff] %v451_v34  ;;  %v453_v55 = vmax.f32 %v4163_v48, 0.0  ;;  %v4180_v56 = vadd.f32 %v4066_v17, %v359_v51  ;;  %v3159_v9 = vunpack.c.h.bf16 %v3281_v62  ;;  %v4236_v30 = vpack.c.bf16 %v429_v44, %v428_v37 }
  0x29   : > { %3321 = vmatpush3.bf16.msra.mxu0 %v3898_v52  ;;  %3873 = vmatpush3.bf16.msra.mxu1 %v3898_v52  ;;  %v711_v25 = vpack.c.bf16 %v680_v19, %v679_v18  ;;  %v703_v26 = vld [vmem:[#allocation2 + $0x138] sm:$0xff]  ;;  %v704_v27 = vld [vmem:[#allocation2 + $0x140] sm:$0xff]  ;;  %v360_v52 = vmul.f32 %v3151_v45, %v4060_v13  ;;  %485 = vst [vmem:[#allocation2 + $0x181] sm:$0xff] %v452_v49  ;;  %v3284_v45 = vld [vmem:[%s4048_s17 + $0x48] sm:$0xff]  }
  0x2a   : > { %3714 = vmatprep.subr.bf16.mxu1 %v4106_v57  ;;  %3762 = vmatprep.subr.bf16.mxu0 %v3900_v63  ;;  %v723_v31 = vpack.c.bf16 %v704_v27, %v703_v26  ;;  %v681_v41 = vld [vmem:[#allocation2 + $0x30] sm:$0xff]  ;;  %v682_v42 = vld [vmem:[#allocation2 + $0x38] sm:$0xff]  ;;  %486 = vst [vmem:[#allocation2 + $0x189] sm:$0xff] %v453_v55  ;;  %v430_v0 = vmax.f32 %v4180_v56, 0.0  ;;  %v363_v10 = vmul.f32 %v3158_v2, %v4060_v13  ;;  %v3283_v44 = vld [vmem:[%s4048_s17 + $0x40] sm:$0xff]  }
  0x2b   : > { %v705_v46 = vld [vmem:[#allocation2 + $0x150] sm:$0xff]  ;;  %v706_v47 = vld [vmem:[#allocation2 + $0x158] sm:$0xff]  ;;  %v4174_v54 = vpack.c.bf16 %v682_v42, %v681_v41  ;;  %v4185_v60 = vadd.f32 %v4066_v17, %v360_v52  ;;  %v4209_v14 = vadd.f32 %v4066_v17, %v362_v5  ;;  %v364_v19 = vmul.f32 %v3159_v9, %v4060_v13  ;;  %v776_v52 = vld [vmem:[#allocation2 + $0x22] sm:$0xff] }
  0x2c   : > { %1049 = vmatmul.mubr.bf16.vlgmr.msra.gmra.mxu0 %v711_v25  ;;  %1145 = vmatmul.mubr.bf16.vlgmr.msra.gmra.mxu1 %v723_v31  ;;  %v724_v58 = vpack.c.bf16 %v706_v47, %v705_v46  ;;  %463 = vst [vmem:[#allocation2 + $0x79] sm:$0xff] %v430_v0  ;;  %v683_v11 = vld [vmem:[#allocation2 + $0x48] sm:$0xff]  ;;  %v684_v12 = vld [vmem:[#allocation2 + $0x50] sm:$0xff]  ;;  %v4214_v20 = vadd.f32 %v4066_v17, %v363_v10  ;;  %v3917_v26 = vld [vmem:[%s5307_s1 + $0x98] sm:$0xff]   ;;  %v3166_v48 = vunpack.c.l.bf16 %v3283_v44 }
  0x2d   : > { %3763 = vmatpush3.bf16.msra.mxu0 %v3900_v63  ;;  %3715 = vmatpush3.bf16.msra.mxu1 %v4106_v57  ;;  %v3154_v57 = vunpack.c.l.bf16 %v3280_v53  ;;  %v773_v63 = vpack.c.bf16 %v451_v34, %v450_v28  ;;  %v431_v4 = vmax.f32 %v4185_v60, 0.0  ;;  %v707_v15 = vld [vmem:[#allocation2 + $0x168] sm:$0xff]  ;;  %v433_v22 = vmax.f32 %v4209_v14, 0.0  ;;  %v3282_v27 = vld [vmem:[%s4048_s17 + $0x38] sm:$0xff]   ;;  %v685_v37 = vld [vmem:[#allocation2 + $0x60] sm:$0xff] }
  0x2e   : > { %1056 = vmatprep.mubr.bf16.mxu0 %v4119_v8  ;;  %3716 = vmatprep.subr.bf16.mxu1 %v3901_v32  ;;  %v4220_v23 = vpack.c.bf16 %v684_v12, %v683_v11  ;;  %v4225_v24 = vadd.f32 %v4066_v17, %v364_v19  ;;  %v434_v25 = vmax.f32 %v4214_v20, 0.0  ;;  %v3162_v31 = vunpack.c.l.bf16 %v3282_v27  ;;  %v686_v38 = vld [vmem:[#allocation2 + $0x68] sm:$0xff]  ;;  %v775_v41 = vld [vmem:[#allocation2 + $0x1a] sm:$0xff]  ;;  %v777_v19 = vld [vmem:[#allocation2 + $0x32] sm:$0xff] }
  0x2f   : > { %1152 = vmatprep.mubr.bf16.mxu1 %v772_v33  ;;  %3764 = vmatprep.subr.bf16.mxu0 %v3904_v36  ;;  %v361_v1 = vmul.f32 %v3154_v57, %v4060_v13  ;;  %464 = vst [vmem:[#allocation2 + $0x81] sm:$0xff] %v431_v4  ;;  %v708_v16 = vld [vmem:[#allocation2 + $0x170] sm:$0xff]  ;;  %466 = vst [vmem:[#allocation2 + $0x99] sm:$0xff] %v433_v22  ;;  %v774_v33 = vpack.c.bf16 %v453_v55, %v452_v49  ;;  %v3167_v49 = vunpack.c.h.bf16 %v3283_v44  ;;  %v3919_v20 = vld [vmem:[%s5307_s1 + $0x20] sm:$0xff]  }
  0x30   : > { %v725_v28 = vpack.c.bf16 %v708_v16, %v707_v15  ;;  %v435_v34 = vmax.f32 %v4225_v24, 0.0  ;;  %467 = vst [vmem:[#allocation2 + $0xa9] sm:$0xff] %v434_v25  ;;  %v365_v35 = vmul.f32 %v3162_v31, %v4060_v13  ;;  %v709_v39 = vld [vmem:[#allocation2 + $0x180] sm:$0xff]  ;;  %v4268_v51 = vpack.c.bf16 %v686_v38, %v685_v37  ;;  %v3910_v37 = vld [vmem:[%s5307_s1 + $0x78] sm:$0xff]   ;;  %v779_v38 = vld [vmem:[#allocation2 + $0x4a] sm:$0xff] }
  0x31   : > { %3765 = vmatpush3.bf16.msra.mxu0 %v3904_v36  ;;  %3717 = vmatpush3.bf16.msra.mxu1 %v3901_v32  ;;  %v4202_v7 = vadd.f32 %v4066_v17, %v361_v1  ;;  %v3163_v32 = vunpack.c.h.bf16 %v3282_v27  ;;  %v710_v46 = vld [vmem:[#allocation2 + $0x188] sm:$0xff]  ;;  %v3171_v55 = vunpack.c.h.bf16 %v3284_v45  ;;  %v368_v61 = vmul.f32 %v3167_v49, %v4060_v13  ;;  %v3913_v14 = vld [vmem:[%s5307_s1 + $0x70] sm:$0xff]  }
  0x32   : > { %3766 = vmatprep.subr.bf16.mxu0 %v3908_v50  ;;  %3718 = vmatprep.subr.bf16.mxu1 %v3902_v43  ;;  %468 = vst [vmem:[#allocation2 + $0xb1] sm:$0xff] %v435_v34  ;;  %v4258_v42 = vadd.f32 %v4066_v17, %v365_v35  ;;  %v4279_v1 = vpack.c.bf16 %v431_v4, %v430_v0  ;;  %v3286_v0 = vld [vmem:[%s4048_s17 + $0x58] sm:$0xff]   ;;  %v3909_v4 = vld [vmem:[%s5307_s1 + $0x140] sm:$0xff]  }
  0x33   : > { %v432_v18 = vmax.f32 %v4202_v7, 0.0  ;;  %v366_v36 = vmul.f32 %v3163_v32, %v4060_v13  ;;  %v370_v2 = vmul.f32 %v3171_v55, %v4060_v13  ;;  %v4285_v5 = vpack.c.bf16 %v776_v52, %v775_v41  ;;  %v687_v15 = vld [vmem:[#allocation2 + $0x78] sm:$0xff] }
  0x34   : > { %1057 = vmatmul.mubr.bf16.gmra.mxu0 %v4174_v54  ;;  %1153 = vmatmul.mubr.bf16.gmra.mxu1 %v724_v58  ;;  %v436_v53 = vmax.f32 %v4258_v42, 0.0  ;;  %v367_v58 = vmul.f32 %v3166_v48, %v4060_v13  ;;  %v4293_v56 = vadd.f32 %v4066_v17, %v368_v61  ;;  %v3178_v12 = vunpack.c.l.bf16 %v3286_v0  ;;  %v781_v61 = vld [vmem:[#allocation2 + $0x62] sm:$0xff] }
  0x35   : > { %1064 = vmatprep.mubr.bf16.mxu0 %v4182_v59  ;;  %3719 = vmatpush3.bf16.msra.mxu1 %v3902_v43  ;;  %465 = vst [vmem:[#allocation2 + $0x91] sm:$0xff] %v432_v18  ;;  %v3920_v43 = vld [vmem:[%s5307_s1 + $0x90] sm:$0xff]   ;;  %v4266_v47 = vadd.f32 %v4066_v17, %v366_v36  ;;  %v4303_v9 = vadd.f32 %v4066_v17, %v370_v2  ;;  %v3925_v36 = vld [vmem:[%s5307_s1 + $0x88] sm:$0xff]  }
  0x36   : > { %1160 = vmatprep.mubr.bf16.mxu1 %v773_v63  ;;  %3720 = vmatprep.subr.bf16.mxu1 %v3903_v3  ;;  %v726_v63 = vpack.c.bf16 %v710_v46, %v709_v39  ;;  %469 = vst [vmem:[#allocation2 + $0xc1] sm:$0xff] %v436_v53  ;;  %v688_v16 = vld [vmem:[#allocation2 + $0x80] sm:$0xff]  ;;  %v373_v35 = vmul.f32 %v3178_v12, %v4060_v13  ;;  %v780_v39 = vld [vmem:[#allocation2 + $0x52] sm:$0xff] }
  0x37   : > { %3767 = vmatpush3.bf16.msra.mxu0 %v3908_v50  ;;  %v3170_v50 = vunpack.c.l.bf16 %v3284_v45  ;;  %v437_v57 = vmax.f32 %v4266_v47, 0.0  ;;  %v4347_v48 = vpack.c.bf16 %v433_v22, %v432_v18  ;;  %v4354_v52 = vpack.c.bf16 %v780_v39, %v779_v38  ;;  %v783_v2 = vld [vmem:[#allocation2 + $0x7a] sm:$0xff]  ;;  %v691_v24 = vld [vmem:[#allocation2 + $0xa8] sm:$0xff] }
  0x38   : > { %3768 = vmatprep.subr.bf16.mxu0 %v3912_v6  ;;  %v4339_v45 = vadd.f32 %v4066_v17, %v373_v35  ;;  %v3932_v35 = vld [vmem:[%s5307_s1 + $0x1f8] sm:$0xff]  }
  0x39   : > { %3721 = vmatpush3.bf16.msra.mxu1 %v3903_v3  ;;  %v369_v62 = vmul.f32 %v3170_v50, %v4060_v13  ;;  %v3285_v3 = vld [vmem:[%s4048_s17 + $0x50] sm:$0xff]   ;;  %470 = vst [vmem:[#allocation2 + $0xc9] sm:$0xff] %v437_v57  ;;  %v3922_v39 = vld [vmem:[%s5307_s1 + $0x18] sm:$0xff]  }
  0x3a   : > { %3722 = vmatprep.subr.bf16.mxu1 %v3905_v21  ;;  %v3174_v10 = vunpack.c.l.bf16 %v3285_v3  ;;  %v3175_v11 = vunpack.c.h.bf16 %v3285_v3  ;;  %v444_v7 = vmax.f32 %v4339_v45, 0.0  ;;  %v784_v3 = vld [vmem:[#allocation2 + $0x82] sm:$0xff]  ;;  %v584_v45 = vld [vmem:[#allocation2 + $0xa] sm:$0xff] }
  0x3b   : > { %3769 = vmatpush3.bf16.msra.mxu0 %v3912_v6  ;;  %v4290_v6 = vadd.f32 %v4066_v17, %v367_v58  ;;  %v4296_v60 = vadd.f32 %v4066_v17, %v369_v62  ;;  %v782_v62 = vld [vmem:[#allocation2 + $0x6a] sm:$0xff]  ;;  %v4395_v12 = vpack.c.bf16 %v784_v3, %v783_v2 }
  0x3c   : > { %1065 = vmatmul.mubr.bf16.gmra.mxu0 %v4220_v23  ;;  %3770 = vmatprep.subr.bf16.mxu0 %v3917_v26  ;;  %v371_v31 = vmul.f32 %v3174_v10, %v4060_v13  ;;  %v372_v32 = vmul.f32 %v3175_v11, %v4060_v13  ;;  %477 = vst [vmem:[#allocation2 + $0x121] sm:$0xff] %v444_v7  ;;  %v689_v22 = vld [vmem:[#allocation2 + $0x90] sm:$0xff]  ;;  %v690_v58 = vld [vmem:[#allocation2 + $0x98] sm:$0xff]  ;;  %v3927_v2 = vld [vmem:[%s5307_s1 + $0x8] sm:$0xff]  }
  0x3d   : > { %1161 = vmatmul.mubr.bf16.gmra.mxu1 %v725_v28  ;;  %1072 = vmatprep.mubr.bf16.mxu0 %v4236_v30  ;;  %v440_v27 = vmax.f32 %v4296_v60, 0.0  ;;  %v441_v28 = vmax.f32 %v4303_v9, 0.0  ;;  %v4387_v10 = vpack.c.bf16 %v782_v62, %v781_v61  ;;  %v4393_v11 = vpack.c.bf16 %v435_v34, %v434_v25  ;;  %v692_v25 = vld [vmem:[#allocation2 + $0xb0] sm:$0xff]  ;;  %v799_v9 = vld [vmem:[#allocation2 + $0x13a] sm:$0xff] }
  0x3e   : > { %3723 = vmatpush3.bf16.msra.mxu1 %v3905_v21  ;;  %1168 = vmatprep.mubr.bf16.mxu1 %v774_v33  ;;  %v438_v21 = vmax.f32 %v4290_v6, 0.0  ;;  %v778_v33 = vld [vmem:[#allocation2 + $0x3a] sm:$0xff]  ;;  %v4333_v41 = vadd.f32 %v4066_v17, %v372_v32  ;;  %v785_v34 = vld [vmem:[#allocation2 + $0x92] sm:$0xff]  ;;  %v787_v32 = vld [vmem:[#allocation2 + $0xaa] sm:$0xff] }
  0x3f   : > { %3724 = vmatprep.subr.bf16.mxu1 %v3906_v29  ;;  %3771 = vmatpush3.bf16.msra.mxu0 %v3917_v26  ;;  %v439_v26 = vmax.f32 %v4293_v56, 0.0  ;;  %473 = vst [vmem:[#allocation2 + $0xf1] sm:$0xff] %v440_v27  ;;  %474 = vst [vmem:[#allocation2 + $0xf9] sm:$0xff] %v441_v28  ;;  %v4341_v46 = vpack.c.bf16 %v778_v33, %v777_v19  ;;  %v3921_v19 = vld [vmem:[%s5307_s1 + $0x58] sm:$0xff]  }
  0x40   : > { %3772 = vmatprep.subr.bf16.mxu0 %v3920_v43  ;;  %471 = vst [vmem:[#allocation2 + $0xd9] sm:$0xff] %v438_v21  ;;  %v443_v50 = vmax.f32 %v4333_v41, 0.0  ;;  %v788_v33 = vld [vmem:[#allocation2 + $0xb2] sm:$0xff]  ;;  %v789_v42 = vld [vmem:[#allocation2 + $0xc2] sm:$0xff]  ;;  %v790_v47 = vld [vmem:[#allocation2 + $0xca] sm:$0xff] }
  0x41   : > { %472 = vst [vmem:[#allocation2 + $0xe1] sm:$0xff] %v439_v26  ;;  %v4426_v38 = vpack.c.bf16 %v788_v33, %v787_v32  ;;  %v4446_v61 = vpack.c.bf16 %v790_v47, %v789_v42  ;;  %v4452_v62 = vpack.c.bf16 %v439_v26, %v438_v21  ;;  %v801_v42 = vld [vmem:[#allocation2 + $0x152] sm:$0xff]  ;;  %v802_v47 = vld [vmem:[#allocation2 + $0x15a] sm:$0xff] }
  0x42   : > { %3725 = vmatpush3.bf16.msra.mxu1 %v3906_v29  ;;  %v3179_v29 = vunpack.c.h.bf16 %v3286_v0  ;;  %476 = vst [vmem:[#allocation2 + $0x111] sm:$0xff] %v443_v50  ;;  %v3915_v0 = vld [vmem:[%s5307_s1 + $0x68] sm:$0xff]   ;;  %v4509_v41 = vpack.c.bf16 %v802_v47, %v801_v42  ;;  %v490_v42 = vld [vmem:[#allocation2 + $0x20] sm:$0xff] }
  0x43   : > { %3726 = vmatprep.subr.bf16.mxu1 %v3907_v40  ;;  %3773 = vmatpush3.bf16.msra.mxu0 %v3920_v43  ;;  %v4335_v43 = vpack.c.bf16 %v688_v16, %v687_v15  ;;  %v3916_v15 = vld [vmem:[%s5307_s1 + $0x28] sm:$0xff]   ;;  %v3918_v16 = vld [vmem:[%s5307_s1 + $0x60] sm:$0xff]  }
  0x44   : > { %1073 = vmatmul.mubr.bf16.gmra.mxu0 %v4268_v51  ;;  %v374_v44 = vmul.f32 %v3179_v29, %v4060_v13  ;;  %3774 = vmatprep.subr.bf16.mxu0 %v3925_v36  ;;  %v3911_v13 = vld [vmem:[%s5307_s1 + $0x38] sm:$0xff]   ;;  %v4413_v29 = vpack.c.bf16 %v692_v25, %v691_v24  ;;  %v3937_v47 = vld [vmem:[%s5307_s1 + $0x1e8] sm:$0xff]  }
  0x45   : > { %1169 = vmatmul.mubr.bf16.gmra.mxu1 %v726_v63  ;;  %1080 = vmatprep.mubr.bf16.mxu0 %v4279_v1  ;;  %v3914_v63 = vld [vmem:[%s5307_s1 + $0x30] sm:$0xff]  }
  0x46   : > { %3727 = vmatpush3.bf16.msra.mxu1 %v3907_v40  ;;  %3730 = vmatprep.mubr.bf16.mxu1 %v4285_v5  ;;  %v4330_v40 = vadd.f32 %v4066_v17, %v371_v31  ;;  %v4357_v55 = vadd.f32 %v4066_v17, %v374_v44  ;;  %v3928_v17 = vld [vmem:[%s5307_s1 + $0x80] sm:$0xff]   ;;  %v3923_v44 = vld [vmem:[%s5307_s1 + $0x50] sm:$0xff]   ;;  %v698_v32 = vld [vmem:[#allocation2 + $0xf8] sm:$0xff] }
  0x47   : > { %3728 = vmatprep.subr.bf16.mxu1 %v3909_v4  ;;  %3775 = vmatpush3.bf16.msra.mxu0 %v3925_v36  ;;  %v786_v31 = vld [vmem:[#allocation2 + $0x9a] sm:$0xff]  ;;  %v793_v6 = vld [vmem:[#allocation2 + $0xf2] sm:$0xff] }
  0x48   : > { %v442_v49 = vmax.f32 %v4330_v40, 0.0  ;;  %v445_v18 = vmax.f32 %v4357_v55, 0.0  ;;  %3776 = vmatprep.subr.bf16.mxu0 %v3928_v17  ;;  %v4418_v36 = vpack.c.bf16 %v786_v31, %v785_v34  ;;  %v695_v3 = vld [vmem:[#allocation2 + $0xd8] sm:$0xff]  ;;  %v4482_v34 = vpack.c.bf16 %v441_v28, %v440_v27  ;;  %v697_v31 = vld [vmem:[#allocation2 + $0xf0] sm:$0xff]  ;;  %v800_v27 = vld [vmem:[#allocation2 + $0x142] sm:$0xff] }
  0x49   : > { %v794_v56 = vld [vmem:[#allocation2 + $0xfa] sm:$0xff]  ;;  %v796_v26 = vld [vmem:[#allocation2 + $0x112] sm:$0xff]  ;;  %v4491_v28 = vpack.c.bf16 %v698_v32, %v697_v31  ;;  %v536_v55 = vld [vmem:[#allocation2 + $0x9] sm:$0xff] }
  0x4a   : > { %3729 = vmatpush3.bf16.msra.mxu1 %v3909_v4  ;;  %475 = vst [vmem:[#allocation2 + $0x109] sm:$0xff] %v442_v49  ;;  %478 = vst [vmem:[#allocation2 + $0x129] sm:$0xff] %v445_v18  ;;  %v4385_v4 = vpack.c.bf16 %v690_v58, %v689_v22  ;;  %v792_v22 = vld [vmem:[#allocation2 + $0xe2] sm:$0xff]  ;;  %v4476_v25 = vpack.c.bf16 %v794_v56, %v793_v6  ;;  %v804_v40 = vld [vmem:[#allocation2 + $0x172] sm:$0xff] }
  0x4b   : > { %3442 = vmatprep.subr.bf16.mxu1 %v3910_v37  ;;  %3777 = vmatpush3.bf16.msra.mxu0 %v3928_v17  ;;  %v4424_v37 = vpack.c.bf16 %v437_v57, %v436_v53  ;;  %v3924_v53 = vld [vmem:[%s5307_s1 + $0x10] sm:$0xff]   ;;  %v3926_v57 = vld [vmem:[%s5307_s1 + $0x48] sm:$0xff]   ;;  %v791_v17 = vld [vmem:[#allocation2 + $0xda] sm:$0xff] }
  0x4c   : > { %1081 = vmatmul.mubr.bf16.gmra.mxu0 %v4335_v43  ;;  %3578 = vmatprep.subr.bf16.mxu0 %v3932_v35  ;;  %v4526_v31 = vld [vmem:[#allocation2 + $0x8] sm:$0xff] }
  0x4d   : > { %3731 = vmatmul.mubr.bf16.vlgmr.msra.gmra.mxu1 %v4341_v46  ;;  %1088 = vmatprep.mubr.bf16.mxu0 %v4347_v48 }
  0x4e   : > { %3443 = vmatpush3.bf16.msra.mxu1 %v3911_v13  ;;  %3734 = vmatprep.mubr.bf16.mxu1 %v4354_v52  ;;  %v693_v13 = vld [vmem:[#allocation2 + $0xc0] sm:$0xff] }
  0x4f   : > { %3444 = vmatprep.subr.bf16.mxu1 %v3913_v14  ;;  %v694_v14 = vld [vmem:[#allocation2 + $0xc8] sm:$0xff] }
  0x50   : > { %v4444_v58 = vpack.c.bf16 %v694_v14, %v693_v13 }
  0x51   : > { %v795_v21 = vld [vmem:[#allocation2 + $0x10a] sm:$0xff]  ;;  %v797_v60 = vld [vmem:[#allocation2 + $0x122] sm:$0xff] }
  0x52   : > { %3445 = vmatpush3.bf16.msra.mxu1 %v3914_v63  ;;  %v4454_v63 = vpack.c.bf16 %v792_v22, %v791_v17  ;;  %v798_v33 = vld [vmem:[#allocation2 + $0x12a] sm:$0xff]  ;;  %v701_v17 = vld [vmem:[#allocation2 + $0x120] sm:$0xff] }
  0x53   : > { %3446 = vmatprep.subr.bf16.mxu1 %v3915_v0  ;;  %v696_v0 = vld [vmem:[#allocation2 + $0xe0] sm:$0xff]  ;;  %v4493_v35 = vpack.c.bf16 %v798_v33, %v797_v60  ;;  %v699_v13 = vld [vmem:[#allocation2 + $0x108] sm:$0xff]  ;;  %v700_v14 = vld [vmem:[#allocation2 + $0x110] sm:$0xff] }
  0x54   : > { %1089 = vmatmul.mubr.bf16.gmra.mxu0 %v4385_v4  ;;  %v4474_v24 = vpack.c.bf16 %v696_v0, %v695_v3  ;;  %v702_v22 = vld [vmem:[#allocation2 + $0x128] sm:$0xff]  ;;  %v3933_v60 = vld [vmem:[%s5307_s1 + $0x1b8] sm:$0xff]  }
  0x55   : > { %3735 = vmatmul.mubr.bf16.gmra.mxu1 %v4387_v10  ;;  %1096 = vmatprep.mubr.bf16.mxu0 %v4393_v11  ;;  %v806_v3 = vld [vmem:[#allocation2 + $0x18a] sm:$0xff]  ;;  %v583_v0 = vld [vmem:[#allocation2 + $0x2] sm:$0xff] }
  0x56   : > { %3738 = vmatprep.mubr.bf16.mxu1 %v4395_v12  ;;  %3447 = vmatpush3.bf16.msra.mxu1 %v3916_v15  ;;  %v3929_v15 = vld [vmem:[%s5307_s1 + $0x40] sm:$0xff]   ;;  %v615_v6 = vpack.c.bf16 %v584_v45, %v583_v0 }
  0x57   : > { %3448 = vmatprep.subr.bf16.mxu1 %v3918_v16  ;;  %v3930_v16 = vld [vmem:[%s5307_s1] sm:$0xff]  }
  0x58   : > { %v3954_v0 = vld [vmem:[%s5307_s1 + $0x200] sm:$0xff]  }
  0x59   : > { %v3950_v45 = vld [vmem:[%s5307_s1 + $0x180] sm:$0xff]  }
  0x5a   : > { %3449 = vmatpush3.bf16.msra.mxu1 %v3919_v20  ;;  %v4472_v20 = vld [vmem:[%s5307_s1 + $0x238] sm:$0xff]  }
  0x5b   : > { %3450 = vmatprep.subr.bf16.mxu1 %v3921_v19  ;;  %v4484_v19 = vpack.c.bf16 %v796_v26, %v795_v21  ;;  %v487_v21 = vld [vmem:[#allocation2] sm:$0xff] }
  0x5c   : > { %1097 = vmatmul.mubr.bf16.gmra.mxu0 %v4413_v29  ;;  %v537_v26 = vld [vmem:[#allocation2 + $0x19] sm:$0xff]  ;;  %v519_v32 = vpack.c.bf16 %v4526_v31, %v487_v21 }
  0x5d   : > { %3739 = vmatmul.mubr.bf16.gmra.mxu1 %v4418_v36  ;;  %1104 = vmatprep.mubr.bf16.mxu0 %v4424_v37  ;;  %v1814_v21 = vld [vmem:[#allocation2 + $0x98] sm:$0xff] }
  0x5e   : > { %3742 = vmatprep.mubr.bf16.mxu1 %v4426_v38  ;;  %3451 = vmatpush3.bf16.msra.mxu1 %v3922_v39  ;;  %v4499_v39 = vpack.c.bf16 %v443_v50, %v442_v49  ;;  %v4515_v49 = vpack.c.bf16 %v445_v18, %v444_v7  ;;  %v4523_v7 = vpack.c.bf16 %v702_v22, %v701_v17  ;;  %v3940_v17 = vld [vmem:[%s5307_s1 + $0x1a0] sm:$0xff]   ;;  %v3951_v22 = vld [vmem:[%s5307_s1 + $0x218] sm:$0xff]  }
  0x5f   : > { %3452 = vmatprep.subr.bf16.mxu1 %v3923_v44  ;;  %v4501_v44 = vpack.c.bf16 %v800_v27, %v799_v9  ;;  %v3934_v9 = vld [vmem:[%s5307_s1 + $0x1f0] sm:$0xff]  }
  0x60   : > { %v3936_v27 = vld [vmem:[%s5307_s1 + $0x230] sm:$0xff]  }
  0x62   : > { %3453 = vmatpush3.bf16.msra.mxu1 %v3924_v53  ;;  %v803_v53 = vld [vmem:[#allocation2 + $0x16a] sm:$0xff] }
  0x63   : > { %3454 = vmatprep.subr.bf16.mxu1 %v3926_v57  ;;  %v4507_v57 = vpack.c.bf16 %v700_v14, %v699_v13  ;;  %v4517_v50 = vpack.c.bf16 %v804_v40, %v803_v53  ;;  %v3935_v13 = vld [vmem:[%s5307_s1 + $0x1b0] sm:$0xff]   ;;  %v489_v14 = vld [vmem:[#allocation2 + $0x18] sm:$0xff]  ;;  %v3939_v40 = vld [vmem:[%s5307_s1 + $0x1e0] sm:$0xff]  }
  0x64   : > { %1105 = vmatmul.mubr.bf16.gmra.mxu0 %v4444_v58  ;;  %v520_v53 = vpack.c.bf16 %v490_v42, %v489_v14  ;;  %v513_v14 = vld [vmem:[#allocation2 + $0x138] sm:$0xff]  ;;  %v1815_v42 = vld [vmem:[#allocation2 + $0xa8] sm:$0xff] }
  0x65   : > { %3743 = vmatmul.mubr.bf16.gmra.mxu1 %v4446_v61  ;;  %1112 = vmatprep.mubr.bf16.mxu0 %v4452_v62 }
  0x66   : > { %3746 = vmatprep.mubr.bf16.mxu1 %v4454_v63  ;;  %3455 = vmatpush3.bf16.msra.mxu1 %v3927_v2  ;;  %v805_v2 = vld [vmem:[#allocation2 + $0x182] sm:$0xff] }
  0x67   : > { %3456 = vmatprep.subr.bf16.mxu1 %v3929_v15  ;;  %v535_v15 = vld [vmem:[#allocation2 + $0x1] sm:$0xff]  ;;  %v822_v18 = vpack.c.bf16 %v806_v3, %v805_v2  ;;  %v3952_v2 = vld [vmem:[%s5307_s1 + $0x210] sm:$0xff]  }
  0x68   : > { %v567_v56 = vpack.c.bf16 %v536_v55, %v535_v15  ;;  %v3945_v3 = vld [vmem:[%s5307_s1 + $0x190] sm:$0xff]   ;;  %v1812_v55 = vld [vmem:[#allocation2 + $0x80] sm:$0xff] }
  0x6a   : > { %3457 = vmatpush3.bf16.msra.mxu1 %v3930_v16  ;;  %v538_v16 = vld [vmem:[#allocation2 + $0x21] sm:$0xff] }
  0x6b   : > { %3810 = vmatprep.subr.bf16.mxu1 %v4472_v20  ;;  %v568_v33 = vpack.c.bf16 %v538_v16, %v537_v26  ;;  %v1863_v26 = vld [vmem:[#allocation2 + $0xa9] sm:$0xff]  ;;  %v1864_v16 = vld [vmem:[#allocation2 + $0xb1] sm:$0xff] }
  0x6c   : > { %1113 = vmatmul.mubr.bf16.gmra.mxu0 %v4474_v24 }
  0x6d   : > { %3747 = vmatmul.mubr.bf16.gmra.mxu1 %v4476_v25  ;;  %1120 = vmatprep.mubr.bf16.mxu0 %v4482_v34 }
  0x6e   : > { %3750 = vmatprep.mubr.bf16.mxu1 %v4484_v19 }
  0x74   : > { %1121 = vmatmul.mubr.bf16.gmra.mxu0 %v4491_v28 }
  0x75   : > { %3751 = vmatmul.mubr.bf16.gmra.mxu1 %v4493_v35  ;;  %1128 = vmatprep.mubr.bf16.mxu0 %v4499_v39 }
  0x76   : > { %3754 = vmatprep.mubr.bf16.mxu1 %v4501_v44 }
  0x7c   : > { %1129 = vmatmul.mubr.bf16.gmra.mxu0 %v4507_v57 }
  0x7d   : > { %3755 = vmatmul.mubr.bf16.gmra.mxu1 %v4509_v41  ;;  %1136 = vmatprep.mubr.bf16.mxu0 %v4515_v49 }
  0x7e   : > { %3758 = vmatprep.mubr.bf16.mxu1 %v4517_v50 }
  0x84   : > { %1137 = vmatmul.mubr.bf16.gmra.mxu0 %v4523_v7 }
  0x85   : > { %3759 = vmatmul.mubr.bf16.gmra.mxu1 %v822_v18  ;;  %3778 = vmatprep.mubr.bf16.mxu0 %v615_v6  ;;  %v1861_v18 = vld [vmem:[#allocation2 + $0x91] sm:$0xff]  ;;  %v1862_v6 = vld [vmem:[#allocation2 + $0x99] sm:$0xff] }
  0x86   : > { %1514 = vmatprep.mubr.bf16.mxu1 %v567_v56  ;;  %v1889_v56 = vpack.c.bf16 %v1862_v6, %v1861_v18 }
  0x8c   : > { %3779 = vmatmul.mubr.bf16.vlgmr.msra.gmra.mxu0 %v4285_v5  ;;  %v3941_v5 = vld [vmem:[%s5307_s1 + $0x228] sm:$0xff]  }
  0x8d   : > { %1515 = vmatmul.mubr.bf16.vlgmr.msra.gmra.mxu1 %v519_v32  ;;  %3579 = vmatpush3.bf16.msra.mxu0 %v3933_v60  ;;  %v561_v32 = vld [vmem:[#allocation2 + $0x139] sm:$0xff]  ;;  %v562_v60 = vld [vmem:[#allocation2 + $0x141] sm:$0xff] }
  0x8e   : > { %3811 = vmatpush3.bf16.msra.mxu1 %v4472_v20  ;;  %1522 = vmatprep.mubr.bf16.mxu1 %v568_v33  ;;  %v3938_v20 = vld [vmem:[%s5307_s1 + $0x1a8] sm:$0xff]  }
  0x8f   : > { %3782 = vmatprep.mubr.bf16.mxu0 %v4341_v46  ;;  %3580 = vmatprep.subr.bf16.mxu0 %v3934_v9  ;;  %v3946_v46 = vld [vmem:[%s5307_s1 + $0x220] sm:$0xff]   ;;  %v1890_v9 = vpack.c.bf16 %v1864_v16, %v1863_v26  ;;  %v518_v16 = vld [vmem:[#allocation2 + $0x170] sm:$0xff] }
  0x90   : > { %3812 = vmatprep.subr.bf16.mxu1 %v3936_v27 }
  0x91   : > { %3581 = vmatpush3.bf16.msra.mxu0 %v3935_v13 }
  0x92   : > { %3813 = vmatpush3.bf16.msra.mxu1 %v3936_v27  ;;  %3582 = vmatprep.subr.bf16.mxu0 %v3937_v47  ;;  %v4632_v27 = vpack.c.bf16 %v562_v60, %v561_v32  ;;  %v1816_v47 = vld [vmem:[#allocation2 + $0xb0] sm:$0xff]  ;;  %v1870_v60 = vld [vmem:[#allocation2 + $0xf9] sm:$0xff] }
  0x93   : > { %3814 = vmatprep.subr.bf16.mxu1 %v3941_v5  ;;  %v1869_v32 = vld [vmem:[#allocation2 + $0xf1] sm:$0xff] }
  0x94   : > { %3783 = vmatmul.mubr.bf16.gmra.mxu0 %v4354_v52  ;;  %v3942_v52 = vld [vmem:[%s5307_s1 + $0x1d8] sm:$0xff]  }
  0x95   : > { %1523 = vmatmul.mubr.bf16.gmra.mxu1 %v520_v53  ;;  %3786 = vmatprep.mubr.bf16.mxu0 %v4387_v10  ;;  %v3944_v10 = vld [vmem:[%s5307_s1 + $0x1d0] sm:$0xff]   ;;  %v1865_v53 = vld [vmem:[#allocation2 + $0xc1] sm:$0xff] }
  0x96   : > { %1530 = vmatprep.mubr.bf16.mxu1 %v4119_v8  ;;  %3583 = vmatpush3.bf16.msra.mxu0 %v3938_v20  ;;  %v3943_v8 = vld [vmem:[%s5307_s1 + $0x198] sm:$0xff]   ;;  %v1866_v20 = vld [vmem:[#allocation2 + $0xc9] sm:$0xff] }
  0x97   : > { %3584 = vmatprep.subr.bf16.mxu0 %v3939_v40  ;;  %3815 = vmatpush3.bf16.msra.mxu1 %v3941_v5 }
  0x98   : > { %3816 = vmatprep.subr.bf16.mxu1 %v3946_v46 }
  0x9a   : > { %3585 = vmatpush3.bf16.msra.mxu0 %v3940_v17  ;;  %v563_v17 = vld [vmem:[#allocation2 + $0x151] sm:$0xff] }
  0x9b   : > { %3586 = vmatprep.subr.bf16.mxu0 %v3942_v52  ;;  %3817 = vmatpush3.bf16.msra.mxu1 %v3946_v46  ;;  %v564_v52 = vld [vmem:[#allocation2 + $0x159] sm:$0xff] }
  0x9c   : > { %3787 = vmatmul.mubr.bf16.gmra.mxu0 %v4395_v12  ;;  %3818 = vmatprep.subr.bf16.mxu1 %v3951_v22  ;;  %v3947_v12 = vld [vmem:[%s5307_s1 + $0x1c8] sm:$0xff]  }
  0x9d   : > { %1531 = vmatmul.mubr.bf16.gmra.mxu1 %v4174_v54  ;;  %3790 = vmatprep.mubr.bf16.mxu0 %v4418_v36  ;;  %v3953_v54 = vld [vmem:[%s5307_s1 + $0x208] sm:$0xff]   ;;  %v3949_v36 = vld [vmem:[%s5307_s1 + $0x1c0] sm:$0xff]  }
  0x9e   : > { %1538 = vmatprep.mubr.bf16.mxu1 %v4182_v59  ;;  %3587 = vmatpush3.bf16.msra.mxu0 %v3943_v8  ;;  %v3948_v59 = vld [vmem:[%s5307_s1 + $0x188] sm:$0xff]  }
  0x9f   : > { %3588 = vmatprep.subr.bf16.mxu0 %v3944_v10  ;;  %3819 = vmatpush3.bf16.msra.mxu1 %v3951_v22  ;;  %v1842_v10 = vpack.c.bf16 %v1816_v47, %v1815_v42 }
  0xa0   : > { %3820 = vmatprep.subr.bf16.mxu1 %v3952_v2 }
  0xa2   : > { %3589 = vmatpush3.bf16.msra.mxu0 %v3945_v3 }
  0xa3   : > { %3590 = vmatprep.subr.bf16.mxu0 %v3947_v12  ;;  %3821 = vmatpush3.bf16.msra.mxu1 %v3952_v2  ;;  %v1891_v12 = vpack.c.bf16 %v1866_v20, %v1865_v53  ;;  %v1893_v53 = vpack.c.bf16 %v1870_v60, %v1869_v32  ;;  %v1909_v60 = vld [vmem:[#allocation2 + $0x92] sm:$0xff] }
  0xa4   : > { %3791 = vmatmul.mubr.bf16.gmra.mxu0 %v4426_v38  ;;  %3822 = vmatprep.subr.bf16.mxu1 %v3953_v54  ;;  %v1856_v38 = vld [vmem:[#allocation2 + $0x51] sm:$0xff] }
  0xa5   : > { %1539 = vmatmul.mubr.bf16.gmra.mxu1 %v4220_v23  ;;  %3794 = vmatprep.mubr.bf16.mxu0 %v4446_v61  ;;  %v1853_v23 = vld [vmem:[#allocation2 + $0x31] sm:$0xff] }
  0xa6   : > { %1546 = vmatprep.mubr.bf16.mxu1 %v4236_v30  ;;  %3591 = vmatpush3.bf16.msra.mxu0 %v3948_v59  ;;  %v1854_v30 = vld [vmem:[#allocation2 + $0x39] sm:$0xff]  ;;  %v4642_v59 = vpack.c.bf16 %v564_v52, %v563_v17 }
  0xa7   : > { %3592 = vmatprep.subr.bf16.mxu0 %v3949_v36  ;;  %3823 = vmatpush3.bf16.msra.mxu1 %v3953_v54 }
  0xa8   : > { %3824 = vmatprep.subr.bf16.mxu1 %v3954_v0 }
  0xaa   : > { %3593 = vmatpush3.bf16.msra.mxu0 %v3950_v45 }
  0xab   : > { %3825 = vmatpush3.bf16.msra.mxu1 %v3954_v0 }
  0xac   : > { %3795 = vmatmul.mubr.bf16.gmra.mxu0 %v4454_v63  ;;  %v1808_v63 = vld [vmem:[#allocation2 + $0x50] sm:$0xff] }
  0xad   : > { %1547 = vmatmul.mubr.bf16.gmra.mxu1 %v4268_v51  ;;  %3798 = vmatprep.mubr.bf16.mxu0 %v4476_v25  ;;  %v1885_v51 = vpack.c.bf16 %v1854_v30, %v1853_v23  ;;  %v1857_v25 = vld [vmem:[#allocation2 + $0x61] sm:$0xff] }
  0xae   : > { %1554 = vmatprep.mubr.bf16.mxu1 %v4279_v1  ;;  %v1805_v1 = vld [vmem:[#allocation2 + $0x30] sm:$0xff] }
  0xb4   : > { %3799 = vmatmul.mubr.bf16.gmra.mxu0 %v4484_v19  ;;  %v1858_v19 = vld [vmem:[#allocation2 + $0x69] sm:$0xff] }
  0xb5   : > { %1555 = vmatmul.mubr.bf16.gmra.mxu1 %v4335_v43  ;;  %3802 = vmatprep.mubr.bf16.mxu0 %v4493_v35  ;;  %v1806_v43 = vld [vmem:[#allocation2 + $0x38] sm:$0xff]  ;;  %v1887_v35 = vpack.c.bf16 %v1858_v19, %v1857_v25  ;;  %v565_v25 = vld [vmem:[#allocation2 + $0x169] sm:$0xff] }
  0xb6   : > { %1562 = vmatprep.mubr.bf16.mxu1 %v4347_v48  ;;  %v1855_v48 = vld [vmem:[#allocation2 + $0x49] sm:$0xff]  ;;  %v1837_v61 = vpack.c.bf16 %v1806_v43, %v1805_v1  ;;  %v1817_v1 = vld [vmem:[#allocation2 + $0xc0] sm:$0xff]  ;;  %v566_v19 = vld [vmem:[#allocation2 + $0x171] sm:$0xff] }
  0xb7   : > { %v1818_v43 = vld [vmem:[#allocation2 + $0xc8] sm:$0xff] }
  0xbc   : > { %3803 = vmatmul.mubr.bf16.gmra.mxu0 %v4501_v44  ;;  %v1810_v44 = vld [vmem:[#allocation2 + $0x68] sm:$0xff] }
  0xbd   : > { %1563 = vmatmul.mubr.bf16.gmra.mxu1 %v4385_v4  ;;  %3806 = vmatprep.mubr.bf16.mxu0 %v4509_v41  ;;  %v1886_v4 = vpack.c.bf16 %v1856_v38, %v1855_v48  ;;  %v1859_v41 = vld [vmem:[#allocation2 + $0x79] sm:$0xff] }
  0xbe   : > { %1570 = vmatprep.mubr.bf16.mxu1 %v4393_v11  ;;  %v1807_v11 = vld [vmem:[#allocation2 + $0x48] sm:$0xff]  ;;  %v516_v38 = vld [vmem:[#allocation2 + $0x158] sm:$0xff] }
  0xc4   : > { %3807 = vmatmul.mubr.bf16.gmra.mxu0 %v4517_v50  ;;  %v1860_v50 = vld [vmem:[#allocation2 + $0x81] sm:$0xff] }
  0xc5   : > { %1571 = vmatmul.mubr.bf16.gmra.mxu1 %v4413_v29  ;;  %2174 = vmatprep.mubr.bf16.mxu0 %v1885_v51  ;;  %v1838_v29 = vpack.c.bf16 %v1808_v63, %v1807_v11  ;;  %v1888_v15 = vpack.c.bf16 %v1860_v50, %v1859_v41  ;;  %v515_v51 = vld [vmem:[#allocation2 + $0x150] sm:$0xff] }
  0xc6   : > { %1578 = vmatprep.mubr.bf16.mxu1 %v4424_v37  ;;  %v1809_v37 = vld [vmem:[#allocation2 + $0x60] sm:$0xff]  ;;  %v4654_v41 = vpack.c.bf16 %v516_v38, %v515_v51 }
  0xcc   : > { %2175 = vmatmul.mubr.bf16.vlgmr.msra.gmra.mxu0 %v1837_v61  ;;  %v1867_v61 = vld [vmem:[#allocation2 + $0xd9] sm:$0xff] }
  0xcd   : > { %1579 = vmatmul.mubr.bf16.gmra.mxu1 %v4444_v58  ;;  %2182 = vmatprep.mubr.bf16.mxu0 %v1886_v4  ;;  %v1839_v58 = vpack.c.bf16 %v1810_v44, %v1809_v37  ;;  %v1868_v4 = vld [vmem:[#allocation2 + $0xe1] sm:$0xff]  ;;  %v1843_v37 = vpack.c.bf16 %v1818_v43, %v1817_v1 }
  0xce   : > { %1586 = vmatprep.mubr.bf16.mxu1 %v4452_v62  ;;  %v1811_v62 = vld [vmem:[#allocation2 + $0x78] sm:$0xff]  ;;  %v1892_v50 = vpack.c.bf16 %v1868_v4, %v1867_v61  ;;  %v1905_v43 = vld [vmem:[#allocation2 + $0x62] sm:$0xff] }
  0xd4   : > { %2183 = vmatmul.mubr.bf16.gmra.mxu0 %v1838_v29 }
  0xd5   : > { %1587 = vmatmul.mubr.bf16.gmra.mxu1 %v4474_v24  ;;  %2190 = vmatprep.mubr.bf16.mxu0 %v1887_v35  ;;  %v1840_v24 = vpack.c.bf16 %v1812_v55, %v1811_v62 }
  0xd6   : > { %1594 = vmatprep.mubr.bf16.mxu1 %v4482_v34  ;;  %v1813_v34 = vld [vmem:[#allocation2 + $0x90] sm:$0xff] }
  0xd7   : > { %v1841_v33 = vpack.c.bf16 %v1814_v21, %v1813_v34  ;;  %v1819_v34 = vld [vmem:[#allocation2 + $0xd8] sm:$0xff]  ;;  %v1820_v21 = vld [vmem:[#allocation2 + $0xe0] sm:$0xff] }
  0xd8   : > { %v1844_v47 = vpack.c.bf16 %v1820_v21, %v1819_v34  ;;  %v1908_v34 = vld [vmem:[#allocation2 + $0x82] sm:$0xff] }
  0xd9   : > { %v1873_v21 = vld [vmem:[#allocation2 + $0x121] sm:$0xff] }
  0xdc   : > { %2191 = vmatmul.mubr.bf16.gmra.mxu0 %v1839_v58 }
  0xdd   : > { %1595 = vmatmul.mubr.bf16.gmra.mxu1 %v4491_v28  ;;  %2198 = vmatprep.mubr.bf16.mxu0 %v1888_v15  ;;  %v4656_v15 = vpack.c.bf16 %v566_v19, %v565_v25 }
  0xde   : > { %1602 = vmatprep.mubr.bf16.mxu1 %v4499_v39 }
  0xe4   : > { %2199 = vmatmul.mubr.bf16.gmra.mxu0 %v1840_v24 }
  0xe5   : > { %1603 = vmatmul.mubr.bf16.gmra.mxu1 %v4507_v57  ;;  %2206 = vmatprep.mubr.bf16.mxu0 %v1889_v56  ;;  %v517_v56 = vld [vmem:[#allocation2 + $0x168] sm:$0xff] }
  0xe6   : > { %1610 = vmatprep.mubr.bf16.mxu1 %v4515_v49  ;;  %v514_v49 = vld [vmem:[#allocation2 + $0x140] sm:$0xff] }
  0xe7   : > { %v4640_v3 = vpack.c.bf16 %v514_v49, %v513_v14  ;;  %v4668_v49 = vpack.c.bf16 %v518_v16, %v517_v56 }
  0xec   : > { %v3322_v39 = vpop.f32.mrf.mxu0  ;;  %2207 = vmatmul.mubr.bf16.gmra.mxu0 %v1841_v33  ;;  %v3394_v13 = vpop.f32.mrf.mxu1 }
  0xed   : > { %1611 = vmatmul.mubr.bf16.gmra.mxu1 %v4523_v7  ;;  %2214 = vmatprep.mubr.bf16.mxu0 %v1890_v9 }
  0xee   : > { %v3323_v5 = vpop.f32.mrf.mxu0  ;;  %1618 = vmatprep.mubr.bf16.mxu1 %v4632_v27  ;;  %v3395_v46 = vpop.f32.mrf.mxu1 }
  0xef   : > { %v4636_v40 = vadd.f32 %v3323_v5, %v3322_v39  ;;  %v4638_v22 = vadd.f32 %v3395_v46, %v3394_v13  ;;  %v1901_v39 = vld [vmem:[#allocation2 + $0x32] sm:$0xff]  ;;  %v1902_v13 = vld [vmem:[#allocation2 + $0x3a] sm:$0xff] }
  0xf0   : > { %v3325_v8 = vpop.f32.mrf.mxu0  ;;  %v3397_v2 = vpop.f32.mrf.mxu1  ;;  %v1933_v46 = vpack.c.bf16 %v1902_v13, %v1901_v39 }
  0xf2   : > { %v3326_v54 = vpop.f32.mrf.mxu0  ;;  %v3398_v0 = vpop.f32.mrf.mxu1 }
  0xf3   : > { %v4644_v36 = vadd.f32 %v3326_v54, %v3325_v8  ;;  %v4646_v45 = vadd.f32 %v3398_v0, %v3397_v2  ;;  %v1904_v0 = vld [vmem:[#allocation2 + $0x52] sm:$0xff] }
  0xf4   : > { %v3328_v23 = vpop.f32.mrf.mxu0  ;;  %2215 = vmatmul.mubr.bf16.gmra.mxu0 %v1842_v10  ;;  %v3400_v30 = vpop.f32.mrf.mxu1 }
  0xf5   : > { %1619 = vmatmul.mubr.bf16.gmra.mxu1 %v4640_v3  ;;  %2222 = vmatprep.mubr.bf16.mxu0 %v1891_v12  ;;  %v1903_v12 = vld [vmem:[#allocation2 + $0x4a] sm:$0xff] }
  0xf6   : > { %v3329_v48 = vpop.f32.mrf.mxu0  ;;  %1626 = vmatprep.mubr.bf16.mxu1 %v4642_v59  ;;  %v3401_v63 = vpop.f32.mrf.mxu1 }
  0xf7   : > { %v4650_v11 = vadd.f32 %v3329_v48, %v3328_v23  ;;  %v4652_v29 = vadd.f32 %v3401_v63, %v3400_v30  ;;  %v1871_v23 = vld [vmem:[#allocation2 + $0x109] sm:$0xff]  ;;  %v1872_v30 = vld [vmem:[#allocation2 + $0x111] sm:$0xff]  ;;  %v1934_v63 = vpack.c.bf16 %v1904_v0, %v1903_v12 }
  0xf8   : > { %v3331_v35 = vpop.f32.mrf.mxu0  ;;  %v3403_v44 = vpop.f32.mrf.mxu1  ;;  %v1906_v48 = vld [vmem:[#allocation2 + $0x6a] sm:$0xff]  ;;  %v1894_v25 = vpack.c.bf16 %v1872_v30, %v1871_v23  ;;  %v1913_v30 = vld [vmem:[#allocation2 + $0xc2] sm:$0xff] }
  0xfa   : > { %v3332_v58 = vpop.f32.mrf.mxu0  ;;  %v3404_v55 = vpop.f32.mrf.mxu1 }
  0xfb   : > { %v4658_v62 = vadd.f32 %v3332_v58, %v3331_v35  ;;  %v4660_v18 = vadd.f32 %v3404_v55, %v3403_v44  ;;  %v1935_v35 = vpack.c.bf16 %v1906_v48, %v1905_v43 }
  0xfc   : > { %v3334_v6 = vpop.f32.mrf.mxu0  ;;  %2223 = vmatmul.mubr.bf16.gmra.mxu0 %v1843_v37 }
  0xfd   : > { %v3406_v24 = vpop.f32.mrf.mxu1  ;;  %1627 = vmatmul.mubr.bf16.gmra.mxu1 %v4654_v41  ;;  %2230 = vmatprep.mubr.bf16.mxu0 %v1892_v50 }
  0xfe   : > { %v3335_v26 = vpop.f32.mrf.mxu0  ;;  %1634 = vmatprep.mubr.bf16.mxu1 %v4656_v15 }
  0xff   : > { %v4664_v33 = vadd.f32 %v3335_v26, %v3334_v6  ;;  %v3407_v9 = vpop.f32.mrf.mxu1  ;;  %v1907_v6 = vld [vmem:[#allocation2 + $0x7a] sm:$0xff]  ;;  %v1874_v26 = vld [vmem:[#allocation2 + $0x129] sm:$0xff] }
 0x100   : > { %v4666_v14 = vadd.f32 %v3407_v9, %v3406_v24  ;;  %v3337_v42 = vpop.f32.mrf.mxu0  ;;  %v1910_v9 = vld [vmem:[#allocation2 + $0x9a] sm:$0xff] }
 0x101   : > { %v3409_v5 = vpop.f32.mrf.mxu1 }
 0x102   : > { %v3338_v20 = vpop.f32.mrf.mxu0 }
 0x103   : > { %v4670_v17 = vadd.f32 %v3338_v20, %v3337_v42  ;;  %v3410_v52 = vpop.f32.mrf.mxu1  ;;  %v1936_v42 = vpack.c.bf16 %v1908_v34, %v1907_v6  ;;  %v1917_v34 = vld [vmem:[#allocation2 + $0xf2] sm:$0xff] }
 0x104   : > { %v4672_v8 = vadd.f32 %v3410_v52, %v3409_v5  ;;  %v3340_v10 = vpop.f32.mrf.mxu0  ;;  %2231 = vmatmul.mubr.bf16.gmra.mxu0 %v1844_v47  ;;  %v1895_v47 = vpack.c.bf16 %v1874_v26, %v1873_v21  ;;  %v1918_v21 = vld [vmem:[#allocation2 + $0xfa] sm:$0xff] }
 0x105   : > { %v3412_v2 = vpop.f32.mrf.mxu1  ;;  %1635 = vmatmul.mubr.bf16.gmra.mxu1 %v4668_v49  ;;  %2238 = vmatprep.mubr.bf16.mxu0 %v1893_v53  ;;  %v1937_v53 = vpack.c.bf16 %v1910_v9, %v1909_v60 }
 0x106   : > { %v3341_v54 = vpop.f32.mrf.mxu0  ;;  %3826 = vmatprep.mubr.bf16.mxu1 %v1933_v46 }
 0x107   : > { %v3342_v51 = vadd.f32 %v3341_v54, %v3340_v10  ;;  %v3413_v1 = vpop.f32.mrf.mxu1  ;;  %v1911_v54 = vld [vmem:[#allocation2 + $0xaa] sm:$0xff] }
 0x108   : > { %v4675_v38 = vadd.f32 %v3413_v1, %v3412_v2  ;;  %v3343_v61 = vpop.f32.mrf.mxu0  ;;  %v1914_v1 = vld [vmem:[#allocation2 + $0xca] sm:$0xff] }
 0x109   : > { %v3415_v4 = vpop.f32.mrf.mxu1 }
 0x10a   : > { %v3344_v19 = vpop.f32.mrf.mxu0 }
 0x10b   : > { %v3345_v37 = vadd.f32 %v3344_v19, %v3343_v61  ;;  %v3416_v44 = vpop.f32.mrf.mxu1 }
 0x10c   : > { %v4677_v50 = vadd.f32 %v3416_v44, %v3415_v4  ;;  %v3346_v58 = vpop.f32.mrf.mxu0  ;;  %2239 = vmatmul.mubr.bf16.gmra.mxu0 %v4491_v28 }
 0x10d   : > { %v3732_v55 = vpop.f32.mrf.mxu1  ;;  %3827 = vmatmul.mubr.bf16.vlgmr.msra.gmra.mxu1 %v1934_v63  ;;  %2246 = vmatprep.mubr.bf16.mxu0 %v1894_v25  ;;  %v1939_v63 = vpack.c.bf16 %v1914_v1, %v1913_v30 }
 0x10e   : > { %v4681_v24 = vadd.f32 %v3732_v55, %v4650_v11  ;;  %v3347_v56 = vpop.f32.mrf.mxu0  ;;  %3830 = vmatprep.mubr.bf16.mxu1 %v1935_v35  ;;  %v1916_v55 = vld [vmem:[#allocation2 + $0xe2] sm:$0xff] }
 0x10f   : > { %v3348_v16 = vadd.f32 %v3347_v56, %v3346_v58  ;;  %v1211_v32 = vpop.f32.mrf.mxu1 }
 0x110   : > { %v4684_v39 = vadd.f32 %v4636_v40, %v1211_v32  ;;  %v3349_v28 = vpop.f32.mrf.mxu0 }
 0x111   : > { %v3733_v13 = vpop.f32.mrf.mxu1 }
 0x112   : > { %v4687_v5 = vadd.f32 %v3733_v13, %v4658_v62  ;;  %v3350_v11 = vpop.f32.mrf.mxu0  ;;  %v1912_v62 = vld [vmem:[#allocation2 + $0xb2] sm:$0xff] }
 0x113   : > { %v3351_v20 = vadd.f32 %v3350_v11, %v3349_v28  ;;  %v1214_v46 = vpop.f32.mrf.mxu1  ;;  %v1938_v61 = vpack.c.bf16 %v1912_v62, %v1911_v54  ;;  %v1941_v28 = vpack.c.bf16 %v1918_v21, %v1917_v34  ;;  %v1922_v54 = vld [vmem:[#allocation2 + $0x12a] sm:$0xff] }
 0x114   : > { %v4690_v52 = vadd.f32 %v4644_v36, %v1214_v46  ;;  %v3352_v10 = vpop.f32.mrf.mxu0  ;;  %2247 = vmatmul.mubr.bf16.gmra.mxu0 %v4507_v57  ;;  %v1920_v46 = vld [vmem:[#allocation2 + $0x112] sm:$0xff] }
 0x115   : > { %v3736_v2 = vpop.f32.mrf.mxu1  ;;  %3831 = vmatmul.mubr.bf16.gmra.mxu1 %v1936_v42  ;;  %2254 = vmatprep.mubr.bf16.mxu0 %v1895_v47 }
 0x116   : > { %v4693_v40 = vadd.f32 %v3736_v2, %v3342_v51  ;;  %v3353_v12 = vpop.f32.mrf.mxu0  ;;  %3834 = vmatprep.mubr.bf16.mxu1 %v1937_v53  ;;  %v1919_v53 = vld [vmem:[#allocation2 + $0x10a] sm:$0xff] }
 0x117   : > { %v3354_v0 = vadd.f32 %v3353_v12, %v3352_v10  ;;  %v1227_v23 = vpop.f32.mrf.mxu1  ;;  %v1921_v12 = vld [vmem:[#allocation2 + $0x122] sm:$0xff]  ;;  %v1942_v30 = vpack.c.bf16 %v1920_v46, %v1919_v53  ;;  %v1927_v53 = vld [vmem:[#allocation2 + $0x16a] sm:$0xff] }
 0x118   : > { %v4696_v43 = vadd.f32 %v4664_v33, %v1227_v23  ;;  %v3355_v36 = vpop.f32.mrf.mxu0  ;;  %v1943_v1 = vpack.c.bf16 %v1922_v54, %v1921_v12  ;;  %v1884_v12 = vld [vmem:[#allocation2 + $0x1a1] sm:$0xff] }
 0x119   : > { %v3737_v48 = vpop.f32.mrf.mxu1 }
 0x11a   : > { %v4698_v57 = vadd.f32 %v3737_v48, %v3345_v37  ;;  %v3356_v4 = vpop.f32.mrf.mxu0  ;;  %v1915_v37 = vld [vmem:[#allocation2 + $0xda] sm:$0xff] }
 0x11b   : > { %v3357_v51 = vadd.f32 %v3356_v4, %v3355_v36  ;;  %v1230_v25 = vpop.f32.mrf.mxu1  ;;  %v1940_v60 = vpack.c.bf16 %v1916_v55, %v1915_v37 }
 0x11c   : > { %v4701_v19 = vadd.f32 %v4670_v17, %v1230_v25  ;;  %v3358_v35 = vpop.f32.mrf.mxu0  ;;  %2255 = vmatmul.mubr.bf16.gmra.mxu0 %v4523_v7 }
 0x11d   : > { %v3740_v44 = vpop.f32.mrf.mxu1  ;;  %3835 = vmatmul.mubr.bf16.gmra.mxu1 %v1938_v61  ;;  %2262 = vmatprep.mubr.bf16.mxu0 %v4632_v27 }
 0x11e   : > { %v4705_v33 = vadd.f32 %v3740_v44, %v3354_v0  ;;  %v3359_v58 = vpop.f32.mrf.mxu0  ;;  %3838 = vmatprep.mubr.bf16.mxu1 %v1939_v63  ;;  %v1881_v44 = vld [vmem:[#allocation2 + $0x181] sm:$0xff] }
 0x11f   : > { %v3360_v6 = vadd.f32 %v3359_v58, %v3358_v35  ;;  %v1243_v56 = vpop.f32.mrf.mxu1  ;;  %v1924_v35 = vld [vmem:[#allocation2 + $0x142] sm:$0xff] }
 0x120   : > { %v4707_v26 = vadd.f32 %v3348_v16, %v1243_v56  ;;  %v3361_v17 = vpop.f32.mrf.mxu0  ;;  %v1882_v58 = vld [vmem:[#allocation2 + $0x189] sm:$0xff]  ;;  %v1926_v56 = vld [vmem:[#allocation2 + $0x15a] sm:$0xff] }
 0x121   : > { %v3741_v32 = vpop.f32.mrf.mxu1 }
 0x122   : > { %v4709_v7 = vadd.f32 %v3741_v32, %v3357_v51  ;;  %v3362_v9 = vpop.f32.mrf.mxu0  ;;  %v1923_v51 = vld [vmem:[#allocation2 + $0x13a] sm:$0xff]  ;;  %v1899_v32 = vpack.c.bf16 %v1882_v58, %v1881_v44 }
 0x123   : > { %v3363_v27 = vadd.f32 %v3362_v9, %v3361_v17  ;;  %v1246_v13 = vpop.f32.mrf.mxu1  ;;  %v1944_v17 = vpack.c.bf16 %v1924_v35, %v1923_v51 }
 0x124   : > { %v4711_v42 = vadd.f32 %v3351_v20, %v1246_v13  ;;  %v3364_v47 = vpop.f32.mrf.mxu0  ;;  %2263 = vmatmul.mubr.bf16.gmra.mxu0 %v4640_v3 }
 0x125   : > { %v3744_v11 = vpop.f32.mrf.mxu1  ;;  %3839 = vmatmul.mubr.bf16.gmra.mxu1 %v1940_v60  ;;  %2270 = vmatprep.mubr.bf16.mxu0 %v4642_v59 }
 0x126   : > { %v3365_v16 = vpop.f32.mrf.mxu0  ;;  %3842 = vmatprep.mubr.bf16.mxu1 %v1941_v28 }
 0x127   : > { %v3366_v10 = vadd.f32 %v3365_v16, %v3364_v47  ;;  %v1259_v2 = vpop.f32.mrf.mxu1  ;;  %v1834_v16 = vld [vmem:[#allocation2 + $0x188] sm:$0xff] }
 0x128   : > { %v4715_v62 = vadd.f32 %v3360_v6, %v1259_v2  ;;  %v3367_v0 = vpop.f32.mrf.mxu0  ;;  %v1925_v6 = vld [vmem:[#allocation2 + $0x152] sm:$0xff] }
 0x129   : > { %v4717_v20 = vadd.f32 %v3744_v11, %v3366_v10  ;;  %v3745_v23 = vpop.f32.mrf.mxu1  ;;  %v1945_v9 = vpack.c.bf16 %v1926_v56, %v1925_v6  ;;  %v1833_v11 = vld [vmem:[#allocation2 + $0x180] sm:$0xff]  ;;  %v1928_v10 = vld [vmem:[#allocation2 + $0x172] sm:$0xff] }
 0x12a   : > { %v3368_v3 = vpop.f32.mrf.mxu0  ;;  %v1883_v2 = vld [vmem:[#allocation2 + $0x199] sm:$0xff] }
 0x12b   : > { %v3369_v36 = vadd.f32 %v3368_v3, %v3367_v0  ;;  %v1262_v48 = vpop.f32.mrf.mxu1  ;;  %v1835_v6 = vld [vmem:[#allocation2 + $0x198] sm:$0xff] }
 0x12c   : > { %v4719_v59 = vadd.f32 %v3363_v27, %v1262_v48  ;;  %v3370_v61 = vpop.f32.mrf.mxu0  ;;  %2271 = vmatmul.mubr.bf16.gmra.mxu0 %v4654_v41  ;;  %v1946_v48 = vpack.c.bf16 %v1928_v10, %v1927_v53 }
 0x12d   : > { %v4722_v4 = vadd.f32 %v3745_v23, %v3369_v36  ;;  %v3748_v63 = vpop.f32.mrf.mxu1  ;;  %3843 = vmatmul.mubr.bf16.gmra.mxu1 %v1942_v30  ;;  %2278 = vmatprep.mubr.bf16.mxu0 %v4656_v15  ;;  %v1929_v23 = vld [vmem:[#allocation2 + $0x182] sm:$0xff]  ;;  %v1930_v30 = vld [vmem:[#allocation2 + $0x18a] sm:$0xff] }
 0x12e   : > { %v3371_v25 = vpop.f32.mrf.mxu0  ;;  %3846 = vmatprep.mubr.bf16.mxu1 %v1943_v1  ;;  %v1851_v1 = vpack.c.bf16 %v1834_v16, %v1833_v11 }
 0x12f   : > { %v3372_v37 = vadd.f32 %v3371_v25, %v3370_v61  ;;  %v1275_v55 = vpop.f32.mrf.mxu1  ;;  %v1900_v61 = vpack.c.bf16 %v1884_v12, %v1883_v2  ;;  %v1947_v25 = vpack.c.bf16 %v1930_v30, %v1929_v23 }
 0x130   : > { %v3373_v34 = vpop.f32.mrf.mxu0 }
 0x131   : > { %v4725_v21 = vadd.f32 %v3372_v37, %v1275_v55  ;;  %v3749_v41 = vpop.f32.mrf.mxu1 }
 0x132   : > { %v3374_v60 = vpop.f32.mrf.mxu0 }
 0x133   : > { %v3375_v28 = vadd.f32 %v3374_v60, %v3373_v34  ;;  %v1278_v15 = vpop.f32.mrf.mxu1  ;;  %v1931_v34 = vld [vmem:[#allocation2 + $0x19a] sm:$0xff] }
 0x134   : > { %v3376_v27 = vpop.f32.mrf.mxu0  ;;  %2279 = vmatmul.mubr.bf16.gmra.mxu0 %v4668_v49 }
 0x135   : > { %v4728_v13 = vadd.f32 %v3375_v28, %v1278_v15  ;;  %v3752_v47 = vpop.f32.mrf.mxu1  ;;  %3847 = vmatmul.mubr.bf16.gmra.mxu1 %v1944_v17  ;;  %2286 = vmatprep.mubr.bf16.mxu0 %v1899_v32  ;;  %v1932_v17 = vld [vmem:[#allocation2 + $0x1a2] sm:$0xff] }
 0x136   : > { %v3377_v46 = vpop.f32.mrf.mxu0  ;;  %3850 = vmatprep.mubr.bf16.mxu1 %v1945_v9  ;;  %v1948_v11 = vpack.c.bf16 %v1932_v17, %v1931_v34 }
 0x137   : > { %v3378_v54 = vadd.f32 %v3377_v46, %v3376_v27  ;;  %v1291_v0 = vpop.f32.mrf.mxu1 }
 0x138   : > { %v3379_v3 = vpop.f32.mrf.mxu0 }
 0x139   : > { %v4730_v49 = vadd.f32 %v3748_v63, %v3378_v54  ;;  %v3753_v36 = vpop.f32.mrf.mxu1 }
 0x13a   : > { %v3380_v51 = vpop.f32.mrf.mxu0 }
 0x13b   : > { %v3381_v35 = vadd.f32 %v3380_v51, %v3379_v3  ;;  %v1294_v44 = vpop.f32.mrf.mxu1 }
 0x13c   : > { %v3382_v58 = vpop.f32.mrf.mxu0  ;;  %2287 = vmatmul.mubr.bf16.gmra.mxu0 %v1851_v1 }
 0x13d   : > { %v4732_v37 = vadd.f32 %v3749_v41, %v3381_v35  ;;  %v3756_v55 = vpop.f32.mrf.mxu1  ;;  %3851 = vmatmul.mubr.bf16.gmra.mxu1 %v1946_v48  ;;  %2294 = vmatprep.mubr.bf16.mxu0 %v1900_v61  ;;  %v1852_v41 = vpack.c.bf16 %v4526_v31, %v1835_v6 }
 0x13e   : > { %v4735_v56 = vadd.f32 %v3756_v55, %v4652_v29  ;;  %v3383_v63 = vpop.f32.mrf.mxu0  ;;  %3854 = vmatprep.mubr.bf16.mxu1 %v1947_v25 }
 0x13f   : > { %v3384_v32 = vadd.f32 %v3383_v63, %v3382_v58  ;;  %v1307_v60 = vpop.f32.mrf.mxu1 }
 0x140   : > { %v4738_v9 = vadd.f32 %v4638_v22, %v1307_v60  ;;  %v3385_v28 = vpop.f32.mrf.mxu0 }
 0x141   : > { %v4741_v15 = vadd.f32 %v3384_v32, %v1291_v0  ;;  %v3757_v27 = vpop.f32.mrf.mxu1 }
 0x142   : > { %v4744_v16 = vadd.f32 %v3757_v27, %v4660_v18  ;;  %v3386_v29 = vpop.f32.mrf.mxu0 }
 0x143   : > { %v3387_v53 = vadd.f32 %v3386_v29, %v3385_v28  ;;  %v1310_v46 = vpop.f32.mrf.mxu1 }
 0x144   : > { %v4747_v10 = vadd.f32 %v4646_v45, %v1310_v46  ;;  %v3388_v2 = vpop.f32.mrf.mxu0  ;;  %2295 = vmatmul.mubr.bf16.gmra.mxu0 %v1852_v41 }
 0x145   : > { %v4749_v22 = vadd.f32 %v3387_v53, %v1294_v44  ;;  %v3760_v12 = vpop.f32.mrf.mxu1  ;;  %3855 = vmatmul.mubr.bf16.gmra.mxu1 %v1948_v11 }
 0x146   : > { %v4752_v31 = vadd.f32 %v3760_v12, %v4675_v38  ;;  %v3389_v54 = vpop.f32.mrf.mxu0 }
 0x147   : > { %v3390_v0 = vadd.f32 %v3389_v54, %v3388_v2  ;;  %v1323_v23 = vpop.f32.mrf.mxu1 }
 0x148   : > { %v4755_v18 = vadd.f32 %v4666_v14, %v1323_v23  ;;  %v3391_v30 = vpop.f32.mrf.mxu0 }
 0x149   : > { %v4757_v3 = vadd.f32 %v3752_v47, %v3390_v0  ;;  %v3761_v45 = vpop.f32.mrf.mxu1 }
 0x14a   : > { %v4760_v1 = vadd.f32 %v3761_v45, %v4677_v50  ;;  %v3392_v48 = vpop.f32.mrf.mxu0 }
 0x14b   : > { %v3393_v61 = vadd.f32 %v3392_v48, %v3391_v30  ;;  %v1326_v51 = vpop.f32.mrf.mxu1 }
 0x14c   : > { %5313 = vst [vmem:[#allocation3_spill] sm:$0xff] %v4760_v1  ;;  %v4763_v25 = vadd.f32 %v4672_v8, %v1326_v51  ;;  %v3780_v38 = vpop.f32.mrf.mxu0 }
 0x14d   : > { %v4765_v35 = vadd.f32 %v3753_v36, %v3393_v61  ;;  %v3458_v44 = vpop.f32.mrf.mxu1 }
 0x14e   : > { %v1677_v58 = vpop.f32.mrf.mxu0 }
 0x14f   : > { %v3459_v14 = vpop.f32.mrf.mxu1 }
 0x150   : > { %v3460_v55 = vadd.f32 %v3459_v14, %v3458_v44  ;;  %v3781_v6 = vpop.f32.mrf.mxu0 }
 0x151   : > { %v3461_v47 = vpop.f32.mrf.mxu1 }
 0x152   : > { %v1517_v63 = vadd.f32 %v3460_v55, %v4684_v39  ;;  %v1680_v34 = vpop.f32.mrf.mxu0 }
 0x153   : > { %v3462_v50 = vpop.f32.mrf.mxu1 }
 0x154   : > { %v4768_v17 = vadd.f32 %v1677_v58, %v1517_v63  ;;  %v3463_v32 = vadd.f32 %v3462_v50, %v3461_v47  ;;  %v3784_v60 = vpop.f32.mrf.mxu0 }
 0x155   : > { %v3464_v28 = vpop.f32.mrf.mxu1 }
 0x156   : > { %v1520_v8 = vadd.f32 %v3463_v32, %v4690_v52  ;;  %v1693_v41 = vpop.f32.mrf.mxu0 }
 0x157   : > { %v3465_v36 = vpop.f32.mrf.mxu1 }
 0x158   : > { %v4771_v27 = vadd.f32 %v1680_v34, %v1520_v8  ;;  %v3466_v11 = vadd.f32 %v3465_v36, %v3464_v28  ;;  %v3785_v29 = vpop.f32.mrf.mxu0 }
 0x159   : > { %v3467_v53 = vpop.f32.mrf.mxu1 }
 0x15a   : > { %v1525_v46 = vadd.f32 %v3466_v11, %v4681_v24  ;;  %v1696_v2 = vpop.f32.mrf.mxu0 }
 0x15b   : > { %v3468_v39 = vpop.f32.mrf.mxu1 }
 0x15c   : > { %v3469_v12 = vadd.f32 %v3468_v39, %v3467_v53  ;;  %v3788_v54 = vpop.f32.mrf.mxu0  ;;  %v4774_v0 = vadd.f32 %v3780_v38, %v1525_v46 }
 0x15d   : > { %v3470_v23 = vpop.f32.mrf.mxu1 }
 0x15e   : > { %v1528_v30 = vadd.f32 %v3469_v12, %v4687_v5  ;;  %v1709_v45 = vpop.f32.mrf.mxu0 }
 0x15f   : > { %v3471_v52 = vpop.f32.mrf.mxu1 }
 0x160   : > { %v3472_v48 = vadd.f32 %v3471_v52, %v3470_v23  ;;  %v3789_v61 = vpop.f32.mrf.mxu0  ;;  %v4777_v51 = vadd.f32 %v3781_v6, %v1528_v30 }
 0x161   : > { %v3473_v44 = vpop.f32.mrf.mxu1 }
 0x162   : > { %v1533_v58 = vadd.f32 %v3472_v48, %v4696_v43  ;;  %v1712_v14 = vpop.f32.mrf.mxu0 }
 0x163   : > { %v3474_v24 = vpop.f32.mrf.mxu1 }
 0x164   : > { %v3475_v55 = vadd.f32 %v3474_v24, %v3473_v44  ;;  %v4780_v47 = vpop.f32.mrf.mxu0  ;;  %v4782_v63 = vadd.f32 %v1693_v41, %v1533_v58 }
 0x165   : > { %v3476_v38 = vpop.f32.mrf.mxu1 }
 0x166   : > { %v1536_v34 = vadd.f32 %v3475_v55, %v4701_v19  ;;  %v1725_v5 = vpop.f32.mrf.mxu0 }
 0x167   : > { %v3477_v50 = vpop.f32.mrf.mxu1 }
 0x168   : > { %v3478_v32 = vadd.f32 %v3477_v50, %v3476_v38  ;;  %v4785_v28 = vpop.f32.mrf.mxu0  ;;  %v4787_v6 = vadd.f32 %v1696_v2, %v1536_v34 }
 0x169   : > { %v3479_v8 = vpop.f32.mrf.mxu1 }
 0x16a   : > { %v1541_v43 = vadd.f32 %v3478_v32, %v4693_v40  ;;  %v1728_v36 = vpop.f32.mrf.mxu0 }
 0x16b   : > { %v3480_v11 = vpop.f32.mrf.mxu1 }
 0x16c   : > { %v3481_v53 = vadd.f32 %v3480_v11, %v3479_v8  ;;  %v4790_v46 = vpop.f32.mrf.mxu0  ;;  %v4792_v41 = vadd.f32 %v3784_v60, %v1541_v43 }
 0x16d   : > { %v3482_v39 = vpop.f32.mrf.mxu1 }
 0x16e   : > { %v1544_v19 = vadd.f32 %v3481_v53, %v4698_v57  ;;  %v4795_v12 = vpop.f32.mrf.mxu0 }
 0x16f   : > { %v3483_v23 = vpop.f32.mrf.mxu1 }
 0x170   : > { %v3484_v30 = vadd.f32 %v3483_v23, %v3482_v39  ;;  %v4797_v52 = vpop.f32.mrf.mxu0  ;;  %v4799_v2 = vadd.f32 %v3785_v29, %v1544_v19 }
 0x171   : > { %v3485_v48 = vpop.f32.mrf.mxu1 }
 0x172   : > { %v1549_v40 = vadd.f32 %v3484_v30, %v4707_v26  ;;  %v4802_v44 = vpop.f32.mrf.mxu0 }
 0x173   : > { %v3486_v58 = vpop.f32.mrf.mxu1 }
 0x174   : > { %v3487_v24 = vadd.f32 %v3486_v58, %v3485_v48  ;;  %v4804_v60 = vpop.f32.mrf.mxu0  ;;  %v4806_v55 = vadd.f32 %v1709_v45, %v1549_v40 }
 0x175   : > { %v3488_v57 = vpop.f32.mrf.mxu1 }
 0x176   : > { %v1552_v38 = vadd.f32 %v3487_v24, %v4711_v42  ;;  %v4809_v34 = vpop.f32.mrf.mxu0 }
 0x177   : > { %v3489_v50 = vpop.f32.mrf.mxu1 }
 0x178   : > { %v3490_v32 = vadd.f32 %v3489_v50, %v3488_v57  ;;  %v4811_v29 = vpop.f32.mrf.mxu0  ;;  %v4813_v8 = vadd.f32 %v1712_v14, %v1552_v38 }
 0x179   : > { %v3491_v26 = vpop.f32.mrf.mxu1 }
 0x17a   : > { %v1557_v43 = vadd.f32 %v3490_v32, %v4705_v33  ;;  %v4816_v11 = vpop.f32.mrf.mxu0 }
 0x17b   : > { %v3492_v53 = vpop.f32.mrf.mxu1 }
 0x17c   : > { %v3493_v39 = vadd.f32 %v3492_v53, %v3491_v26  ;;  %v4818_v45 = vpop.f32.mrf.mxu0  ;;  %v4820_v19 = vadd.f32 %v3788_v54, %v1557_v43 }
 0x17d   : > { %v3494_v42 = vpop.f32.mrf.mxu1 }
 0x17e   : > { %v1560_v23 = vadd.f32 %v3493_v39, %v4709_v7  ;;  %v4823_v30 = vpop.f32.mrf.mxu0 }
 0x17f   : > { %v3495_v48 = vpop.f32.mrf.mxu1 }
 0x180   : > { %v3496_v40 = vadd.f32 %v3495_v48, %v3494_v42  ;;  %v4825_v14 = vpop.f32.mrf.mxu0  ;;  %v4827_v58 = vadd.f32 %v3789_v61, %v1560_v23 }
 0x181   : > { %v3497_v33 = vpop.f32.mrf.mxu1 }
 0x182   : > { %v1565_v24 = vadd.f32 %v3496_v40, %v4715_v62  ;;  %v4830_v57 = vpop.f32.mrf.mxu0 }
 0x183   : > { %v3498_v38 = vpop.f32.mrf.mxu1 }
 0x184   : > { %v3499_v50 = vadd.f32 %v3498_v38, %v3497_v33  ;;  %v4832_v54 = vpop.f32.mrf.mxu0  ;;  %v4834_v32 = vadd.f32 %v1725_v5, %v1565_v24 }
 0x185   : > { %5314 = vst [vmem:[#allocation4_spill] sm:$0xff] %v4832_v54  ;;  %v3500_v7 = vpop.f32.mrf.mxu1 }
 0x186   : > { %v1568_v26 = vadd.f32 %v3499_v50, %v4719_v59  ;;  %v4837_v43 = vpop.f32.mrf.mxu0 }
 0x187   : > { %v3501_v53 = vpop.f32.mrf.mxu1 }
 0x188   : > { %v3502_v39 = vadd.f32 %v3501_v53, %v3500_v7  ;;  %v4839_v61 = vpop.f32.mrf.mxu0  ;;  %v4841_v42 = vadd.f32 %v1728_v36, %v1568_v26 }
 0x189   : > { %5315 = vst [vmem:[#allocation5_spill] sm:$0xff] %v4839_v61  ;;  %v3503_v62 = vpop.f32.mrf.mxu1 }
 0x18a   : > { %v1573_v23 = vadd.f32 %v3502_v39, %v4717_v20  ;;  %v4844_v48 = vpop.f32.mrf.mxu0 }
 0x18b   : > { %v3504_v40 = vpop.f32.mrf.mxu1 }
 0x18c   : > { %v3505_v33 = vadd.f32 %v3504_v40, %v3503_v62  ;;  %v3594_v5 = vpop.f32.mrf.mxu0  ;;  %v4847_v24 = vadd.f32 %v4780_v47, %v1573_v23 }
 0x18d   : > { %v3506_v59 = vpop.f32.mrf.mxu1 }
 0x18e   : > { %v1576_v38 = vadd.f32 %v3505_v33, %v4722_v4  ;;  %v3595_v50 = vpop.f32.mrf.mxu0 }
 0x18f   : > { %v3507_v7 = vpop.f32.mrf.mxu1  ;;  %v4850_v53 = vadd.f32 %v3595_v50, %v3594_v5 }
 0x190   : > { %v3508_v36 = vadd.f32 %v3507_v7, %v3506_v59  ;;  %v4852_v26 = vpop.f32.mrf.mxu0  ;;  %v4855_v20 = vadd.f32 %v4785_v28, %v1576_v38 }
 0x191   : > { %v3509_v39 = vpop.f32.mrf.mxu1 }
 0x192   : > { %v1581_v62 = vadd.f32 %v3508_v36, %v4725_v21  ;;  %v4858_v40 = vpop.f32.mrf.mxu0 }
 0x193   : > { %v3510_v47 = vpop.f32.mrf.mxu1 }
 0x194   : > { %v3511_v23 = vadd.f32 %v3510_v47, %v3509_v39  ;;  %v4860_v61 = vpop.f32.mrf.mxu0  ;;  %v4863_v4 = vadd.f32 %v4795_v12, %v1581_v62 }
 0x195   : > { %v3512_v33 = vpop.f32.mrf.mxu1 }
 0x196   : > { %v1584_v5 = vadd.f32 %v3511_v23, %v4728_v13  ;;  %v4866_v59 = vpop.f32.mrf.mxu0 }
 0x197   : > { %v3513_v50 = vpop.f32.mrf.mxu1 }
 0x198   : > { %v3514_v28 = vadd.f32 %v3513_v50, %v3512_v33  ;;  %v4868_v38 = vpop.f32.mrf.mxu0  ;;  %v4871_v21 = vadd.f32 %v4802_v44, %v1584_v5 }
 0x199   : > { %v3515_v7 = vpop.f32.mrf.mxu1 }
 0x19a   : > { %5316 = vst [vmem:[#allocation6_spill] sm:$0xff] %v4871_v21  ;;  %v1589_v36 = vadd.f32 %v3514_v28, %v4730_v49  ;;  %v4874_v39 = vpop.f32.mrf.mxu0 }
 0x19b   : > { %v3516_v47 = vpop.f32.mrf.mxu1 }
 0x19c   : > { %v3517_v12 = vadd.f32 %v3516_v47, %v3515_v7  ;;  %v4876_v62 = vpop.f32.mrf.mxu0  ;;  %v4879_v13 = vadd.f32 %v4790_v46, %v1589_v36 }
 0x19d   : > { %v3518_v23 = vpop.f32.mrf.mxu1 }
 0x19e   : > { %v1592_v33 = vadd.f32 %v3517_v12, %v4732_v37  ;;  %v4882_v50 = vpop.f32.mrf.mxu0 }
 0x19f   : > { %v3519_v54 = vpop.f32.mrf.mxu1 }
 0x1a0   : > { %v3520_v44 = vadd.f32 %v3519_v54, %v3518_v23  ;;  %v4884_v5 = vpop.f32.mrf.mxu0  ;;  %v4887_v49 = vadd.f32 %v4797_v52, %v1592_v33 }
 0x1a1   : > { %v3521_v28 = vpop.f32.mrf.mxu1 }
 0x1a2   : > { %5317 = vst [vmem:[#allocation7_spill] sm:$0xff] %v4887_v49  ;;  %v1597_v7 = vadd.f32 %v3520_v44, %v4741_v15  ;;  %v4890_v47 = vpop.f32.mrf.mxu0 }
 0x1a3   : > { %v3522_v1 = vpop.f32.mrf.mxu1 }
 0x1a4   : > { %v3523_v46 = vadd.f32 %v3522_v1, %v3521_v28  ;;  %v4892_v36 = vpop.f32.mrf.mxu0  ;;  %v4895_v37 = vadd.f32 %v4809_v34, %v1597_v7 }
 0x1a5   : > { %v3524_v12 = vpop.f32.mrf.mxu1 }
 0x1a6   : > { %5318 = vst [vmem:[#allocation8_spill] sm:$0xff] %v4895_v37  ;;  %v1600_v54 = vadd.f32 %v3523_v46, %v4749_v22  ;;  %v4898_v23 = vpop.f32.mrf.mxu0 }
 0x1a7   : > { %v3525_v21 = vpop.f32.mrf.mxu1 }
 0x1a8   : > { %v3526_v52 = vadd.f32 %v3525_v21, %v3524_v12  ;;  %v4900_v33 = vpop.f32.mrf.mxu0  ;;  %v4903_v15 = vadd.f32 %v4816_v11, %v1600_v54 }
 0x1a9   : > { %v3527_v44 = vpop.f32.mrf.mxu1 }
 0x1aa   : > { %5319 = vst [vmem:[#allocation9_spill] sm:$0xff] %v4903_v15  ;;  %v1605_v1 = vadd.f32 %v3526_v52, %v4757_v3  ;;  %v4906_v28 = vpop.f32.mrf.mxu0 }
 0x1ab   : > { %v3528_v49 = vpop.f32.mrf.mxu1 }
 0x1ac   : > { %v3529_v34 = vadd.f32 %v3528_v49, %v3527_v44  ;;  %v4908_v7 = vpop.f32.mrf.mxu0  ;;  %v4911_v22 = vadd.f32 %v4804_v60, %v1605_v1 }
 0x1ad   : > { %v3530_v46 = vpop.f32.mrf.mxu1 }
 0x1ae   : > { %5320 = vst [vmem:[#allocation10_spill] sm:$0xff] %v4911_v22  ;;  %v1608_v21 = vadd.f32 %v3529_v34, %v4765_v35  ;;  %v4914_v12 = vpop.f32.mrf.mxu0 }
 0x1af   : > { %v3531_v37 = vpop.f32.mrf.mxu1 }
 0x1b0   : > { %v3532_v11 = vadd.f32 %v3531_v37, %v3530_v46  ;;  %v4916_v54 = vpop.f32.mrf.mxu0  ;;  %v4919_v3 = vadd.f32 %v4811_v29, %v1608_v21 }
 0x1b1   : > { %v3533_v52 = vpop.f32.mrf.mxu1 }
 0x1b2   : > { %5321 = vst [vmem:[#allocation11_spill] sm:$0xff] %v4919_v3  ;;  %v1613_v49 = vadd.f32 %v3532_v11, %v4738_v9  ;;  %v4922_v44 = vpop.f32.mrf.mxu0 }
 0x1b3   : > { %v3534_v15 = vpop.f32.mrf.mxu1 }
 0x1b4   : > { %v3535_v60 = vadd.f32 %v3534_v15, %v3533_v52  ;;  %v4924_v1 = vpop.f32.mrf.mxu0  ;;  %v4927_v35 = vadd.f32 %v4823_v30, %v1613_v49 }
 0x1b5   : > { %v3536_v34 = vpop.f32.mrf.mxu1 }
 0x1b6   : > { %5322 = vst [vmem:[#allocation12_spill] sm:$0xff] %v4927_v35  ;;  %v1616_v37 = vadd.f32 %v3535_v60, %v4747_v10  ;;  %v4930_v46 = vpop.f32.mrf.mxu0 }
 0x1b7   : > { %v3537_v22 = vpop.f32.mrf.mxu1 }
 0x1b8   : > { %v3538_v29 = vadd.f32 %v3537_v22, %v3536_v34  ;;  %v4932_v21 = vpop.f32.mrf.mxu0  ;;  %v4935_v9 = vadd.f32 %v4830_v57, %v1616_v37 }
 0x1b9   : > { %v3539_v11 = vpop.f32.mrf.mxu1 }
 0x1ba   : > { %5323 = vst [vmem:[#allocation13_spill] sm:$0xff] %v4935_v9  ;;  %v1621_v15 = vadd.f32 %v3538_v29, %v4735_v56  ;;  %v4938_v52 = vpop.f32.mrf.mxu0 }
 0x1bb   : > { %v3540_v3 = vpop.f32.mrf.mxu1 }
 0x1bc   : > { %v3541_v30 = vadd.f32 %v3540_v3, %v3539_v11  ;;  %v4940_v49 = vpop.f32.mrf.mxu0  ;;  %v4943_v10 = vadd.f32 %v4818_v45, %v1621_v15 }
 0x1bd   : > { %v3542_v60 = vpop.f32.mrf.mxu1 }
 0x1be   : > { %5324 = vst [vmem:[#allocation14_spill] sm:$0xff] %v4943_v10  ;;  %v1624_v22 = vadd.f32 %v3541_v30, %v4744_v16  ;;  %v4946_v34 = vpop.f32.mrf.mxu0 }
 0x1bf   : > { %v3543_v35 = vpop.f32.mrf.mxu1 }
 0x1c0   : > { %v3544_v57 = vadd.f32 %v3543_v35, %v3542_v60  ;;  %v4948_v37 = vpop.f32.mrf.mxu0  ;;  %v4951_v56 = vadd.f32 %v4825_v14, %v1624_v22 }
 0x1c1   : > { %v3545_v29 = vpop.f32.mrf.mxu1 }
 0x1c2   : > { %v1629_v3 = vadd.f32 %v3544_v57, %v4755_v18  ;;  %v4954_v11 = vpop.f32.mrf.mxu0 }
 0x1c3   : > { %v3546_v9 = vpop.f32.mrf.mxu1 }
 0x1c4   : > { %v3547_v45 = vadd.f32 %v3546_v9, %v3545_v29  ;;  %v4956_v15 = vpop.f32.mrf.mxu0  ;;  %v4959_v16 = vadd.f32 %v4837_v43, %v1629_v3 }
 0x1c5   : > { %v3548_v30 = vpop.f32.mrf.mxu1 }
 0x1c6   : > { %5325 = vst [vmem:[#allocation15_spill] sm:$0xff] %v4959_v16  ;;  %v1632_v35 = vadd.f32 %v3547_v45, %v4763_v25  ;;  %v4962_v60 = vpop.f32.mrf.mxu0 }
 0x1c7   : > { %v3549_v10 = vpop.f32.mrf.mxu1 }
 0x1c8   : > { %v3550_v14 = vadd.f32 %v3549_v10, %v3548_v30  ;;  %v4964_v22 = vpop.f32.mrf.mxu0  ;;  %v4967_v18 = vadd.f32 %v4844_v48, %v1632_v35  ;;  %v3602_v10 = vadd.f32 %v4866_v59, %v4860_v61  ;;  %v3605_v48 = vadd.f32 %v4874_v39, %v4868_v38 }
 0x1c9   : > { %v4969_v57 = vpop.f32.mrf.mxu1 }
 0x1ca   : > { %5326 = vst [vmem:[#allocation16_spill] sm:$0xff] %v4967_v18  ;;  %5327 = vst [vmem:[#allocation17_spill] sm:$0xff] %v4969_v57  ;;  %v4972_v9 = vadd.f32 %v3550_v14, %v4752_v31  ;;  %v4974_v29 = vpop.f32.mrf.mxu0 }
 0x1cb   : > { %v4976_v43 = vpop.f32.mrf.mxu1 }
 0x1cc   : > { %5328 = vst [vmem:[#allocation18_spill] sm:$0xff] %v4972_v9  ;;  %5329 = vst [vmem:[#allocation19_spill] sm:$0xff] %v4976_v43  ;;  %v4978_v3 = vpop.f32.mrf.mxu0  ;;  %v3599_v9 = vadd.f32 %v4858_v40, %v4852_v26 }
 0x1cd   : > { %v3828_v25 = vpop.f32.mrf.mxu1 }
 0x1ce   : > { %v4982_v45 = vpop.f32.mrf.mxu0  ;;  %v2346_v35 = vadd.f32 %v3828_v25, %v3602_v10  ;;  %v3614_v25 = vadd.f32 %v4898_v23, %v4892_v36 }
 0x1cf   : > { %v2337_v30 = vpop.f32.mrf.mxu1 }
 0x1d0   : > { %v2338_v31 = vadd.f32 %v4850_v53, %v2337_v30  ;;  %v4987_v14 = vpop.f32.mrf.mxu0  ;;  %v4997_v57 = vadd.f32 %v2346_v35, %v4774_v0  ;;  %v3608_v0 = vadd.f32 %v4882_v50, %v4876_v62 }
 0x1d1   : > { %v3829_v18 = vpop.f32.mrf.mxu1 }
 0x1d2   : > { %v4992_v16 = vadd.f32 %v2338_v31, %v4768_v17  ;;  %v2349_v61 = vadd.f32 %v3829_v18, %v3605_v48  ;;  %v4994_v59 = vpop.f32.mrf.mxu0  ;;  %v3617_v18 = vadd.f32 %v4906_v28, %v4900_v33 }
 0x1d3   : > { %v2340_v43 = vpop.f32.mrf.mxu1 }
 0x1d4   : > { %v5000_v38 = vadd.f32 %v2349_v61, %v4777_v51  ;;  %v2341_v53 = vadd.f32 %v3599_v9, %v2340_v43  ;;  %v5002_v39 = vpop.f32.mrf.mxu0 }
 0x1d5   : > { %v3832_v17 = vpop.f32.mrf.mxu1 }
 0x1d6   : > { %v3204_v51 = vpack.c.bf16 %v5000_v38, %v4997_v57  ;;  %v5018_v26 = vadd.f32 %v2341_v53, %v4771_v27  ;;  %v5020_v40 = vpop.f32.mrf.mxu0  ;;  %v2362_v36 = vadd.f32 %v3832_v17, %v3614_v25  ;;  %v3611_v27 = vadd.f32 %v4890_v47, %v4884_v5 }
 0x1d7   : > { %v2353_v23 = vpop.f32.mrf.mxu1  ;;  %v3626_v25 = vadd.f32 %v4930_v46, %v4924_v1  ;;  %v3629_v1 = vadd.f32 %v4938_v52, %v4932_v21 }
 0x1d8   : > { %3291 = vst [vmem:[%s5011_s22 + $0x8] sm:$0xff] %v3204_v51   ;;  %v3199_v9 = vpack.c.bf16 %v5018_v26, %v4992_v16  ;;  %v2656_v62 = vadd.f32 %v5018_v26, %v4992_v16  ;;  %v2354_v50 = vadd.f32 %v3608_v0, %v2353_v23  ;;  %v5029_v43 = vpop.f32.mrf.mxu0  ;;  %v5038_v33 = vadd.f32 %v2362_v36, %v4792_v41 }
 0x1d9   : > { %v3833_v10 = vpop.f32.mrf.mxu1  ;;  %v3620_v41 = vadd.f32 %v4914_v12, %v4908_v7 }
 0x1da   : > { %3200 = vst [vmem:[%s5011_s22] sm:$0xff] %v3199_v9   ;;  %v2657_v30 = vadd.f32 %v2656_v62, %v4997_v57  ;;  %v2365_v48 = vadd.f32 %v3833_v10, %v3617_v18  ;;  %v5035_v35 = vpop.f32.mrf.mxu0  ;;  %v5041_v31 = vadd.f32 %v2354_v50, %v4782_v63 }
 0x1db   : > { %v2356_v28 = vpop.f32.mrf.mxu1 }
 0x1dc   : > { %v2658_v61 = vadd.f32 %v2657_v30, %v5000_v38  ;;  %v5045_v53 = vadd.f32 %v2365_v48, %v4799_v2  ;;  %v2357_v5 = vadd.f32 %v3611_v27, %v2356_v28  ;;  %v5047_v47 = vpop.f32.mrf.mxu0  ;;  %v3638_v28 = vadd.f32 %v4962_v60, %v4956_v15 }
 0x1dd   : > { %v3836_v17 = vpop.f32.mrf.mxu1 }
 0x1de   : > { %v2659_v0 = vadd.f32 %v2658_v61, %v5041_v31  ;;  %v3214_v63 = vpack.c.bf16 %v5045_v53, %v5038_v33  ;;  %v5057_v51 = vadd.f32 %v2357_v5, %v4787_v6  ;;  %v5059_v2 = vpop.f32.mrf.mxu0  ;;  %v2378_v36 = vadd.f32 %v3836_v17, %v3626_v25 }
 0x1df   : > { %v2369_v23 = vpop.f32.mrf.mxu1  ;;  %v3623_v6 = vadd.f32 %v4922_v44, %v4916_v54 }
 0x1e0   : > { %3293 = vst [vmem:[%s5011_s22 + $0x18] sm:$0xff] %v3214_v63   ;;  %v3209_v46 = vpack.c.bf16 %v5057_v51, %v5041_v31  ;;  %v2660_v7 = vadd.f32 %v2659_v0, %v5057_v51  ;;  %v2370_v12 = vadd.f32 %v3620_v41, %v2369_v23  ;;  %v5067_v18 = vpop.f32.mrf.mxu0  ;;  %v5076_v21 = vadd.f32 %v2378_v36, %v4820_v19 }
 0x1e1   : > { %v3837_v9 = vpop.f32.mrf.mxu1  ;;  %v3632_v19 = vadd.f32 %v4946_v34, %v4940_v49  ;;  %v3641_v0 = vadd.f32 %v4974_v29, %v4964_v22  ;;  %v3635_v36 = vadd.f32 %v4954_v11, %v4948_v37  ;;  %v3650_v11 = vadd.f32 %v5020_v40, %v5002_v39 }
 0x1e2   : > { %3292 = vst [vmem:[%s5011_s22 + $0x10] sm:$0xff] %v3209_v46   ;;  %v2661_v62 = vadd.f32 %v2660_v7, %v5038_v33  ;;  %v2381_v50 = vadd.f32 %v3837_v9, %v3629_v1  ;;  %v5073_v10 = vpop.f32.mrf.mxu0  ;;  %v5079_v27 = vadd.f32 %v2370_v12, %v4806_v55 }
 0x1e3   : > { %v2372_v52 = vpop.f32.mrf.mxu1 }
 0x1e4   : > { %v2662_v30 = vadd.f32 %v2661_v62, %v5045_v53  ;;  %v5083_v48 = vadd.f32 %v2381_v50, %v4827_v58  ;;  %v2373_v54 = vadd.f32 %v3623_v6, %v2372_v52  ;;  %v3660_v44 = vpop.f32.mrf.mxu0 }
 0x1e5   : > { %v3840_v61 = vpop.f32.mrf.mxu1 }
 0x1e6   : > { %v2663_v5 = vadd.f32 %v2662_v30, %v5079_v27  ;;  %v3224_v55 = vpack.c.bf16 %v5083_v48, %v5076_v21  ;;  %v5093_v25 = vadd.f32 %v2373_v54, %v4813_v8  ;;  %v3661_v58 = vpop.f32.mrf.mxu0  ;;  %v2394_v17 = vadd.f32 %v3840_v61, %v3638_v28 }
 0x1e7   : > { %v2385_v41 = vpop.f32.mrf.mxu1  ;;  %v3653_v54 = vadd.f32 %v5035_v35, %v5029_v43  ;;  %v3647_v61 = vadd.f32 %v4994_v59, %v4987_v14  ;;  %v3662_v59 = vadd.f32 %v3661_v58, %v3660_v44 }
 0x1e8   : > { %3295 = vst [vmem:[%s5011_s22 + $0x28] sm:$0xff] %v3224_v55   ;;  %v3219_v15 = vpack.c.bf16 %v5093_v25, %v5079_v27  ;;  %v2664_v49 = vadd.f32 %v2663_v5, %v5093_v25  ;;  %v2386_v34 = vadd.f32 %v3632_v19, %v2385_v41  ;;  %v3663_v60 = vpop.f32.mrf.mxu0  ;;  %v5106_v46 = vadd.f32 %v2394_v17, %v4847_v24  ;;  %v5330_v41 = vld [vmem:[#allocation7_spill] sm:$0xff] }
 0x1e9   : > { %v3841_v63 = vpop.f32.mrf.mxu1  ;;  %v3644_v24 = vadd.f32 %v4982_v45, %v4978_v3 }
 0x1ea   : > { %3294 = vst [vmem:[%s5011_s22 + $0x20] sm:$0xff] %v3219_v15   ;;  %v2665_v8 = vadd.f32 %v2664_v49, %v5076_v21  ;;  %v2397_v23 = vadd.f32 %v3841_v63, %v3641_v0  ;;  %v3664_v1 = vpop.f32.mrf.mxu0  ;;  %v5109_v29 = vadd.f32 %v2386_v34, %v4834_v32  ;;  %v3656_v34 = vadd.f32 %v5059_v2, %v5047_v47 }
 0x1eb   : > { %v2388_v22 = vpop.f32.mrf.mxu1 }
 0x1ec   : > { %v2666_v7 = vadd.f32 %v2665_v8, %v5083_v48  ;;  %v5113_v12 = vadd.f32 %v2397_v23, %v4855_v20  ;;  %v2389_v9 = vadd.f32 %v3635_v36, %v2388_v22  ;;  %v3666_v37 = vpop.f32.mrf.mxu0 }
 0x1ed   : > { %v3844_v6 = vpop.f32.mrf.mxu1 }
 0x1ee   : > { %v2667_v62 = vadd.f32 %v2666_v7, %v5109_v29  ;;  %v3234_v32 = vpack.c.bf16 %v5113_v12, %v5106_v46  ;;  %v5123_v50 = vadd.f32 %v2389_v9, %v4841_v42  ;;  %v3667_v20 = vpop.f32.mrf.mxu0  ;;  %v2410_v52 = vadd.f32 %v3844_v6, %v3650_v11 }
 0x1ef   : > { %v2401_v30 = vpop.f32.mrf.mxu1  ;;  %v3665_v7 = vadd.f32 %v3664_v1, %v3663_v60  ;;  %v3659_v11 = vadd.f32 %v5073_v10, %v5067_v18  ;;  %v5333_v1 = vld [vmem:[#allocation8_spill] sm:$0xff] }
 0x1f0   : > { %3297 = vst [vmem:[%s5011_s22 + $0x38] sm:$0xff] %v3234_v32   ;;  %v3229_v39 = vpack.c.bf16 %v5123_v50, %v5109_v29  ;;  %v2668_v3 = vadd.f32 %v2667_v62, %v5123_v50  ;;  %v2402_v45 = vadd.f32 %v3644_v24, %v2401_v30  ;;  %v3669_v40 = vpop.f32.mrf.mxu0  ;;  %v5136_v55 = vadd.f32 %v2410_v52, %v4879_v13  ;;  %v5332_v32 = vld [vmem:[#allocation10_spill] sm:$0xff] }
 0x1f1   : > { %v3845_v28 = vpop.f32.mrf.mxu1 }
 0x1f2   : > { %3296 = vst [vmem:[%s5011_s22 + $0x30] sm:$0xff] %v3229_v39   ;;  %v2669_v42 = vadd.f32 %v2668_v3, %v5106_v46  ;;  %v2413_v19 = vadd.f32 %v3845_v28, %v3653_v54  ;;  %v3670_v5 = vpop.f32.mrf.mxu0  ;;  %v5139_v35 = vadd.f32 %v2402_v45, %v4863_v4  ;;  %v5331_v4 = vld [vmem:[#allocation6_spill] sm:$0xff]  ;;  %v5334_v39 = vld [vmem:[#allocation11_spill] sm:$0xff] }
 0x1f3   : > { %v2404_v43 = vpop.f32.mrf.mxu1 }
 0x1f4   : > { %v2670_v17 = vadd.f32 %v2669_v42, %v5113_v12  ;;  %v5143_v0 = vadd.f32 %v2413_v19, %v5330_v41  ;;  %v2405_v15 = vadd.f32 %v3647_v61, %v2404_v43  ;;  %v3672_v14 = vpop.f32.mrf.mxu0  ;;  %v3668_v61 = vadd.f32 %v3667_v20, %v3666_v37  ;;  %v5335_v43 = vld [vmem:[#allocation9_spill] sm:$0xff] }
 0x1f5   : > { %v3848_v49 = vpop.f32.mrf.mxu1 }
 0x1f6   : > { %v2671_v13 = vadd.f32 %v2670_v17, %v5139_v35  ;;  %v3244_v63 = vpack.c.bf16 %v5143_v0, %v5136_v55  ;;  %v5151_v36 = vadd.f32 %v2405_v15, %v5331_v4  ;;  %v3673_v8 = vpop.f32.mrf.mxu0  ;;  %v2426_v23 = vadd.f32 %v3848_v49, %v3662_v59 }
 0x1f7   : > { %v2417_v22 = vpop.f32.mrf.mxu1  ;;  %v3674_v10 = vadd.f32 %v3673_v8, %v3672_v14 }
 0x1f8   : > { %3299 = vst [vmem:[%s5011_s22 + $0x48] sm:$0xff] %v3244_v63   ;;  %v3239_v44 = vpack.c.bf16 %v5151_v36, %v5139_v35  ;;  %v2672_v58 = vadd.f32 %v2671_v13, %v5151_v36  ;;  %v2418_v9 = vadd.f32 %v3656_v34, %v2417_v22  ;;  %v3675_v47 = vpop.f32.mrf.mxu0  ;;  %v5162_v52 = vadd.f32 %v2426_v23, %v5332_v32  ;;  %v5336_v22 = vld [vmem:[#allocation14_spill] sm:$0xff] }
 0x1f9   : > { %v3849_v2 = vpop.f32.mrf.mxu1  ;;  %v3671_v63 = vadd.f32 %v3670_v5, %v3669_v40  ;;  %v5338_v5 = vld [vmem:[#allocation17_spill] sm:$0xff] }
 0x1fa   : > { %3298 = vst [vmem:[%s5011_s22 + $0x40] sm:$0xff] %v3239_v44   ;;  %v2673_v6 = vadd.f32 %v2672_v58, %v5136_v55  ;;  %v2429_v24 = vadd.f32 %v3849_v2, %v3665_v7  ;;  %v3676_v62 = vpop.f32.mrf.mxu0  ;;  %v5165_v30 = vadd.f32 %v2418_v9, %v5333_v1  ;;  %v5337_v58 = vld [vmem:[#allocation12_spill] sm:$0xff] }
 0x1fb   : > { %v2420_v60 = vpop.f32.mrf.mxu1  ;;  %v3677_v49 = vadd.f32 %v3676_v62, %v3675_v47 }
 0x1fc   : > { %v2674_v54 = vadd.f32 %v2673_v6, %v5143_v0  ;;  %v5169_v3 = vadd.f32 %v2429_v24, %v5334_v39  ;;  %v2421_v45 = vadd.f32 %v3659_v11, %v2420_v60  ;;  %v3678_v18 = vpop.f32.mrf.mxu0  ;;  %v5339_v6 = vld [vmem:[#allocation19_spill] sm:$0xff] }
 0x1fd   : > { %v3852_v28 = vpop.f32.mrf.mxu1  ;;  %v3553_v24 = vadd.f32 %v5339_v6, %v5338_v5 }
 0x1fe   : > { %v2675_v42 = vadd.f32 %v2674_v54, %v5165_v30  ;;  %v3254_v19 = vpack.c.bf16 %v5169_v3, %v5162_v52  ;;  %v5175_v17 = vadd.f32 %v2421_v45, %v5335_v43  ;;  %v3679_v41 = vpop.f32.mrf.mxu0  ;;  %v2442_v15 = vadd.f32 %v3852_v28, %v3674_v10  ;;  %v5340_v54 = vld [vmem:[#allocation13_spill] sm:$0xff] }
 0x1ff   : > { %v2433_v59 = vpop.f32.mrf.mxu1  ;;  %v3680_v32 = vadd.f32 %v3679_v41, %v3678_v18  ;;  %v5341_v18 = vld [vmem:[#allocation3_spill] sm:$0xff] }
 0x200   : > { %3301 = vst [vmem:[%s5011_s22 + $0x58] sm:$0xff] %v3254_v19   ;;  %v3249_v34 = vpack.c.bf16 %v5175_v17, %v5165_v30  ;;  %v2676_v14 = vadd.f32 %v2675_v42, %v5175_v17  ;;  %v2434_v13 = vadd.f32 %v3668_v61, %v2433_v59  ;;  %v3681_v37 = vpop.f32.mrf.mxu0  ;;  %v5184_v7 = vadd.f32 %v2442_v15, %v5336_v22  ;;  %v5343_v22 = vld [vmem:[#allocation18_spill] sm:$0xff] }
 0x201   : > { %v3853_v20 = vpop.f32.mrf.mxu1  ;;  %v1640_v43 = vadd.f32 %v3553_v24, %v5341_v18 }
 0x202   : > { %3300 = vst [vmem:[%s5011_s22 + $0x50] sm:$0xff] %v3249_v34   ;;  %v2677_v4 = vadd.f32 %v2676_v14, %v5162_v52  ;;  %v2445_v8 = vadd.f32 %v3853_v20, %v3677_v49  ;;  %v3682_v23 = vpop.f32.mrf.mxu0  ;;  %v5187_v9 = vadd.f32 %v2434_v13, %v5337_v58  ;;  %v5342_v20 = vld [vmem:[#allocation15_spill] sm:$0xff] }
 0x203   : > { %v2436_v44 = vpop.f32.mrf.mxu1  ;;  %v3683_v15 = vadd.f32 %v3682_v23, %v3681_v37 }
 0x204   : > { %v2678_v47 = vadd.f32 %v2677_v4, %v5169_v3  ;;  %v5191_v2 = vadd.f32 %v2445_v8, %v4951_v56  ;;  %v2437_v11 = vadd.f32 %v3671_v63, %v2436_v44  ;;  %v3684_v40 = vpop.f32.mrf.mxu0  ;;  %v5344_v44 = vld [vmem:[#allocation4_spill] sm:$0xff] }
 0x205   : > { %v3856_v62 = vpop.f32.mrf.mxu1  ;;  %v1798_v58 = vadd.f32 %v5344_v44, %v5343_v22 }
 0x206   : > { %v2679_v60 = vadd.f32 %v2678_v47, %v5187_v9  ;;  %v3264_v1 = vpack.c.bf16 %v5191_v2, %v5184_v7  ;;  %v5199_v39 = vadd.f32 %v2437_v11, %v5340_v54  ;;  %v3685_v45 = vpop.f32.mrf.mxu0  ;;  %v5345_v47 = vld [vmem:[#allocation5_spill] sm:$0xff] }
 0x207   : > { %v3686_v10 = vadd.f32 %v3685_v45, %v3684_v40  ;;  %v2449_v56 = vpop.f32.mrf.mxu1  ;;  %v1801_v37 = vadd.f32 %v5345_v47, %v1640_v43  ;;  %v5346_v40 = vld [vmem:[#allocation16_spill] sm:$0xff] }
 0x208   : > { %3303 = vst [vmem:[%s5011_s22 + $0x68] sm:$0xff] %v3264_v1   ;;  %v3259_v28 = vpack.c.bf16 %v5199_v39, %v5187_v9  ;;  %v2680_v61 = vadd.f32 %v2679_v60, %v5199_v39  ;;  %v2450_v42 = vadd.f32 %v3680_v32, %v2449_v56  ;;  %v3687_v19 = vpop.f32.mrf.mxu0 }
 0x209   : > { %v3857_v41 = vpop.f32.mrf.mxu1  ;;  %v2458_v34 = vadd.f32 %v3856_v62, %v3686_v10 }
 0x20a   : > { %3302 = vst [vmem:[%s5011_s22 + $0x60] sm:$0xff] %v3259_v28   ;;  %v2681_v59 = vadd.f32 %v2680_v61, %v5184_v7  ;;  %v3688_v49 = vpop.f32.mrf.mxu0  ;;  %v5209_v63 = vadd.f32 %v2450_v42, %v5342_v20 }
 0x20b   : > { %v3689_v14 = vadd.f32 %v3688_v49, %v3687_v19  ;;  %v2452_v13 = vpop.f32.mrf.mxu1  ;;  %v5219_v6 = vadd.f32 %v2458_v34, %v1798_v58 }
 0x20c   : > { %v2682_v4 = vadd.f32 %v2681_v59, %v5191_v2  ;;  %v2453_v8 = vadd.f32 %v3683_v15, %v2452_v13 }
 0x20d   : > { %v2461_v23 = vadd.f32 %v3857_v41, %v3689_v14 }
 0x20e   : > { %v2683_v11 = vadd.f32 %v2682_v4, %v5209_v63  ;;  %v5217_v5 = vadd.f32 %v2453_v8, %v5346_v40 }
 0x20f   : > { %v5221_v24 = vadd.f32 %v2461_v23, %v1801_v37 }
 0x210   : > { %v3269_v62 = vpack.c.bf16 %v5217_v5, %v5209_v63  ;;  %v2684_v32 = vadd.f32 %v2683_v11, %v5217_v5 }
 0x211   : > { %v3274_v60 = vpack.c.bf16 %v5221_v24, %v5219_v6 }
 0x212   : > { %3304 = vst [vmem:[%s5011_s22 + $0x70] sm:$0xff] %v3269_v62   ;;  %v2685_v1 = vadd.f32 %v2684_v32, %v5219_v6 }
 0x213   : > { %3305 = vst [vmem:[%s5011_s22 + $0x78] sm:$0xff] %v3274_v60  }
 0x214   : > { %v2686_v54 = vadd.f32 %v2685_v1, %v5221_v24 }
 0x216   : > { %v2687_v45 = vrot.slane %v2686_v54, 4 }
 0x218   : > { %v2688_v10 = vadd.f32 %v2687_v45, %v2686_v54 }
 0x21a   : > { %v2689_v56 = vrot.slane %v2688_v10, 2 }
 0x21c   : > { %v2690_v28 = vadd.f32 %v2689_v56, %v2688_v10 }
 0x21e   : > { %v2691_v61 = vrot.slane %v2690_v28, 1 }
 0x220   : > { %v2692_v42 = vadd.f32 %v2691_v61, %v2690_v28 }
 0x222   : > { %v5232_v19 = vmul.f32 0.00390625, %v2692_v42 }
 0x224   : > { %v2694_v18 = vsub.f32 %v4992_v16, %v5232_v19  ;;  %v2695_v43 = vsub.f32 %v5018_v26, %v5232_v19  ;;  %v2696_v41 = vsub.f32 %v4997_v57, %v5232_v19  ;;  %v2697_v49 = vsub.f32 %v5000_v38, %v5232_v19 }
 0x225   : > { %v2698_v34 = vsub.f32 %v5041_v31, %v5232_v19  ;;  %v2699_v20 = vsub.f32 %v5057_v51, %v5232_v19  ;;  %v2700_v26 = vsub.f32 %v5038_v33, %v5232_v19  ;;  %v2701_v22 = vsub.f32 %v5045_v53, %v5232_v19 }
 0x226   : > { %v2726_v15 = vmul.f32 %v2694_v18, %v2694_v18  ;;  %v2727_v59 = vmul.f32 %v2695_v43, %v2695_v43  ;;  %v2728_v14 = vmul.f32 %v2696_v41, %v2696_v41  ;;  %v2729_v16 = vmul.f32 %v2697_v49, %v2697_v49 }
 0x227   : > { %v2730_v8 = vmul.f32 %v2698_v34, %v2698_v34  ;;  %v2731_v44 = vmul.f32 %v2699_v20, %v2699_v20  ;;  %v2702_v31 = vsub.f32 %v5079_v27, %v5232_v19  ;;  %v2732_v58 = vmul.f32 %v2700_v26, %v2700_v26 }
 0x228   : > { %v2758_v13 = vadd.f32 %v2727_v59, %v2726_v15  ;;  %v2703_v51 = vsub.f32 %v5093_v25, %v5232_v19  ;;  %v2733_v37 = vmul.f32 %v2701_v22, %v2701_v22  ;;  %v2704_v33 = vsub.f32 %v5076_v21, %v5232_v19 }
 0x229   : > { %v2734_v11 = vmul.f32 %v2702_v31, %v2702_v31  ;;  %v2705_v53 = vsub.f32 %v5083_v48, %v5232_v19  ;;  %v2706_v27 = vsub.f32 %v5109_v29, %v5232_v19  ;;  %v2707_v25 = vsub.f32 %v5123_v50, %v5232_v19 }
 0x22a   : > { %v2759_v4 = vadd.f32 %v2758_v13, %v2728_v14  ;;  %v2735_v62 = vmul.f32 %v2703_v51, %v2703_v51  ;;  %v2736_v60 = vmul.f32 %v2704_v33, %v2704_v33  ;;  %v2708_v21 = vsub.f32 %v5106_v46, %v5232_v19 }
 0x22b   : > { %v2737_v54 = vmul.f32 %v2705_v53, %v2705_v53  ;;  %v2738_v10 = vmul.f32 %v2706_v27, %v2706_v27  ;;  %v2709_v48 = vsub.f32 %v5113_v12, %v5232_v19  ;;  %v2739_v28 = vmul.f32 %v2707_v25, %v2707_v25 }
 0x22c   : > { %v2760_v57 = vadd.f32 %v2759_v4, %v2729_v16  ;;  %v2710_v29 = vsub.f32 %v5139_v35, %v5232_v19  ;;  %v2740_v42 = vmul.f32 %v2708_v21, %v2708_v21  ;;  %v2711_v50 = vsub.f32 %v5151_v36, %v5232_v19 }
 0x22d   : > { %v2741_v43 = vmul.f32 %v2709_v48, %v2709_v48  ;;  %v2712_v46 = vsub.f32 %v5136_v55, %v5232_v19  ;;  %v2713_v12 = vsub.f32 %v5143_v0, %v5232_v19  ;;  %v2714_v35 = vsub.f32 %v5165_v30, %v5232_v19 }
 0x22e   : > { %v2761_v38 = vadd.f32 %v2760_v57, %v2730_v8  ;;  %v2742_v15 = vmul.f32 %v2710_v29, %v2710_v29  ;;  %v2743_v49 = vmul.f32 %v2711_v50, %v2711_v50  ;;  %v2715_v36 = vsub.f32 %v5175_v17, %v5232_v19 }
 0x22f   : > { %v2744_v14 = vmul.f32 %v2712_v46, %v2712_v46  ;;  %v2745_v20 = vmul.f32 %v2713_v12, %v2713_v12  ;;  %v2716_v55 = vsub.f32 %v5162_v52, %v5232_v19  ;;  %v2746_v4 = vmul.f32 %v2714_v35, %v2714_v35 }
 0x230   : > { %v2762_v47 = vadd.f32 %v2761_v38, %v2731_v44  ;;  %v2717_v0 = vsub.f32 %v5169_v3, %v5232_v19  ;;  %v2747_v8 = vmul.f32 %v2715_v36, %v2715_v36  ;;  %v2718_v30 = vsub.f32 %v5187_v9, %v5232_v19 }
 0x231   : > { %v2748_v22 = vmul.f32 %v2716_v55, %v2716_v55  ;;  %v2719_v17 = vsub.f32 %v5199_v39, %v5232_v19  ;;  %v2720_v52 = vsub.f32 %v5184_v7, %v5232_v19  ;;  %v2721_v3 = vsub.f32 %v5191_v2, %v5232_v19 }
 0x232   : > { %v2763_v23 = vadd.f32 %v2762_v47, %v2732_v58  ;;  %v2749_v38 = vmul.f32 %v2717_v0, %v2717_v0  ;;  %v2750_v58 = vmul.f32 %v2718_v30, %v2718_v30  ;;  %v2722_v9 = vsub.f32 %v5209_v63, %v5232_v19 }
 0x233   : > { %v2751_v51 = vmul.f32 %v2719_v17, %v2719_v17  ;;  %v2723_v39 = vsub.f32 %v5217_v5, %v5232_v19  ;;  %v2724_v7 = vsub.f32 %v5219_v6, %v5232_v19  ;;  %v2725_v2 = vsub.f32 %v5221_v24, %v5232_v19 }
 0x234   : > { %v2764_v40 = vadd.f32 %v2763_v23, %v2733_v37  ;;  %v2752_v23 = vmul.f32 %v2720_v52, %v2720_v52  ;;  %v2754_v53 = vmul.f32 %v2722_v9, %v2722_v9 }
 0x236   : > { %v2765_v32 = vadd.f32 %v2764_v40, %v2734_v11  ;;  %v2753_v11 = vmul.f32 %v2721_v3, %v2721_v3 }
 0x238   : > { %v2766_v1 = vadd.f32 %v2765_v32, %v2735_v62  ;;  %v2755_v32 = vmul.f32 %v2723_v39, %v2723_v39 }
 0x23a   : > { %v2767_v45 = vadd.f32 %v2766_v1, %v2736_v60  ;;  %v2756_v60 = vmul.f32 %v2724_v7, %v2724_v7  ;;  %v2757_v1 = vmul.f32 %v2725_v2, %v2725_v2 }
 0x23c   : > { %v2768_v56 = vadd.f32 %v2767_v45, %v2737_v54 }
 0x23e   : > { %v2769_v61 = vadd.f32 %v2768_v56, %v2738_v10 }
 0x240   : > { %v2770_v18 = vadd.f32 %v2769_v61, %v2739_v28 }
 0x242   : > { %v2771_v41 = vadd.f32 %v2770_v18, %v2740_v42 }
 0x244   : > { %v2772_v59 = vadd.f32 %v2771_v41, %v2741_v43 }
 0x246   : > { %v2773_v34 = vadd.f32 %v2772_v59, %v2742_v15 }
 0x248   : > { %v2774_v13 = vadd.f32 %v2773_v34, %v2743_v49 }
 0x24a   : > { %v2775_v16 = vadd.f32 %v2774_v13, %v2744_v14 }
 0x24c   : > { %v2776_v26 = vadd.f32 %v2775_v16, %v2745_v20 }
 0x24e   : > { %v2777_v57 = vadd.f32 %v2776_v26, %v2746_v4 }
 0x250   : > { %v2778_v44 = vadd.f32 %v2777_v57, %v2747_v8 }
 0x252   : > { %v2779_v31 = vadd.f32 %v2778_v44, %v2748_v22 }
 0x254   : > { %v2780_v47 = vadd.f32 %v2779_v31, %v2749_v38 }
 0x256   : > { %v2781_v37 = vadd.f32 %v2780_v47, %v2750_v58 }
 0x258   : > { %v2782_v33 = vadd.f32 %v2781_v37, %v2751_v51 }
 0x25a   : > { %v2783_v40 = vadd.f32 %v2782_v33, %v2752_v23 }
 0x25c   : > { %v2784_v62 = vadd.f32 %v2783_v40, %v2753_v11 }
 0x25e   : > { %v2785_v27 = vadd.f32 %v2784_v62, %v2754_v53 }
 0x260   : > { %v2786_v63 = vadd.f32 %v2785_v27, %v2755_v32 }
 0x262   : > { %v2787_v25 = vadd.f32 %v2786_v63, %v2756_v60 }
 0x264   : > { %v2788_v54 = vadd.f32 %v2787_v25, %v2757_v1 }
 0x266   : > { %v2789_v45 = vrot.slane %v2788_v54, 4 }
 0x268   : > { %v2790_v5 = vadd.f32 %v2789_v45, %v2788_v54 }
 0x26a   : > { %v2791_v21 = vrot.slane %v2790_v5, 2 }
 0x26c   : > { %v2792_v10 = vadd.f32 %v2791_v21, %v2790_v5 }
 0x26e   : > { %v2793_v56 = vrot.slane %v2792_v10, 1 }
 0x270   : > { %v2794_v6 = vadd.f32 %v2793_v56, %v2792_v10 }
 0x272   : > { %v2796_v24 = vsel %vm2795_vm0, %v5232_v19, %v2794_v6 }
 0x273   : > { %2797 = vst [vmem:[%s235_s24] sm:$0x3] %v2796_v24 }
 0x274 PF: > { %s16_s18 = sadd.s32 1, %s3962_s18  }
 0x275   : > { %p13_p4 = scmp.ge.s32.totalorder %s16_s18, 4  }
 0x277   :  { %15 = sbr.rel (!%p13_p4) target bundleno = 1 (0x1), region = 83 }

</bundles_post_ra>
